<compile_context>
chip_gen: v5e
topology: v5e:2x2
jax: 0.10.0
libtpu: 0.0.40
codegen_flags: <defaults>
</compile_context>

<pallas_src>
import functools

import jax
import jax.numpy as jnp
from jax.experimental import pallas as pl
from jax.experimental.pallas import tpu as pltpu

C1, C2, C3 = 64, 128, 32      # channel widths of the three conv stages


# ------------------------------------------------------------------
# Fused per-image kernel (one grid step == one image)
# ------------------------------------------------------------------
def _encoder_kernel(p1_ref, w1_ref, b1_ref, w2_ref, b2_ref,
                    w3_ref, b3_ref, wf_ref, bf_ref, o_ref,
                    xp2_ref, p2_ref, xp3_ref, p3_ref, fcin_ref, *, H):
    f32, bf16 = jnp.float32, jnp.bfloat16
    H1, H2, H3, H4 = H, H // 2, H // 4, H // 8

    def conv(patches, w_ref, b_ref):
        # One MXU push per layer: (h*h, 9*Cin) x (9*Cin, Cout), f32 accumulate.
        return jnp.dot(patches, w_ref[...],
                       preferred_element_type=f32) + b_ref[...]

    def pool_relu(y, h, c):
        # y: (h*h, c) conv output, rows in (row, col) row-major order.
        # 2x2 max pool as two pairwise VPU maxima (pair axes never cross an
        # image boundary because h is even), then ReLU.  Returns (h/2, h/2, c).
        y = y.reshape(h // 2, 2, h, c)
        y = jnp.maximum(y[:, 0], y[:, 1])                  # (h/2, h, c)
        y = y.reshape(h // 2, h // 2, 2, c)
        y = jnp.maximum(y[:, :, 0, :], y[:, :, 1, :])      # (h/2, h/2, c)
        return jnp.maximum(y, 0.0)

    def im2col(xpad_ref, p_ref, h, c_in):
        # xpad_ref: (h+2, h+2, c_in) zero-haloed activations (bf16).
        # Fills p_ref (h*h, 9*c_in) with the 3x3 taps, (dy, dx, cin) ordered.
        xpad = xpad_ref[...]
        for dy in range(3):
            for dx in range(3):
                j = dy * 3 + dx
                p_ref[:, j * c_in:(j + 1) * c_in] = (
                    xpad[dy:dy + h, dx:dx + h, :].reshape(h * h, c_in))

    # ---- stage 1: conv(3->64) + pool + relu (layer-1 im2col done in wrapper)
    a1 = pool_relu(conv(p1_ref[0], w1_ref, b1_ref), H1, C1)        # (H/2, H/2, 64)

    # ---- stage 2: conv(64->128) + pool + relu
    xp2_ref[...] = jnp.zeros(xp2_ref.shape, bf16)
    xp2_ref[1:H2 + 1, 1:H2 + 1, :] = a1.astype(bf16)
    im2col(xp2_ref, p2_ref, H2, C1)
    a2 = pool_relu(conv(p2_ref[...], w2_ref, b2_ref), H2, C2)      # (H/4, H/4, 128)

    # ---- stage 3: conv(128->32) + pool + relu
    xp3_ref[...] = jnp.zeros(xp3_ref.shape, bf16)
    xp3_ref[1:H3 + 1, 1:H3 + 1, :] = a2.astype(bf16)
    im2col(xp3_ref, p3_ref, H3, C2)
    a3 = pool_relu(conv(p3_ref[...], w3_ref, b3_ref), H3, C3)      # (H/8, H/8, 32)

    # ---- flatten in NHWC order (wf is pre-permuted to match) + FC + ReLU
    a3 = a3.astype(bf16)
    for hh in range(H4):
        for ww in range(H4):
            j = hh * H4 + ww
            fcin_ref[:, j * C3:(j + 1) * C3] = a3[hh, ww:ww + 1, :]
    out = jnp.dot(fcin_ref[...], wf_ref[...], preferred_element_type=f32)
    o_ref[0] = jnp.maximum(out + bf_ref[...], 0.0).astype(o_ref.dtype)


# ------------------------------------------------------------------
# Wrapper-side glue (tiny, one XLA op on the small NCHW input)
# ------------------------------------------------------------------
def _layer1_patches(x_nchw):
    """NCHW image -> (N, H*W, 27) bf16 im2col patches, (dy, dx, cin) ordered."""
    n, c, h, w = x_nchw.shape
    x = jnp.transpose(x_nchw, (0, 2, 3, 1))                      # NHWC
    xp = jnp.pad(x, ((0, 0), (1, 1), (1, 1), (0, 0)))
    cols = [xp[:, dy:dy + h, dx:dx + w, :]
            for dy in range(3) for dx in range(3)]
    p = jnp.concatenate(cols, axis=-1)                           # (N, H, W, 9*C)
    return p.reshape(n, h * w, 9 * c).astype(jnp.bfloat16)


def prepare_params(params, im_size):
    """One-time conversion of PyTorch-layout params into the kernel layout."""
    h4 = im_size // 8
    out = params["wf"].shape[-1]
    bf16, f32 = jnp.bfloat16, jnp.float32
    # PyTorch flatten order is (C, H, W); kernel flatten order is (H, W, C).
    wf = params["wf"].reshape(C3, h4, h4, out)
    wf = jnp.transpose(wf, (1, 2, 0, 3)).reshape(h4 * h4 * C3, out)
    return {
        "w1": params["w1"].reshape(9 * 3, C1).astype(bf16),
        "b1": params["b1"].astype(f32),
        "w2": params["w2"].reshape(9 * C1, C2).astype(bf16),
        "b2": params["b2"].astype(f32),
        "w3": params["w3"].reshape(9 * C2, C3).astype(bf16),
        "b3": params["b3"].astype(f32),
        "wf": wf.astype(bf16),
        "bf": params["bf"].astype(f32),
    }


def image_encoder_forward(x_nchw, kparams):
    n, _, h, w = x_nchw.shape
    assert h == w and h % 8 == 0, "im_size must be square and divisible by 8"
    out_size = kparams["bf"].shape[-1]
    h2, h3, h4 = h // 2, h // 4, h // 8

    p1 = _layer1_patches(x_nchw)                                 # (N, H*W, 27)
    kernel = functools.partial(_encoder_kernel, H=h)

    def const_spec(shape):
        nd = len(shape)
        return pl.BlockSpec(shape, lambda i, _nd=nd: (0,) * _nd)

    weights = (kparams["w1"], kparams["b1"], kparams["w2"], kparams["b2"],
               kparams["w3"], kparams["b3"], kparams["wf"], kparams["bf"])

    out3d = pl.pallas_call(
        kernel,
        out_shape=jax.ShapeDtypeStruct((n, 1, out_size), jnp.float32),
        grid=(n,),
        in_specs=[pl.BlockSpec((1, h * w, p1.shape[-1]), lambda i: (i, 0, 0))]
                 + [const_spec(a.shape) for a in weights],
        out_specs=pl.BlockSpec((1, 1, out_size), lambda i: (i, 0, 0)),
        scratch_shapes=[
            pltpu.VMEM((h2 + 2, h2 + 2, C1), jnp.bfloat16),   # padded act 1->2
            pltpu.VMEM((h2 * h2, 9 * C1), jnp.bfloat16),      # im2col patches L2
            pltpu.VMEM((h3 + 2, h3 + 2, C2), jnp.bfloat16),   # padded act 2->3
            pltpu.VMEM((h3 * h3, 9 * C2), jnp.bfloat16),      # im2col patches L3
            pltpu.VMEM((1, h4 * h4 * C3), jnp.bfloat16),      # FC input (NHWC flat)
        ],
        compiler_params=pltpu.CompilerParams(
            dimension_semantics=("parallel",)),
    )(p1, *weights)
    return out3d.reshape(n, out_size)


# ------------------------------------------------------------------
# Pure-JAX reference (PyTorch semantics, f32) + param init
# ------------------------------------------------------------------
def reference_forward(x_nchw, params):
    x = jnp.transpose(x_nchw, (0, 2, 3, 1))
    for w, b in ((params["w1"], params["b1"]),
                 (params["w2"], params["b2"]),
                 (params["w3"], params["b3"])):
        y = jax.lax.conv_general_dilated(
            x, w, window_strides=(1, 1), padding="SAME",
            dimension_numbers=("NHWC", "HWIO", "NHWC")) + b.reshape(1, 1, 1, -1)
        y = jax.lax.reduce_window(y, -jnp.inf, jax.lax.max,
                                  (1, 2, 2, 1), (1, 2, 2, 1), "VALID")
        x = jnp.maximum(y, 0.0)
    x = jnp.transpose(x, (0, 3, 1, 2)).reshape(x.shape[0], -1)   # NCHW flatten
    return jnp.maximum(x @ params["wf"] + params["bf"], 0.0)


def init_params(key, im_size, out_size):
    fc_size = (im_size // 2 ** 3) ** 2
    ks = jax.random.split(key, 8)
    s = 0.05
    return {
        "w1": jax.random.normal(ks[0], (3, 3, 3, C1), jnp.float32) * s,
        "b1": jax.random.normal(ks[1], (1, C1), jnp.float32) * s,
        "w2": jax.random.normal(ks[2], (3, 3, C1, C2), jnp.float32) * s,
        "b2": jax.random.normal(ks[3], (1, C2), jnp.float32) * s,
        "w3": jax.random.normal(ks[4], (3, 3, C2, C3), jnp.float32) * s,
        "b3": jax.random.normal(ks[5], (1, C3), jnp.float32) * s,
        "wf": jax.random.normal(ks[6], (fc_size * C3, out_size), jnp.float32) * s,
        "bf": jax.random.normal(ks[7], (1, out_size), jnp.float32) * s,
    }


if __name__ == "__main__":
    im_size, out_size, batch = 16, 32, 2

    key = jax.random.PRNGKey(0)
    k_x, k_p = jax.random.split(key)
    x_nchw = jax.random.normal(k_x, (batch, 3, im_size, im_size), jnp.float32)
    params = init_params(k_p, im_size, out_size)
    kparams = prepare_params(params, im_size)      # one-time repack (bf16, im2col K)

    fwd = jax.jit(image_encoder_forward)
    out = jax.block_until_ready(fwd(x_nchw, kparams))

    ref = jax.block_until_ready(reference_forward(x_nchw, params))
    assert out.shape == (batch, out_size)
    # bf16 matmul operands (f32 accumulate) -> relaxed tolerance vs f32 reference.
    max_err = float(jnp.max(jnp.abs(out - ref)))
    assert jnp.allclose(out, ref, atol=2e-2, rtol=2e-2), f"mismatch, max err {max_err:.4f}"

    print("KERNEL_OK")
</pallas_src>

<mosaic_0001>
module attributes {stable_mosaic.version = 11 : i64} {
  func.func @_encoder_kernel(%arg0: i32, %arg1: memref<1x256x27xbf16, #tpu.memory_space<vmem>>, %arg2: memref<27x64xbf16, #tpu.memory_space<vmem>>, %arg3: memref<1x64xf32, #tpu.memory_space<vmem>>, %arg4: memref<576x128xbf16, #tpu.memory_space<vmem>>, %arg5: memref<1x128xf32, #tpu.memory_space<vmem>>, %arg6: memref<1152x32xbf16, #tpu.memory_space<vmem>>, %arg7: memref<1x32xf32, #tpu.memory_space<vmem>>, %arg8: memref<128x32xbf16, #tpu.memory_space<vmem>>, %arg9: memref<1x32xf32, #tpu.memory_space<vmem>>, %arg10: memref<1x1x32xf32, #tpu.memory_space<vmem>>, %arg11: memref<10x10x64xbf16, #tpu.memory_space<vmem>>, %arg12: memref<64x576xbf16, #tpu.memory_space<vmem>>, %arg13: memref<6x6x128xbf16, #tpu.memory_space<vmem>>, %arg14: memref<16x1152xbf16, #tpu.memory_space<vmem>>, %arg15: memref<1x128xbf16, #tpu.memory_space<vmem>>) attributes {dimension_semantics = [#tpu.dimension_semantics<parallel>], iteration_bounds = array<i64: 2>, scalar_prefetch = 0 : i64, scratch_operands = 5 : i64, tpu.core_type = #tpu.core_type<tc>, window_params = [{transform_indices = @transform_0, window_bounds = array<i64: 1, 256, 27>}, {pipeline_mode = #tpu.pipeline_mode<synchronous>, transform_indices = @transform_1, window_bounds = array<i64: 27, 64>}, {pipeline_mode = #tpu.pipeline_mode<synchronous>, transform_indices = @transform_2, window_bounds = array<i64: 1, 64>}, {pipeline_mode = #tpu.pipeline_mode<synchronous>, transform_indices = @transform_3, window_bounds = array<i64: 576, 128>}, {pipeline_mode = #tpu.pipeline_mode<synchronous>, transform_indices = @transform_4, window_bounds = array<i64: 1, 128>}, {pipeline_mode = #tpu.pipeline_mode<synchronous>, transform_indices = @transform_5, window_bounds = array<i64: 1152, 32>}, {pipeline_mode = #tpu.pipeline_mode<synchronous>, transform_indices = @transform_6, window_bounds = array<i64: 1, 32>}, {pipeline_mode = #tpu.pipeline_mode<synchronous>, transform_indices = @transform_7, window_bounds = array<i64: 128, 32>}, {pipeline_mode = #tpu.pipeline_mode<synchronous>, transform_indices = @transform_8, window_bounds = array<i64: 1, 32>}, {transform_indices = @transform_9, window_bounds = array<i64: 1, 1, 32>}]} {
    %c0 = arith.constant 0 : index
    %c0_0 = arith.constant 0 : index
    %c0_1 = arith.constant 0 : index
    %0 = vector.load %arg1[%c0, %c0_0, %c0_1] : memref<1x256x27xbf16, #tpu.memory_space<vmem>>, vector<1x256x27xbf16>
    %1 = vector.shape_cast %0 : vector<1x256x27xbf16> to vector<256x27xbf16>
    %c0_2 = arith.constant 0 : index
    %c0_3 = arith.constant 0 : index
    %2 = vector.load %arg2[%c0_2, %c0_3] : memref<27x64xbf16, #tpu.memory_space<vmem>>, vector<27x64xbf16>
    %cst = arith.constant dense<0.000000e+00> : vector<256x64xf32>
    %3 = tpu.matmul %1, %2, %cst {dimension_numbers = #tpu.dot_dimension_numbers<[1], [0], [0], [1], [0, 0, 1, 1], [], []>} : vector<256x27xbf16>, vector<27x64xbf16>, vector<256x64xf32> -> vector<256x64xf32>
    %c0_4 = arith.constant 0 : index
    %c0_5 = arith.constant 0 : index
    %4 = vector.load %arg3[%c0_4, %c0_5] : memref<1x64xf32, #tpu.memory_space<vmem>>, vector<1x64xf32>
    %5 = vector.broadcast %4 : vector<1x64xf32> to vector<256x64xf32>
    %6 = arith.addf %3, %5 : vector<256x64xf32>
    %7 = vector.shape_cast %6 : vector<256x64xf32> to vector<8x2x16x64xf32>
    %8 = vector.extract_strided_slice %7 {offsets = [0, 0, 0, 0], sizes = [8, 1, 16, 64], strides = [1, 1, 1, 1]} : vector<8x2x16x64xf32> to vector<8x1x16x64xf32>
    %9 = vector.shape_cast %8 : vector<8x1x16x64xf32> to vector<8x16x64xf32>
    %10 = vector.extract_strided_slice %7 {offsets = [0, 1, 0, 0], sizes = [8, 1, 16, 64], strides = [1, 1, 1, 1]} : vector<8x2x16x64xf32> to vector<8x1x16x64xf32>
    %11 = vector.shape_cast %10 : vector<8x1x16x64xf32> to vector<8x16x64xf32>
    %12 = arith.maximumf %9, %11 : vector<8x16x64xf32>
    %13 = vector.shape_cast %12 : vector<8x16x64xf32> to vector<8x8x2x64xf32>
    %14 = vector.extract_strided_slice %13 {offsets = [0, 0, 0, 0], sizes = [8, 8, 1, 64], strides = [1, 1, 1, 1]} : vector<8x8x2x64xf32> to vector<8x8x1x64xf32>
    %15 = vector.shape_cast %14 : vector<8x8x1x64xf32> to vector<8x8x64xf32>
    %16 = vector.extract_strided_slice %13 {offsets = [0, 0, 1, 0], sizes = [8, 8, 1, 64], strides = [1, 1, 1, 1]} : vector<8x8x2x64xf32> to vector<8x8x1x64xf32>
    %17 = vector.shape_cast %16 : vector<8x8x1x64xf32> to vector<8x8x64xf32>
    %18 = arith.maximumf %15, %17 : vector<8x8x64xf32>
    %cst_6 = arith.constant 0.000000e+00 : f32
    %19 = vector.broadcast %cst_6 : f32 to vector<8x8x64xf32>
    %20 = arith.maximumf %18, %19 : vector<8x8x64xf32>
    %cst_7 = arith.constant 0.000000e+00 : bf16
    %21 = vector.broadcast %cst_7 : bf16 to vector<10x10x64xbf16>
    %c0_8 = arith.constant 0 : index
    %c0_9 = arith.constant 0 : index
    %c0_10 = arith.constant 0 : index
    %22 = vector.load %arg11[%c0_8, %c0_9, %c0_10] : memref<10x10x64xbf16, #tpu.memory_space<vmem>>, vector<10x10x64xbf16>
    tpu.vector_store %arg11[%c0_8, %c0_9, %c0_10], %21 {strides = array<i32>} : memref<10x10x64xbf16, #tpu.memory_space<vmem>>, vector<10x10x64xbf16>,
    %23 = arith.truncf %20 : vector<8x8x64xf32> to vector<8x8x64xbf16>
    %c1 = arith.constant 1 : index
    %c1_11 = arith.constant 1 : index
    %c0_12 = arith.constant 0 : index
    %24 = vector.load %arg11[%c1, %c1_11, %c0_12] : memref<10x10x64xbf16, #tpu.memory_space<vmem>>, vector<8x8x64xbf16>
    tpu.vector_store %arg11[%c1, %c1_11, %c0_12], %23 {strides = array<i32>} : memref<10x10x64xbf16, #tpu.memory_space<vmem>>, vector<8x8x64xbf16>,
    %c0_13 = arith.constant 0 : index
    %c0_14 = arith.constant 0 : index
    %c0_15 = arith.constant 0 : index
    %25 = vector.load %arg11[%c0_13, %c0_14, %c0_15] : memref<10x10x64xbf16, #tpu.memory_space<vmem>>, vector<10x10x64xbf16>
    %26 = vector.extract_strided_slice %25 {offsets = [0, 0, 0], sizes = [8, 8, 64], strides = [1, 1, 1]} : vector<10x10x64xbf16> to vector<8x8x64xbf16>
    %27 = vector.shape_cast %26 : vector<8x8x64xbf16> to vector<64x64xbf16>
    %c0_16 = arith.constant 0 : index
    %c0_17 = arith.constant 0 : index
    %28 = vector.load %arg12[%c0_16, %c0_17] : memref<64x576xbf16, #tpu.memory_space<vmem>>, vector<64x64xbf16>
    tpu.vector_store %arg12[%c0_16, %c0_17], %27 {strides = array<i32>} : memref<64x576xbf16, #tpu.memory_space<vmem>>, vector<64x64xbf16>,
    %29 = vector.extract_strided_slice %25 {offsets = [0, 1, 0], sizes = [8, 8, 64], strides = [1, 1, 1]} : vector<10x10x64xbf16> to vector<8x8x64xbf16>
    %30 = vector.shape_cast %29 : vector<8x8x64xbf16> to vector<64x64xbf16>
    %c0_18 = arith.constant 0 : index
    %c64 = arith.constant 64 : index
    %31 = vector.load %arg12[%c0_18, %c64] : memref<64x576xbf16, #tpu.memory_space<vmem>>, vector<64x64xbf16>
    tpu.vector_store %arg12[%c0_18, %c64], %30 {strides = array<i32>} : memref<64x576xbf16, #tpu.memory_space<vmem>>, vector<64x64xbf16>,
    %32 = vector.extract_strided_slice %25 {offsets = [0, 2, 0], sizes = [8, 8, 64], strides = [1, 1, 1]} : vector<10x10x64xbf16> to vector<8x8x64xbf16>
    %33 = vector.shape_cast %32 : vector<8x8x64xbf16> to vector<64x64xbf16>
    %c0_19 = arith.constant 0 : index
    %c128 = arith.constant 128 : index
    %34 = vector.load %arg12[%c0_19, %c128] : memref<64x576xbf16, #tpu.memory_space<vmem>>, vector<64x64xbf16>
    tpu.vector_store %arg12[%c0_19, %c128], %33 {strides = array<i32>} : memref<64x576xbf16, #tpu.memory_space<vmem>>, vector<64x64xbf16>,
    %35 = vector.extract_strided_slice %25 {offsets = [1, 0, 0], sizes = [8, 8, 64], strides = [1, 1, 1]} : vector<10x10x64xbf16> to vector<8x8x64xbf16>
    %36 = vector.shape_cast %35 : vector<8x8x64xbf16> to vector<64x64xbf16>
    %c0_20 = arith.constant 0 : index
    %c192 = arith.constant 192 : index
    %37 = vector.load %arg12[%c0_20, %c192] : memref<64x576xbf16, #tpu.memory_space<vmem>>, vector<64x64xbf16>
    tpu.vector_store %arg12[%c0_20, %c192], %36 {strides = array<i32>} : memref<64x576xbf16, #tpu.memory_space<vmem>>, vector<64x64xbf16>,
    %38 = vector.extract_strided_slice %25 {offsets = [1, 1, 0], sizes = [8, 8, 64], strides = [1, 1, 1]} : vector<10x10x64xbf16> to vector<8x8x64xbf16>
    %39 = vector.shape_cast %38 : vector<8x8x64xbf16> to vector<64x64xbf16>
    %c0_21 = arith.constant 0 : index
    %c256 = arith.constant 256 : index
    %40 = vector.load %arg12[%c0_21, %c256] : memref<64x576xbf16, #tpu.memory_space<vmem>>, vector<64x64xbf16>
    tpu.vector_store %arg12[%c0_21, %c256], %39 {strides = array<i32>} : memref<64x576xbf16, #tpu.memory_space<vmem>>, vector<64x64xbf16>,
    %41 = vector.extract_strided_slice %25 {offsets = [1, 2, 0], sizes = [8, 8, 64], strides = [1, 1, 1]} : vector<10x10x64xbf16> to vector<8x8x64xbf16>
    %42 = vector.shape_cast %41 : vector<8x8x64xbf16> to vector<64x64xbf16>
    %c0_22 = arith.constant 0 : index
    %c320 = arith.constant 320 : index
    %43 = vector.load %arg12[%c0_22, %c320] : memref<64x576xbf16, #tpu.memory_space<vmem>>, vector<64x64xbf16>
    tpu.vector_store %arg12[%c0_22, %c320], %42 {strides = array<i32>} : memref<64x576xbf16, #tpu.memory_space<vmem>>, vector<64x64xbf16>,
    %44 = vector.extract_strided_slice %25 {offsets = [2, 0, 0], sizes = [8, 8, 64], strides = [1, 1, 1]} : vector<10x10x64xbf16> to vector<8x8x64xbf16>
    %45 = vector.shape_cast %44 : vector<8x8x64xbf16> to vector<64x64xbf16>
    %c0_23 = arith.constant 0 : index
    %c384 = arith.constant 384 : index
    %46 = vector.load %arg12[%c0_23, %c384] : memref<64x576xbf16, #tpu.memory_space<vmem>>, vector<64x64xbf16>
    tpu.vector_store %arg12[%c0_23, %c384], %45 {strides = array<i32>} : memref<64x576xbf16, #tpu.memory_space<vmem>>, vector<64x64xbf16>,
    %47 = vector.extract_strided_slice %25 {offsets = [2, 1, 0], sizes = [8, 8, 64], strides = [1, 1, 1]} : vector<10x10x64xbf16> to vector<8x8x64xbf16>
    %48 = vector.shape_cast %47 : vector<8x8x64xbf16> to vector<64x64xbf16>
    %c0_24 = arith.constant 0 : index
    %c448 = arith.constant 448 : index
    %49 = vector.load %arg12[%c0_24, %c448] : memref<64x576xbf16, #tpu.memory_space<vmem>>, vector<64x64xbf16>
    tpu.vector_store %arg12[%c0_24, %c448], %48 {strides = array<i32>} : memref<64x576xbf16, #tpu.memory_space<vmem>>, vector<64x64xbf16>,
    %50 = vector.extract_strided_slice %25 {offsets = [2, 2, 0], sizes = [8, 8, 64], strides = [1, 1, 1]} : vector<10x10x64xbf16> to vector<8x8x64xbf16>
    %51 = vector.shape_cast %50 : vector<8x8x64xbf16> to vector<64x64xbf16>
    %c0_25 = arith.constant 0 : index
    %c512 = arith.constant 512 : index
    %52 = vector.load %arg12[%c0_25, %c512] : memref<64x576xbf16, #tpu.memory_space<vmem>>, vector<64x64xbf16>
    tpu.vector_store %arg12[%c0_25, %c512], %51 {strides = array<i32>} : memref<64x576xbf16, #tpu.memory_space<vmem>>, vector<64x64xbf16>,
    %c0_26 = arith.constant 0 : index
    %c0_27 = arith.constant 0 : index
    %53 = vector.load %arg12[%c0_26, %c0_27] : memref<64x576xbf16, #tpu.memory_space<vmem>>, vector<64x576xbf16>
    %c0_28 = arith.constant 0 : index
    %c0_29 = arith.constant 0 : index
    %54 = vector.load %arg4[%c0_28, %c0_29] : memref<576x128xbf16, #tpu.memory_space<vmem>>, vector<576x128xbf16>
    %cst_30 = arith.constant dense<0.000000e+00> : vector<64x128xf32>
    %55 = tpu.matmul %53, %54, %cst_30 {dimension_numbers = #tpu.dot_dimension_numbers<[1], [0], [0], [1], [0, 0, 1, 1], [], []>} : vector<64x576xbf16>, vector<576x128xbf16>, vector<64x128xf32> -> vector<64x128xf32>
    %c0_31 = arith.constant 0 : index
    %c0_32 = arith.constant 0 : index
    %56 = vector.load %arg5[%c0_31, %c0_32] : memref<1x128xf32, #tpu.memory_space<vmem>>, vector<1x128xf32>
    %57 = vector.broadcast %56 : vector<1x128xf32> to vector<64x128xf32>
    %58 = arith.addf %55, %57 : vector<64x128xf32>
    %59 = vector.shape_cast %58 : vector<64x128xf32> to vector<4x2x8x128xf32>
    %60 = vector.extract_strided_slice %59 {offsets = [0, 0, 0, 0], sizes = [4, 1, 8, 128], strides = [1, 1, 1, 1]} : vector<4x2x8x128xf32> to vector<4x1x8x128xf32>
    %61 = vector.shape_cast %60 : vector<4x1x8x128xf32> to vector<4x8x128xf32>
    %62 = vector.extract_strided_slice %59 {offsets = [0, 1, 0, 0], sizes = [4, 1, 8, 128], strides = [1, 1, 1, 1]} : vector<4x2x8x128xf32> to vector<4x1x8x128xf32>
    %63 = vector.shape_cast %62 : vector<4x1x8x128xf32> to vector<4x8x128xf32>
    %64 = arith.maximumf %61, %63 : vector<4x8x128xf32>
    %65 = vector.shape_cast %64 : vector<4x8x128xf32> to vector<4x4x2x128xf32>
    %66 = vector.extract_strided_slice %65 {offsets = [0, 0, 0, 0], sizes = [4, 4, 1, 128], strides = [1, 1, 1, 1]} : vector<4x4x2x128xf32> to vector<4x4x1x128xf32>
    %67 = vector.shape_cast %66 : vector<4x4x1x128xf32> to vector<4x4x128xf32>
    %68 = vector.extract_strided_slice %65 {offsets = [0, 0, 1, 0], sizes = [4, 4, 1, 128], strides = [1, 1, 1, 1]} : vector<4x4x2x128xf32> to vector<4x4x1x128xf32>
    %69 = vector.shape_cast %68 : vector<4x4x1x128xf32> to vector<4x4x128xf32>
    %70 = arith.maximumf %67, %69 : vector<4x4x128xf32>
    %cst_33 = arith.constant 0.000000e+00 : f32
    %71 = vector.broadcast %cst_33 : f32 to vector<4x4x128xf32>
    %72 = arith.maximumf %70, %71 : vector<4x4x128xf32>
    %cst_34 = arith.constant 0.000000e+00 : bf16
    %73 = vector.broadcast %cst_34 : bf16 to vector<6x6x128xbf16>
    %c0_35 = arith.constant 0 : index
    %c0_36 = arith.constant 0 : index
    %c0_37 = arith.constant 0 : index
    %74 = vector.load %arg13[%c0_35, %c0_36, %c0_37] : memref<6x6x128xbf16, #tpu.memory_space<vmem>>, vector<6x6x128xbf16>
    tpu.vector_store %arg13[%c0_35, %c0_36, %c0_37], %73 {strides = array<i32>} : memref<6x6x128xbf16, #tpu.memory_space<vmem>>, vector<6x6x128xbf16>,
    %75 = arith.truncf %72 : vector<4x4x128xf32> to vector<4x4x128xbf16>
    %c1_38 = arith.constant 1 : index
    %c1_39 = arith.constant 1 : index
    %c0_40 = arith.constant 0 : index
    %76 = vector.load %arg13[%c1_38, %c1_39, %c0_40] : memref<6x6x128xbf16, #tpu.memory_space<vmem>>, vector<4x4x128xbf16>
    tpu.vector_store %arg13[%c1_38, %c1_39, %c0_40], %75 {strides = array<i32>} : memref<6x6x128xbf16, #tpu.memory_space<vmem>>, vector<4x4x128xbf16>,
    %c0_41 = arith.constant 0 : index
    %c0_42 = arith.constant 0 : index
    %c0_43 = arith.constant 0 : index
    %77 = vector.load %arg13[%c0_41, %c0_42, %c0_43] : memref<6x6x128xbf16, #tpu.memory_space<vmem>>, vector<6x6x128xbf16>
    %78 = vector.extract_strided_slice %77 {offsets = [0, 0, 0], sizes = [4, 4, 128], strides = [1, 1, 1]} : vector<6x6x128xbf16> to vector<4x4x128xbf16>
    %79 = vector.shape_cast %78 : vector<4x4x128xbf16> to vector<16x128xbf16>
    %c0_44 = arith.constant 0 : index
    %c0_45 = arith.constant 0 : index
    %80 = vector.load %arg14[%c0_44, %c0_45] : memref<16x1152xbf16, #tpu.memory_space<vmem>>, vector<16x128xbf16>
    tpu.vector_store %arg14[%c0_44, %c0_45], %79 {strides = array<i32>} : memref<16x1152xbf16, #tpu.memory_space<vmem>>, vector<16x128xbf16>,
    %81 = vector.extract_strided_slice %77 {offsets = [0, 1, 0], sizes = [4, 4, 128], strides = [1, 1, 1]} : vector<6x6x128xbf16> to vector<4x4x128xbf16>
    %82 = vector.shape_cast %81 : vector<4x4x128xbf16> to vector<16x128xbf16>
    %c0_46 = arith.constant 0 : index
    %c128_47 = arith.constant 128 : index
    %83 = vector.load %arg14[%c0_46, %c128_47] : memref<16x1152xbf16, #tpu.memory_space<vmem>>, vector<16x128xbf16>
    tpu.vector_store %arg14[%c0_46, %c128_47], %82 {strides = array<i32>} : memref<16x1152xbf16, #tpu.memory_space<vmem>>, vector<16x128xbf16>,
    %84 = vector.extract_strided_slice %77 {offsets = [0, 2, 0], sizes = [4, 4, 128], strides = [1, 1, 1]} : vector<6x6x128xbf16> to vector<4x4x128xbf16>
    %85 = vector.shape_cast %84 : vector<4x4x128xbf16> to vector<16x128xbf16>
    %c0_48 = arith.constant 0 : index
    %c256_49 = arith.constant 256 : index
    %86 = vector.load %arg14[%c0_48, %c256_49] : memref<16x1152xbf16, #tpu.memory_space<vmem>>, vector<16x128xbf16>
    tpu.vector_store %arg14[%c0_48, %c256_49], %85 {strides = array<i32>} : memref<16x1152xbf16, #tpu.memory_space<vmem>>, vector<16x128xbf16>,
    %87 = vector.extract_strided_slice %77 {offsets = [1, 0, 0], sizes = [4, 4, 128], strides = [1, 1, 1]} : vector<6x6x128xbf16> to vector<4x4x128xbf16>
    %88 = vector.shape_cast %87 : vector<4x4x128xbf16> to vector<16x128xbf16>
    %c0_50 = arith.constant 0 : index
    %c384_51 = arith.constant 384 : index
    %89 = vector.load %arg14[%c0_50, %c384_51] : memref<16x1152xbf16, #tpu.memory_space<vmem>>, vector<16x128xbf16>
    tpu.vector_store %arg14[%c0_50, %c384_51], %88 {strides = array<i32>} : memref<16x1152xbf16, #tpu.memory_space<vmem>>, vector<16x128xbf16>,
    %90 = vector.extract_strided_slice %77 {offsets = [1, 1, 0], sizes = [4, 4, 128], strides = [1, 1, 1]} : vector<6x6x128xbf16> to vector<4x4x128xbf16>
    %91 = vector.shape_cast %90 : vector<4x4x128xbf16> to vector<16x128xbf16>
    %c0_52 = arith.constant 0 : index
    %c512_53 = arith.constant 512 : index
    %92 = vector.load %arg14[%c0_52, %c512_53] : memref<16x1152xbf16, #tpu.memory_space<vmem>>, vector<16x128xbf16>
    tpu.vector_store %arg14[%c0_52, %c512_53], %91 {strides = array<i32>} : memref<16x1152xbf16, #tpu.memory_space<vmem>>, vector<16x128xbf16>,
    %93 = vector.extract_strided_slice %77 {offsets = [1, 2, 0], sizes = [4, 4, 128], strides = [1, 1, 1]} : vector<6x6x128xbf16> to vector<4x4x128xbf16>
    %94 = vector.shape_cast %93 : vector<4x4x128xbf16> to vector<16x128xbf16>
    %c0_54 = arith.constant 0 : index
    %c640 = arith.constant 640 : index
    %95 = vector.load %arg14[%c0_54, %c640] : memref<16x1152xbf16, #tpu.memory_space<vmem>>, vector<16x128xbf16>
    tpu.vector_store %arg14[%c0_54, %c640], %94 {strides = array<i32>} : memref<16x1152xbf16, #tpu.memory_space<vmem>>, vector<16x128xbf16>,
    %96 = vector.extract_strided_slice %77 {offsets = [2, 0, 0], sizes = [4, 4, 128], strides = [1, 1, 1]} : vector<6x6x128xbf16> to vector<4x4x128xbf16>
    %97 = vector.shape_cast %96 : vector<4x4x128xbf16> to vector<16x128xbf16>
    %c0_55 = arith.constant 0 : index
    %c768 = arith.constant 768 : index
    %98 = vector.load %arg14[%c0_55, %c768] : memref<16x1152xbf16, #tpu.memory_space<vmem>>, vector<16x128xbf16>
    tpu.vector_store %arg14[%c0_55, %c768], %97 {strides = array<i32>} : memref<16x1152xbf16, #tpu.memory_space<vmem>>, vector<16x128xbf16>,
    %99 = vector.extract_strided_slice %77 {offsets = [2, 1, 0], sizes = [4, 4, 128], strides = [1, 1, 1]} : vector<6x6x128xbf16> to vector<4x4x128xbf16>
    %100 = vector.shape_cast %99 : vector<4x4x128xbf16> to vector<16x128xbf16>
    %c0_56 = arith.constant 0 : index
    %c896 = arith.constant 896 : index
    %101 = vector.load %arg14[%c0_56, %c896] : memref<16x1152xbf16, #tpu.memory_space<vmem>>, vector<16x128xbf16>
    tpu.vector_store %arg14[%c0_56, %c896], %100 {strides = array<i32>} : memref<16x1152xbf16, #tpu.memory_space<vmem>>, vector<16x128xbf16>,
    %102 = vector.extract_strided_slice %77 {offsets = [2, 2, 0], sizes = [4, 4, 128], strides = [1, 1, 1]} : vector<6x6x128xbf16> to vector<4x4x128xbf16>
    %103 = vector.shape_cast %102 : vector<4x4x128xbf16> to vector<16x128xbf16>
    %c0_57 = arith.constant 0 : index
    %c1024 = arith.constant 1024 : index
    %104 = vector.load %arg14[%c0_57, %c1024] : memref<16x1152xbf16, #tpu.memory_space<vmem>>, vector<16x128xbf16>
    tpu.vector_store %arg14[%c0_57, %c1024], %103 {strides = array<i32>} : memref<16x1152xbf16, #tpu.memory_space<vmem>>, vector<16x128xbf16>,
    %c0_58 = arith.constant 0 : index
    %c0_59 = arith.constant 0 : index
    %105 = vector.load %arg14[%c0_58, %c0_59] : memref<16x1152xbf16, #tpu.memory_space<vmem>>, vector<16x1152xbf16>
    %c0_60 = arith.constant 0 : index
    %c0_61 = arith.constant 0 : index
    %106 = vector.load %arg6[%c0_60, %c0_61] : memref<1152x32xbf16, #tpu.memory_space<vmem>>, vector<1152x32xbf16>
    %cst_62 = arith.constant dense<0.000000e+00> : vector<16x32xf32>
    %107 = tpu.matmul %105, %106, %cst_62 {dimension_numbers = #tpu.dot_dimension_numbers<[1], [0], [0], [1], [0, 0, 1, 1], [], []>} : vector<16x1152xbf16>, vector<1152x32xbf16>, vector<16x32xf32> -> vector<16x32xf32>
    %c0_63 = arith.constant 0 : index
    %c0_64 = arith.constant 0 : index
    %108 = vector.load %arg7[%c0_63, %c0_64] : memref<1x32xf32, #tpu.memory_space<vmem>>, vector<1x32xf32>
    %109 = vector.broadcast %108 : vector<1x32xf32> to vector<16x32xf32>
    %110 = arith.addf %107, %109 : vector<16x32xf32>
    %111 = vector.shape_cast %110 : vector<16x32xf32> to vector<2x2x4x32xf32>
    %112 = vector.extract_strided_slice %111 {offsets = [0, 0, 0, 0], sizes = [2, 1, 4, 32], strides = [1, 1, 1, 1]} : vector<2x2x4x32xf32> to vector<2x1x4x32xf32>
    %113 = vector.shape_cast %112 : vector<2x1x4x32xf32> to vector<2x4x32xf32>
    %114 = vector.extract_strided_slice %111 {offsets = [0, 1, 0, 0], sizes = [2, 1, 4, 32], strides = [1, 1, 1, 1]} : vector<2x2x4x32xf32> to vector<2x1x4x32xf32>
    %115 = vector.shape_cast %114 : vector<2x1x4x32xf32> to vector<2x4x32xf32>
    %116 = arith.maximumf %113, %115 : vector<2x4x32xf32>
    %117 = vector.shape_cast %116 : vector<2x4x32xf32> to vector<2x2x2x32xf32>
    %118 = vector.extract_strided_slice %117 {offsets = [0, 0, 0, 0], sizes = [2, 2, 1, 32], strides = [1, 1, 1, 1]} : vector<2x2x2x32xf32> to vector<2x2x1x32xf32>
    %119 = vector.shape_cast %118 : vector<2x2x1x32xf32> to vector<2x2x32xf32>
    %120 = vector.extract_strided_slice %117 {offsets = [0, 0, 1, 0], sizes = [2, 2, 1, 32], strides = [1, 1, 1, 1]} : vector<2x2x2x32xf32> to vector<2x2x1x32xf32>
    %121 = vector.shape_cast %120 : vector<2x2x1x32xf32> to vector<2x2x32xf32>
    %122 = arith.maximumf %119, %121 : vector<2x2x32xf32>
    %cst_65 = arith.constant 0.000000e+00 : f32
    %123 = vector.broadcast %cst_65 : f32 to vector<2x2x32xf32>
    %124 = arith.maximumf %122, %123 : vector<2x2x32xf32>
    %125 = arith.truncf %124 : vector<2x2x32xf32> to vector<2x2x32xbf16>
    %126 = vector.extract_strided_slice %125 {offsets = [0, 0, 0], sizes = [1, 1, 32], strides = [1, 1, 1]} : vector<2x2x32xbf16> to vector<1x1x32xbf16>
    %127 = vector.shape_cast %126 : vector<1x1x32xbf16> to vector<1x32xbf16>
    %c0_66 = arith.constant 0 : index
    %c0_67 = arith.constant 0 : index
    %128 = vector.load %arg15[%c0_66, %c0_67] : memref<1x128xbf16, #tpu.memory_space<vmem>>, vector<1x32xbf16>
    tpu.vector_store %arg15[%c0_66, %c0_67], %127 {strides = array<i32>} : memref<1x128xbf16, #tpu.memory_space<vmem>>, vector<1x32xbf16>,
    %129 = vector.extract_strided_slice %125 {offsets = [0, 1, 0], sizes = [1, 1, 32], strides = [1, 1, 1]} : vector<2x2x32xbf16> to vector<1x1x32xbf16>
    %130 = vector.shape_cast %129 : vector<1x1x32xbf16> to vector<1x32xbf16>
    %c0_68 = arith.constant 0 : index
    %c32 = arith.constant 32 : index
    %131 = vector.load %arg15[%c0_68, %c32] : memref<1x128xbf16, #tpu.memory_space<vmem>>, vector<1x32xbf16>
    tpu.vector_store %arg15[%c0_68, %c32], %130 {strides = array<i32>} : memref<1x128xbf16, #tpu.memory_space<vmem>>, vector<1x32xbf16>,
    %132 = vector.extract_strided_slice %125 {offsets = [1, 0, 0], sizes = [1, 1, 32], strides = [1, 1, 1]} : vector<2x2x32xbf16> to vector<1x1x32xbf16>
    %133 = vector.shape_cast %132 : vector<1x1x32xbf16> to vector<1x32xbf16>
    %c0_69 = arith.constant 0 : index
    %c64_70 = arith.constant 64 : index
    %134 = vector.load %arg15[%c0_69, %c64_70] : memref<1x128xbf16, #tpu.memory_space<vmem>>, vector<1x32xbf16>
    tpu.vector_store %arg15[%c0_69, %c64_70], %133 {strides = array<i32>} : memref<1x128xbf16, #tpu.memory_space<vmem>>, vector<1x32xbf16>,
    %135 = vector.extract_strided_slice %125 {offsets = [1, 1, 0], sizes = [1, 1, 32], strides = [1, 1, 1]} : vector<2x2x32xbf16> to vector<1x1x32xbf16>
    %136 = vector.shape_cast %135 : vector<1x1x32xbf16> to vector<1x32xbf16>
    %c0_71 = arith.constant 0 : index
    %c96 = arith.constant 96 : index
    %137 = vector.load %arg15[%c0_71, %c96] : memref<1x128xbf16, #tpu.memory_space<vmem>>, vector<1x32xbf16>
    tpu.vector_store %arg15[%c0_71, %c96], %136 {strides = array<i32>} : memref<1x128xbf16, #tpu.memory_space<vmem>>, vector<1x32xbf16>,
    %c0_72 = arith.constant 0 : index
    %c0_73 = arith.constant 0 : index
    %138 = vector.load %arg15[%c0_72, %c0_73] : memref<1x128xbf16, #tpu.memory_space<vmem>>, vector<1x128xbf16>
    %c0_74 = arith.constant 0 : index
    %c0_75 = arith.constant 0 : index
    %139 = vector.load %arg8[%c0_74, %c0_75] : memref<128x32xbf16, #tpu.memory_space<vmem>>, vector<128x32xbf16>
    %cst_76 = arith.constant dense<0.000000e+00> : vector<1x32xf32>
    %140 = tpu.matmul %138, %139, %cst_76 {dimension_numbers = #tpu.dot_dimension_numbers<[1], [0], [0], [1], [0, 0, 1, 1], [], []>} : vector<1x128xbf16>, vector<128x32xbf16>, vector<1x32xf32> -> vector<1x32xf32>
    %c0_77 = arith.constant 0 : index
    %c0_78 = arith.constant 0 : index
    %141 = vector.load %arg9[%c0_77, %c0_78] : memref<1x32xf32, #tpu.memory_space<vmem>>, vector<1x32xf32>
    %142 = arith.addf %140, %141 : vector<1x32xf32>
    %cst_79 = arith.constant 0.000000e+00 : f32
    %143 = vector.broadcast %cst_79 : f32 to vector<1x32xf32>
    %144 = arith.maximumf %142, %143 : vector<1x32xf32>
    %c0_80 = arith.constant 0 : index
    %c0_81 = arith.constant 0 : index
    %c0_82 = arith.constant 0 : index
    %145 = vector.load %arg10[%c0_80, %c0_81, %c0_82] : memref<1x1x32xf32, #tpu.memory_space<vmem>>, vector<1x1x32xf32>
    %146 = vector.shape_cast %145 : vector<1x1x32xf32> to vector<1x32xf32>
    %147 = vector.shape_cast %144 : vector<1x32xf32> to vector<1x1x32xf32>
    tpu.vector_store %arg10[%c0_80, %c0_81, %c0_82], %147 {strides = array<i32>} : memref<1x1x32xf32, #tpu.memory_space<vmem>>, vector<1x1x32xf32>,
    return
  }
  func.func @transform_0(%arg0: i32) -> (i32, i32, i32) {
    %c0_i32 = arith.constant 0 : i32
    %c0_i32_0 = arith.constant 0 : i32
    %c0_i32_1 = arith.constant 0 : i32
    return %arg0, %c0_i32, %c0_i32_0 : i32, i32, i32
  }
  func.func @transform_1(%arg0: i32) -> (i32, i32) {
    %c0_i32 = arith.constant 0 : i32
    %c0_i32_0 = arith.constant 0 : i32
    %c0_i32_1 = arith.constant 0 : i32
    return %c0_i32, %c0_i32_0 : i32, i32
  }
  func.func @transform_2(%arg0: i32) -> (i32, i32) {
    %c0_i32 = arith.constant 0 : i32
    %c0_i32_0 = arith.constant 0 : i32
    %c0_i32_1 = arith.constant 0 : i32
    return %c0_i32, %c0_i32_0 : i32, i32
  }
  func.func @transform_3(%arg0: i32) -> (i32, i32) {
    %c0_i32 = arith.constant 0 : i32
    %c0_i32_0 = arith.constant 0 : i32
    %c0_i32_1 = arith.constant 0 : i32
    return %c0_i32, %c0_i32_0 : i32, i32
  }
  func.func @transform_4(%arg0: i32) -> (i32, i32) {
    %c0_i32 = arith.constant 0 : i32
    %c0_i32_0 = arith.constant 0 : i32
    %c0_i32_1 = arith.constant 0 : i32
    return %c0_i32, %c0_i32_0 : i32, i32
  }
  func.func @transform_5(%arg0: i32) -> (i32, i32) {
    %c0_i32 = arith.constant 0 : i32
    %c0_i32_0 = arith.constant 0 : i32
    %c0_i32_1 = arith.constant 0 : i32
    return %c0_i32, %c0_i32_0 : i32, i32
  }
  func.func @transform_6(%arg0: i32) -> (i32, i32) {
    %c0_i32 = arith.constant 0 : i32
    %c0_i32_0 = arith.constant 0 : i32
    %c0_i32_1 = arith.constant 0 : i32
    return %c0_i32, %c0_i32_0 : i32, i32
  }
  func.func @transform_7(%arg0: i32) -> (i32, i32) {
    %c0_i32 = arith.constant 0 : i32
    %c0_i32_0 = arith.constant 0 : i32
    %c0_i32_1 = arith.constant 0 : i32
    return %c0_i32, %c0_i32_0 : i32, i32
  }
  func.func @transform_8(%arg0: i32) -> (i32, i32) {
    %c0_i32 = arith.constant 0 : i32
    %c0_i32_0 = arith.constant 0 : i32
    %c0_i32_1 = arith.constant 0 : i32
    return %c0_i32, %c0_i32_0 : i32, i32
  }
  func.func @transform_9(%arg0: i32) -> (i32, i32, i32) {
    %c0_i32 = arith.constant 0 : i32
    %c0_i32_0 = arith.constant 0 : i32
    %c0_i32_1 = arith.constant 0 : i32
    return %arg0, %c0_i32, %c0_i32_0 : i32, i32, i32
  }
}

</mosaic_0001>

<bundles_post_ra>
// kernel: image_encoder_forward.1
= control target key start
LH: loop header
LB: loop body
LE: loop exit
PB: predicated region body
PF: predicated region fallthrough
CT: control target
= control target key end

     0   :  { %14 = vsyncpa [#allocation8], 0  ;;  %s6279_s0 = inlined_call_operand.vmem [shape: bf16[2,256,27], index: 0, kind: input, shape index: {}]   ;;  %s6280_s1 = inlined_call_operand.vmem [shape: bf16[27,64], index: 1, kind: input, shape index: {}]   ;;  %s6281_s2 = inlined_call_operand.vmem [shape: f32[1,64], index: 2, kind: input, shape index: {}]   ;;  %s6282_s3 = inlined_call_operand.vmem [shape: bf16[576,128], index: 3, kind: input, shape index: {}]   ;;  %s6283_s4 = inlined_call_operand.vmem [shape: f32[1,128], index: 4, kind: input, shape index: {}]   ;;  %s6284_s5 = inlined_call_operand.vmem [shape: bf16[1152,32], index: 5, kind: input, shape index: {}]   ;;  %s6285_s6 = inlined_call_operand.vmem [shape: f32[1,32], index: 6, kind: input, shape index: {}]   ;;  %s6286_s7 = inlined_call_operand.vmem [shape: bf16[128,32], index: 7, kind: input, shape index: {}]   ;;  %s6287_s8 = inlined_call_operand.vmem [shape: f32[1,32], index: 8, kind: input, shape index: {}]   ;;  %s6288_s9 = inlined_call_operand.hbm [shape: f32[2,1,32], index: 9, kind: output, shape index: {}]  }
   0x1   :  { %16 = vsyncpa [#allocation8 + $0x1], 0  ;;  %s5078_s30 = smov 0   ;;  %s5080_s10 = smov 0  }
   0x2   :  { %s5082_s11 = smov 0   ;;  %s5084_s12 = smov 0  }
   0x3 LB: > { %s5099_s13 = sadd.s32 4294967295, %s5021_s12   ;;  %s3965_s14 = sadd.s32 4294967294, %s5021_s12   ;;  %s5021_s12 = sphi %s5084_s12, %s6310_s12   ;;  %s5017_s11 = sphi %s5082_s11, %s6309_s11   ;;  %s5013_s10 = sphi %s5080_s10, %s6308_s10   ;;  %s5009_s30 = sphi %s5078_s30, %s6307_s30  }
   0x4   : > { %s5103_s15 = sadd.s32 1, %s5021_s12   ;;  %s223_s16 = sadd.s32 1, %s5017_s11 }
   0x5   : > { %s220_s17 = ssub.s32 %s5021_s12, %s5103_s15  ;;  %p233_p0 = scmp.ne.s32.totalorder %s5017_s11, %s5013_s10 }
   0x6   : > { %p221_p1 = scmp.eq.s32.totalorder %s220_s17, 0  ;;  %p234_p2 = scmp.eq.s32.totalorder %s5099_s13, 1 }
   0x7   : > { %p239_p3 = scmp.ne.s32.totalorder %s5013_s10, %s5009_s30  ;;  %p240_p4 = scmp.eq.s32.totalorder %s3965_s14, 1 }
   0x8   : > { %s5114_s18 = scalar_select %p221_p1, %s5017_s11, %s223_s16  }
   0x9   : > { %p5116_p5 = por %p234_p2, %p233_p0  ;;  %p5120_p6 = por %p240_p4, %p239_p3 }
   0xa   : > { %p3968_p7 = scmp.ge.s32.totalorder %s5021_s12, 1  ;;  %p290_p8 = scmp.lt.s32.totalorder %s5021_s12, 3 }
   0xc   : > { %p291_p9 = pnand %p3968_p7, %p290_p8 }
   0xd   : > { %p325_p10 = scmp.lt.s32.totalorder (!%p291_p9), %s5099_s13, 1  ;;  %s5025_s22 = smov (!%p291_p9), 64  }
   0xe   : > { %294 = sbr.rel (%p291_p9) target bundleno = 1290 (0x50a), region = 56  ;;  %s3906_s21 = scalar_lea.hbm (!%p291_p9), %s6288_s9, %s5099_s13 }
   0xf   : > { %s3910_s27 = sshll.u32 (!%p291_p9), %s3906_s21, 4  ;;  %s3911_s27 = int_to_ptr.hbm [resolvable:$true] %s3910_s27 }
  0x10   : > { %s4973_s29 = sshra.s32 (!%p291_p9), %s3911_s27, 4  ;;  %s4974_s29 = int_to_ptr.hbm [resolvable:$true] %s4973_s29 }
  0x11   : > { %s4975_s14 = scalar_lea.hbm (!%p291_p9), %s4974_s29, 1  ;;  %p4980_p0 = scmp.lt.s32.totalorder (!%p291_p9), %s4974_s29, %s6288_s9 }
  0x12   : > { %p4976_p11 = scmp.ne.s32.totalorder (!%p291_p9), %s4974_s29, %s4975_s14 }
  0x13   : > { %v4041_v0 = vld [vmem:[%s6280_s1 + $0x8] sm:$0xf]  ;;  %v4763_v1 = vld [vmem:[%s6280_s1 + $0x8] sm:$0x30]  ;;  %vm511_vm0 = vcmask 1044480   ;;  %vm512_vm1 = vcmask 1045504  }
  0x14   : > { %v4042_v2 = vor.u32 %v4763_v1, %v4041_v0  ;;  %v5023_v3 = vmov 65535   ;;  %s326_s25 = scalar_select %p325_p10, %s5099_s13, 1  ;;  %v4762_v7 = vld [vmem:[%s6280_s1] sm:$0xff]  ;;  %vm462_vm2 = vcmask 220160   ;;  %vm1057_vm3 = vcmask 516096  }
  0x15   : > { %v513_v4 = vsel %vm511_vm0, 4294967295, %v5023_v3  ;;  %v5024_v20 = vmov 0   ;;  %vm1055_vm4 = vcmask 519168   ;;  %v5174_v22 = vld [vmem:[%s6281_s2] ss:$0 sm:$0xff]  ;;  %vm1271_vm5 = vcmask 1042434   ;;  %p4977_p12 = pnand %p4976_p11, %p5116_p5 }
  0x16   : > { %v514_v5 = vsel %vm512_vm1, %v513_v4, 0  ;;  %s4745_s26 = sshll.u32 %s326_s25, 7  ;;  %1060 = vst.msk [vmem:[#allocation2 + $0xc] sm:$0x1] %vm1057_vm3, %v5024_v20  ;;  %vm1274_vm6 = vcmask 1043459   ;;  %vm1277_vm7 = vcmask 1044484  }
  0x17   : > { %v516_v6 = vand.u32 %v4042_v2, %v514_v5  ;;  %s5140_s16 = scalar_lea.vmem %s6279_s0, %s4745_s26  ;;  %2547 = vst [vmem:[#allocation4] sm:$0x7] %v5024_v20  ;;  %vm1419_vm8 = vsmask.f32 256  ;;  %vm1280_vm9 = vcmask 1045509   ;;  %vm1283_vm10 = vcmask 1046534   ;;  %p4978_p13 = pneg %p4977_p12 }
  0x18   : > { %v4746_v8 = vld [vmem:[%s5140_s16] sm:$0xff]  ;;  %v4747_v9 = vld [vmem:[%s5140_s16 + $0x8] sm:$0xff]  ;;  %v4748_v10 = vld [vmem:[%s5140_s16 + $0x10] sm:$0xff]  ;;  %1059 = vst.msk [vmem:[#allocation2 + $0x8] sm:$0xf] %vm1055_vm4, %v5024_v20  ;;  %vm1286_vm11 = vcmask 1047559  }
  0x19   : > { %524 = vmatpush.bf16.msra.mxu0 %v516_v6  ;;  %4909 = vmatpush.bf16.msra.mxu3 %v516_v6  ;;  %v4749_v11 = vld [vmem:[%s5140_s16 + $0x18] sm:$0xff]  ;;  %v4750_v12 = vld [vmem:[%s5140_s16 + $0x20] sm:$0xff]  ;;  %v4760_v13 = vld [vmem:[%s5140_s16 + $0x70] sm:$0xff]  ;;  %2552 = vst [vmem:[#allocation4 + $0x14] sm:$0x7] %v5024_v20  ;;  %s5026_s25 = smov 32  }
  0x1a   : > { %v4751_v14 = vld [vmem:[%s5140_s16 + $0x28] sm:$0xff]  ;;  %v4761_v15 = vld [vmem:[%s5140_s16 + $0x78] sm:$0xff]  ;;  %v4752_v16 = vld [vmem:[%s5140_s16 + $0x30] sm:$0xff]  ;;  %1056 = vst.msk [vmem:[#allocation2] sm:$0xf] %vm1055_vm4, %v5024_v20  ;;  %s5027_s26 = smov 96  }
  0x1b   : > { %v4753_v17 = vld [vmem:[%s5140_s16 + $0x38] sm:$0xff]  ;;  %v4754_v18 = vld [vmem:[%s5140_s16 + $0x40] sm:$0xff]  ;;  %1058 = vst.msk [vmem:[#allocation2 + $0x4] sm:$0x1] %vm1057_vm3, %v5024_v20  ;;  %v4755_v23 = vld [vmem:[%s5140_s16 + $0x48] sm:$0xff] }
  0x1c   : > { %1061 = vst.msk [vmem:[#allocation2 + $0x10] sm:$0xf] %vm1055_vm4, %v5024_v20  ;;  %v4756_v59 = vld [vmem:[%s5140_s16 + $0x50] sm:$0xff]  ;;  %vm1413_vm12 = vsmask.f32 7938  ;;  %vm5213_vm13 = vmand %vm1057_vm3, %vm1419_vm8 }
  0x1d   : > { %525 = vmatpush.bf16.msra.mxu0 %v4762_v7  ;;  %4910 = vmatpush.bf16.msra.mxu3 %v4762_v7  ;;  %1062 = vst.msk [vmem:[#allocation2 + $0x14] sm:$0x1] %vm1057_vm3, %v5024_v20  ;;  %vm1494_vm14 = vsmask.f32 3328  ;;  %vm5227_vm15 = vmand %vm1055_vm4, %vm1413_vm12  ;;  %vm1495_vm0 = vsmask.f32 7440 }
  0x1e   : > { %1063 = vst.msk [vmem:[#allocation2 + $0x18] sm:$0xf] %vm1055_vm4, %v5024_v20  ;;  %v5195_v48 = vld [vmem:[#allocation4] sm:$0x7]  ;;  %vm5234_vm1 = vmor %vm1494_vm14, %vm1495_vm0  ;;  %vm1659_vm12 = vcmask 1046532  }
  0x1f   : > { %1064 = vst.msk [vmem:[#allocation2 + $0x1c] sm:$0x1] %vm1057_vm3, %v5024_v20  ;;  %vm2705_vm0 = vsmask.f32 1280 }
  0x20   : > { %4043 = vmatmul.msk.bf16.vlgmr.msra.gmra.mxu0 %vm462_vm2, %v4746_v8  ;;  %4057 = vmatmul.msk.bf16.vlgmr.msra.gmra.mxu3 %vm462_vm2, %v4760_v13  ;;  %1065 = vst.msk [vmem:[#allocation2 + $0x20] sm:$0xf] %vm1055_vm4, %v5024_v20 }
  0x21   : > { %1066 = vst.msk [vmem:[#allocation2 + $0x24] sm:$0x1] %vm1057_vm3, %v5024_v20  ;;  %v5199_v60 = vld [vmem:[#allocation2] sm:$0xf] }
  0x22   : > { %1067 = vst.msk [vmem:[#allocation2 + $0x28] sm:$0xf] %vm1055_vm4, %v5024_v20 }
  0x23   : > { %1068 = vst.msk [vmem:[#allocation2 + $0x2c] sm:$0x1] %vm1057_vm3, %v5024_v20 }
  0x24   : > { %1069 = vst.msk [vmem:[#allocation2 + $0x30] sm:$0xf] %vm1055_vm4, %v5024_v20 }
  0x25   : > { %1070 = vst.msk [vmem:[#allocation2 + $0x34] sm:$0x1] %vm1057_vm3, %v5024_v20 }
  0x26   : > { %1071 = vst.msk [vmem:[#allocation2 + $0x38] sm:$0xf] %vm1055_vm4, %v5024_v20 }
  0x27   : > { %1072 = vst.msk [vmem:[#allocation2 + $0x3c] sm:$0x1] %vm1057_vm3, %v5024_v20 }
  0x28   : > { %1073 = vst.msk [vmem:[#allocation2 + $0x40] sm:$0xf] %vm1055_vm4, %v5024_v20 }
  0x29   : > { %1074 = vst.msk [vmem:[#allocation2 + $0x44] sm:$0x1] %vm1057_vm3, %v5024_v20 }
  0x2a   : > { %1075 = vst.msk [vmem:[#allocation2 + $0x48] sm:$0xf] %vm1055_vm4, %v5024_v20 }
  0x2b   : > { %1076 = vst.msk [vmem:[#allocation2 + $0x4c] sm:$0x1] %vm1057_vm3, %v5024_v20  ;;  %vm1658_vm3 = vcmask 1042432  }
  0x2c   : > { %2548 = vst [vmem:[#allocation4 + $0x4] sm:$0x7] %v5024_v20  ;;  %vm5253_vm14 = vmor %vm1658_vm3, %vm1659_vm12  ;;  %vm2708_vm12 = vsmask.f32 5392 }
  0x2d   : > { %2549 = vst [vmem:[#allocation4 + $0x8] sm:$0x7] %v5024_v20 }
  0x2e   : > { %2550 = vst [vmem:[#allocation4 + $0xc] sm:$0x7] %v5024_v20 }
  0x2f   : > { %2551 = vst [vmem:[#allocation4 + $0x10] sm:$0x7] %v5024_v20 }
  0x30   : > { %4044 = vmatmul.msk.bf16.gmra.mxu0 %vm462_vm2, %v4747_v9  ;;  %4058 = vmatmul.msk.bf16.gmra.mxu3 %vm462_vm2, %v4761_v15  ;;  %2659 = vst [vmem:[#allocation1] ss:$2 sm:$0xff] %v5195_v48 }
  0x31   : > { %1486 = vst.msk [vmem:[#allocation3] sm:$0xf] %vm1055_vm4, %v5199_v60 }
  0x40   : > { %4045 = vmatmul.msk.bf16.gmra.mxu0 %vm462_vm2, %v4748_v10 }
  0x50   : > { %4046 = vmatmul.msk.bf16.gmra.mxu0 %vm462_vm2, %v4749_v11 }
  0x60   : > { %4047 = vmatmul.msk.bf16.gmra.mxu0 %vm462_vm2, %v4750_v12 }
  0x70   : > { %4048 = vmatmul.msk.bf16.gmra.mxu0 %vm462_vm2, %v4751_v14 }
  0x80   : > { %4049 = vmatmul.msk.bf16.gmra.mxu0 %vm462_vm2, %v4752_v16 }
  0x90   : > { %4050 = vmatmul.msk.bf16.gmra.mxu0 %vm462_vm2, %v4753_v17 }
  0x9d   : > { %v527_v19 = vpop.f32.mrf.mxu0 }
  0x9e   : > { %v528_v25 = vadd.f32 %v5174_v22, %v527_v19 }
  0xa0   : > { %4051 = vmatmul.msk.bf16.gmra.mxu0 %vm462_vm2, %v4754_v18 }
  0xa5   : > { %v529_v21 = vpop.f32.mrf.mxu0 }
  0xa6   : > { %v530_v41 = vadd.f32 %v5174_v22, %v529_v21 }
  0xad   : > { %v532_v24 = vpop.f32.mrf.mxu0 }
  0xae   : > { %v533_v26 = vadd.f32 %v5174_v22, %v532_v24 }
  0xb0   : > { %v607_v27 = vmax.f32 %v528_v25, %v533_v26  ;;  %4052 = vmatmul.msk.bf16.gmra.mxu0 %vm462_vm2, %v4755_v23  ;;  %v5208_v26 = vld [vmem:[#allocation2 + $0x4] sm:$0x1] }
  0xb2   : > { %v639_v28 = vrot.slane %v607_v27, 2  ;;  %v640_v29 = vrot.slane %v607_v27, 4  ;;  %v641_v30 = vrot.slane %v607_v27, 6  ;;  %v4059_v31 = vrot.slane %v607_v27, 9 }
  0xb4   : > { %v4060_v32 = vrot.slane %v639_v28, 9  ;;  %v4061_v33 = vrot.slane %v640_v29, 9  ;;  %v4062_v34 = vrot.slane %v641_v30, 9  ;;  %v927_v35 = vmax.f32 %v607_v27, %v4059_v31 }
  0xb5   : > { %v534_v36 = vpop.f32.mrf.mxu0 }
  0xb6   : > { %v928_v37 = vmax.f32 %v639_v28, %v4060_v32  ;;  %v929_v38 = vmax.f32 %v640_v29, %v4061_v33  ;;  %v930_v39 = vmax.f32 %v641_v30, %v4062_v34  ;;  %v991_v40 = vmax.f32 %v927_v35, 0.0  ;;  %v1421_v30 = vld [vmem:[#allocation2 + $0xc] sm:$0x1] }
  0xb7   : > { %v535_v42 = vadd.f32 %v5174_v22, %v534_v36  ;;  %v1498_v34 = vshrl.u32 %v5199_v60, 16  ;;  %v1501_v36 = vshll.u32 %v5199_v60, 16 }
  0xb8   : > { %v992_v43 = vmax.f32 %v928_v37, 0.0  ;;  %v993_v44 = vmax.f32 %v929_v38, 0.0  ;;  %v994_v45 = vmax.f32 %v930_v39, 0.0  ;;  %v1077_v46 = vpack.c.bf16 %v991_v40, %v991_v40  ;;  %v1415_v39 = vld [vmem:[#allocation2 + $0x8] sm:$0xf] }
  0xb9   : > { %v608_v47 = vmax.f32 %v530_v41, %v535_v42  ;;  %v1507_v37 = vshll.u32 %v5208_v26, 16  ;;  %v1500_v41 = vrot.slane %v1498_v34, 4 }
  0xba   : > { %v1078_v49 = vpack.c.bf16 %v992_v43, %v992_v43  ;;  %v1079_v50 = vpack.c.bf16 %v993_v44, %v993_v44  ;;  %v1205_v51 = vunpack.c.l.b16 %v1077_v46  ;;  %v1080_v56 = vpack.c.bf16 %v994_v45, %v994_v45  ;;  %v4757_v46 = vld [vmem:[%s5140_s16 + $0x58] sm:$0xff] }
  0xbb   : > { %v642_v52 = vrot.slane %v608_v47, 2  ;;  %v643_v53 = vrot.slane %v608_v47, 4  ;;  %v644_v54 = vrot.slane %v608_v47, 6  ;;  %v4063_v55 = vrot.slane %v608_v47, 9 }
  0xbc   : > { %v1206_v57 = vunpack.c.l.b16 %v1078_v49  ;;  %v1207_v58 = vunpack.c.l.b16 %v1079_v50  ;;  %v1269_v2 = vrot.slane %v1205_v51, 7  ;;  %v1208_v9 = vunpack.c.l.b16 %v1080_v56 }
  0xbd   : > { %v4064_v61 = vrot.slane %v642_v52, 9  ;;  %v4065_v62 = vrot.slane %v643_v53, 9  ;;  %v4066_v63 = vrot.slane %v644_v54, 9  ;;  %v931_v0 = vmax.f32 %v608_v47, %v4063_v55  ;;  %v5201_v1 = vpop.f32.mrf.mxu0 }
  0xbe   : > { %v1270_v3 = vrot.slane %v1206_v57, 6  ;;  %v1273_v4 = vrot.slane %v1207_v58, 5  ;;  %v1276_v19 = vrot.slane %v1208_v9, 4  ;;  %v1503_v44 = vrot.slane %v1501_v36, 5 }
  0xbf   : > { %v932_v5 = vmax.f32 %v642_v52, %v4064_v61  ;;  %v933_v6 = vmax.f32 %v643_v53, %v4065_v62  ;;  %v934_v7 = vmax.f32 %v644_v54, %v4066_v63  ;;  %v995_v8 = vmax.f32 %v931_v0, 0.0  ;;  %v4807_v52 = vld [vmem:[%s6282_s3 + $0xb8] sm:$0xff] }
  0xc0   : > { %v1272_v10 = vsel %vm1271_vm5, %v1270_v3, %v1269_v2  ;;  %4053 = vmatmul.msk.bf16.gmra.mxu0 %vm462_vm2, %v4756_v59  ;;  %v1504_v47 = vor.u32 %v1503_v44, %v1500_v41  ;;  %v1509_v49 = vrot.slane %v1507_v37, 5  ;;  %v538_v53 = vadd.f32 %v5174_v22, %v5201_v1  ;;  %2348 = vmatpush.bf16.msrb.mxu3 %v4807_v52 }
  0xc1   : > { %v996_v11 = vmax.f32 %v932_v5, 0.0  ;;  %v997_v12 = vmax.f32 %v933_v6, 0.0  ;;  %v998_v13 = vmax.f32 %v934_v7, 0.0  ;;  %v1081_v14 = vpack.c.bf16 %v995_v8, %v995_v8 }
  0xc2   : > { %v1275_v15 = vsel %vm1274_vm6, %v1273_v4, %v1272_v10  ;;  %v1505_v55 = vrot.slane %v1504_v47, 4 }
  0xc3   : > { %v1082_v16 = vpack.c.bf16 %v996_v11, %v996_v11  ;;  %v1083_v17 = vpack.c.bf16 %v997_v12, %v997_v12  ;;  %v1084_v18 = vpack.c.bf16 %v998_v13, %v998_v13  ;;  %v1209_v20 = vunpack.c.l.b16 %v1081_v14 }
  0xc4   : > { %v1278_v27 = vsel %vm1277_vm7, %v1276_v19, %v1275_v15  ;;  %v1510_v57 = vsel %vm5234_vm1, %v1505_v55, %v1509_v49 }
  0xc5   : > { %v1210_v21 = vunpack.c.l.b16 %v1082_v16  ;;  %v1211_v23 = vunpack.c.l.b16 %v1083_v17  ;;  %v1212_v24 = vunpack.c.l.b16 %v1084_v18  ;;  %v539_v25 = vpop.f32.mrf.mxu0  ;;  %v1279_v28 = vrot.slane %v1209_v20, 3  ;;  %1609 = vrot.lane.b32.xlu1 %v1510_v57, %s5025_s22 }
  0xc6   : > { %v540_v4 = vadd.f32 %v5174_v22, %v539_v25 }
  0xc7   : > { %v1282_v31 = vrot.slane %v1210_v21, 2  ;;  %v1285_v32 = vrot.slane %v1211_v23, 1  ;;  %v1380_v33 = vpack.c.b16 %v1212_v24, %v1212_v24  ;;  %v1281_v35 = vsel %vm1280_vm9, %v1279_v28, %v1278_v27 }
  0xc9   : > { %v1284_v38 = vsel %vm1283_vm10, %v1282_v31, %v1281_v35  ;;  %v1422_v40 = vsel %vm5213_vm13, %v1380_v33, %v1421_v30 }
  0xca   : > { %v1287_v42 = vsel %vm1286_vm11, %v1285_v32, %v1284_v38  ;;  %1423 = vst [vmem:[#allocation2 + $0xc] sm:$0x1] %v1422_v40  ;;  %v4758_v38 = vld [vmem:[%s5140_s16 + $0x60] sm:$0xff] }
  0xcb   : > { %v1379_v45 = vpack.c.b16 %v1287_v42, %v1287_v42 }
  0xcd   : > { %v1416_v50 = vsel %vm5227_vm15, %v1379_v45, %v1415_v39  ;;  %v542_v51 = vpop.f32.mrf.mxu0 }
  0xce   : > { %1417 = vst [vmem:[#allocation2 + $0x8] sm:$0xf] %v1416_v50  ;;  %v543_v54 = vadd.f32 %v5174_v22, %v542_v51 }
  0xd0   : > { %v609_v56 = vmax.f32 %v538_v53, %v543_v54  ;;  %4054 = vmatmul.msk.bf16.gmra.mxu0 %vm462_vm2, %v4757_v46 }
  0xd1   : > { %v5245_v63 = vld [vmem:[#allocation2 + $0xc] sm:$0x1] }
  0xd2   : > { %v645_v58 = vrot.slane %v609_v56, 2  ;;  %v646_v59 = vrot.slane %v609_v56, 4  ;;  %v647_v61 = vrot.slane %v609_v56, 6  ;;  %v4067_v62 = vrot.slane %v609_v56, 9 }
  0xd3   : > { %v1667_v7 = vrot.slane %v5245_v63, 5  ;;  %v1521_v47 = vshll.u32 %v5245_v63, 16 }
  0xd4   : > { %v4068_v0 = vrot.slane %v645_v58, 9  ;;  %v4069_v1 = vrot.slane %v646_v59, 9  ;;  %v4070_v2 = vrot.slane %v647_v61, 9  ;;  %v935_v3 = vmax.f32 %v609_v56, %v4067_v62 }
  0xd5   : > { %v544_v5 = vpop.f32.mrf.mxu0  ;;  %v1468_v6 = vld [vmem:[#allocation2 + $0x8] sm:$0xf] }
  0xd6   : > { %v936_v8 = vmax.f32 %v645_v58, %v4068_v0  ;;  %v937_v9 = vmax.f32 %v646_v59, %v4069_v1  ;;  %v938_v10 = vmax.f32 %v647_v61, %v4070_v2  ;;  %v999_v11 = vmax.f32 %v935_v3, 0.0  ;;  %1710 = vrot.lane.b32.xlu0 %v1468_v6, %s5025_s22  ;;  %1487 = vst.msk [vmem:[#allocation3 + $0x14] sm:$0xf] %vm1055_vm4, %v1468_v6 }
  0xd7   : > { %v545_v13 = vadd.f32 %v5174_v22, %v544_v5  ;;  %v1512_v14 = vshrl.u32 %v1468_v6, 16  ;;  %v1515_v15 = vshll.u32 %v1468_v6, 16  ;;  %v4124_v16 = vrot.slane %v1468_v6, 9 }
  0xd8   : > { %v1000_v17 = vmax.f32 %v936_v8, 0.0  ;;  %v1001_v18 = vmax.f32 %v937_v9, 0.0  ;;  %v1002_v19 = vmax.f32 %v938_v10, 0.0  ;;  %v1085_v20 = vpack.c.bf16 %v999_v11, %v999_v11 }
  0xd9   : > { %v610_v21 = vmax.f32 %v540_v4, %v545_v13  ;;  %v5260_v23 = vsel %vm5253_vm14, %v4124_v16, %v1667_v7  ;;  %v1514_v28 = vrot.slane %v1512_v14, 4  ;;  %v1517_v37 = vrot.slane %v1515_v15, 5  ;;  %v1427_v14 = vld [vmem:[#allocation2 + $0x14] sm:$0x1] }
  0xda   : > { %v1086_v24 = vpack.c.bf16 %v1000_v17, %v1000_v17  ;;  %v1087_v25 = vpack.c.bf16 %v1001_v18, %v1001_v18  ;;  %v1213_v27 = vunpack.c.l.b16 %v1085_v20  ;;  %1702 = vst.msk [vmem:[#allocation3 + $0x18] sm:$0xf] %vm1055_vm4, %v5260_v23  ;;  %v1088_v34 = vpack.c.bf16 %v1002_v19, %v1002_v19 }
  0xdb   : > { %v648_v30 = vrot.slane %v610_v21, 2  ;;  %v649_v31 = vrot.slane %v610_v21, 4  ;;  %v650_v32 = vrot.slane %v610_v21, 6  ;;  %v4071_v33 = vrot.slane %v610_v21, 9 }
  0xdc   : > { %v1214_v35 = vunpack.c.l.b16 %v1086_v24  ;;  %v1215_v36 = vunpack.c.l.b16 %v1087_v25  ;;  %v1288_v45 = vrot.slane %v1213_v27, 7  ;;  %v1216_v54 = vunpack.c.l.b16 %v1088_v34  ;;  %v1424_v25 = vld [vmem:[#allocation2 + $0x10] sm:$0xf] }
  0xdd   : > { %v4072_v39 = vrot.slane %v648_v30, 9  ;;  %v4073_v40 = vrot.slane %v649_v31, 9  ;;  %v4074_v41 = vrot.slane %v650_v32, 9  ;;  %v939_v42 = vmax.f32 %v610_v21, %v4071_v33  ;;  %v547_v44 = vpop.f32.mrf.mxu0 }
  0xde   : > { %v1289_v46 = vrot.slane %v1214_v35, 6  ;;  %v1291_v55 = vrot.slane %v1215_v36, 5  ;;  %v1518_v56 = vor.u32 %v1517_v37, %v1514_v28  ;;  %v1523_v1 = vrot.slane %v1521_v47, 5  ;;  %v4759_v28 = vld [vmem:[%s5140_s16 + $0x68] sm:$0xff]  ;;  %s323_s16 = sand.u32 1, %s5013_s10  }
  0xdf   : > { %v940_v49 = vmax.f32 %v648_v30, %v4072_v39  ;;  %v941_v50 = vmax.f32 %v649_v31, %v4073_v40  ;;  %v942_v51 = vmax.f32 %v650_v32, %v4074_v41  ;;  %v1003_v53 = vmax.f32 %v939_v42, 0.0  ;;  %s3898_s28 = scalar_lea.sflag [#allocation8], %s323_s16 }
  0xe0   : > { %4055 = vmatmul.msk.bf16.gmra.mxu0 %vm462_vm2, %v4758_v38  ;;  %v1290_v57 = vsel %vm1271_vm5, %v1289_v46, %v1288_v45  ;;  %v1519_v0 = vrot.slane %v1518_v56, 4  ;;  %v1293_v7 = vrot.slane %v1216_v54, 4  ;;  %v548_v32 = vadd.f32 %v5174_v22, %v547_v44  ;;  %v5288_v44 = vpop.f32.mrf.mxu3 }
  0xe1   : > { %v1004_v58 = vmax.f32 %v940_v49, 0.0  ;;  %v1005_v59 = vmax.f32 %v941_v50, 0.0  ;;  %v1006_v61 = vmax.f32 %v942_v51, 0.0  ;;  %v1089_v62 = vpack.c.bf16 %v1003_v53, %v1003_v53 }
  0xe2   : > { %v1292_v4 = vsel %vm1274_vm6, %v1291_v55, %v1290_v57  ;;  %v1524_v6 = vsel %vm5234_vm1, %v1519_v0, %v1523_v1 }
  0xe3   : > { %v1090_v2 = vpack.c.bf16 %v1004_v58, %v1004_v58  ;;  %v1091_v3 = vpack.c.bf16 %v1005_v59, %v1005_v59  ;;  %v1092_v63 = vpack.c.bf16 %v1006_v61, %v1006_v61  ;;  %v1217_v5 = vunpack.c.l.b16 %v1089_v62  ;;  %1611 = vrot.lane.b32.xlu1 %v1524_v6, %s5025_s22  ;;  %1764 = vst.msk [vmem:[#allocation3 + $0x8] sm:$0xf] %vm1055_vm4, %v1524_v6 }
  0xe4   : > { %v1294_v15 = vsel %vm1277_vm7, %v1293_v7, %v1292_v4 }
  0xe5   : > { %v1218_v8 = vunpack.c.l.b16 %v1090_v2  ;;  %v1219_v9 = vunpack.c.l.b16 %v1091_v3  ;;  %v1220_v10 = vunpack.c.l.b16 %v1092_v63  ;;  %v549_v11 = vpop.f32.mrf.mxu0  ;;  %v1295_v13 = vrot.slane %v1217_v5, 3 }
  0xe6   : > { %v550_v46 = vadd.f32 %v5174_v22, %v549_v11 }
  0xe7   : > { %v1297_v16 = vrot.slane %v1218_v8, 2  ;;  %v1299_v17 = vrot.slane %v1219_v9, 1  ;;  %v1382_v18 = vpack.c.b16 %v1220_v10, %v1220_v10  ;;  %v1296_v19 = vsel %vm1280_vm9, %v1295_v13, %v1294_v15 }
  0xe9   : > { %v1298_v20 = vsel %vm1283_vm10, %v1297_v16, %v1296_v19  ;;  %v1428_v21 = vsel %vm5213_vm13, %v1382_v18, %v1427_v14 }
  0xea   : > { %v1300_v24 = vsel %vm1286_vm11, %v1299_v17, %v1298_v20  ;;  %1429 = vst [vmem:[#allocation2 + $0x14] sm:$0x1] %v1428_v21 }
  0xeb   : > { %v1381_v27 = vpack.c.b16 %v1300_v24, %v1300_v24 }
  0xed   : > { %v1425_v30 = vsel %vm5227_vm15, %v1381_v27, %v1424_v25  ;;  %v552_v31 = vpop.f32.mrf.mxu0 }
  0xee   : > { %1426 = vst [vmem:[#allocation2 + $0x10] sm:$0xf] %v1425_v30  ;;  %v553_v33 = vadd.f32 %v5174_v22, %v552_v31 }
  0xf0   : > { %v611_v34 = vmax.f32 %v548_v32, %v553_v33  ;;  %4056 = vmatmul.msk.bf16.gmra.mxu0 %vm462_vm2, %v4759_v28  ;;  %v5304_v32 = vpop.f32.mrf.mxu3  ;;  %vm1633_vm2 = vcmask 1043968  }
  0xf1   : > { %v5285_v39 = vld [vmem:[#allocation2 + $0x14] sm:$0x1] }
  0xf2   : > { %v651_v35 = vrot.slane %v611_v34, 2  ;;  %v652_v36 = vrot.slane %v611_v34, 4  ;;  %v653_v37 = vrot.slane %v611_v34, 6  ;;  %v4075_v38 = vrot.slane %v611_v34, 9 }
  0xf3   : > { %v1671_v50 = vrot.slane %v5285_v39, 5  ;;  %v1535_v25 = vshll.u32 %v5285_v39, 16 }
  0xf4   : > { %v4076_v40 = vrot.slane %v651_v35, 9  ;;  %v4077_v41 = vrot.slane %v652_v36, 9  ;;  %v4078_v42 = vrot.slane %v653_v37, 9  ;;  %v943_v45 = vmax.f32 %v611_v34, %v4075_v38 }
  0xf5   : > { %v554_v47 = vpop.f32.mrf.mxu0  ;;  %v1470_v49 = vld [vmem:[#allocation2 + $0x10] sm:$0xf] }
  0xf6   : > { %v944_v51 = vmax.f32 %v651_v35, %v4076_v40  ;;  %v945_v53 = vmax.f32 %v652_v36, %v4077_v41  ;;  %v946_v54 = vmax.f32 %v653_v37, %v4078_v42  ;;  %v1007_v55 = vmax.f32 %v943_v45, 0.0  ;;  %1712 = vrot.lane.b32.xlu0 %v1470_v49, %s5025_s22  ;;  %1488 = vst.msk [vmem:[#allocation3 + $0x28] sm:$0xf] %vm1055_vm4, %v1470_v49 }
  0xf7   : > { %v555_v56 = vadd.f32 %v5174_v22, %v554_v47  ;;  %1809 = vst.msk [vmem:[#allocation3 + $0xc] sm:$0xf] %vm1055_vm4, %v1470_v49  ;;  %v1526_v57 = vshrl.u32 %v1470_v49, 16  ;;  %v1529_v58 = vshll.u32 %v1470_v49, 16  ;;  %v4125_v59 = vrot.slane %v1470_v49, 9 }
  0xf8   : > { %v1008_v61 = vmax.f32 %v944_v51, 0.0  ;;  %v1009_v62 = vmax.f32 %v945_v53, 0.0  ;;  %v1010_v0 = vmax.f32 %v946_v54, 0.0  ;;  %v1093_v1 = vpack.c.bf16 %v1007_v55, %v1007_v55 }
  0xf9   : > { %v612_v2 = vmax.f32 %v550_v46, %v555_v56  ;;  %v5297_v3 = vsel %vm5253_vm14, %v4125_v59, %v1671_v50  ;;  %v1528_v6 = vrot.slane %v1526_v57, 4  ;;  %v1531_v15 = vrot.slane %v1529_v58, 5  ;;  %v1433_v59 = vld [vmem:[#allocation2 + $0x1c] sm:$0x1] }
  0xfa   : > { %v1094_v63 = vpack.c.bf16 %v1008_v61, %v1008_v61  ;;  %v1095_v4 = vpack.c.bf16 %v1009_v62, %v1009_v62  ;;  %v1221_v5 = vunpack.c.l.b16 %v1093_v1  ;;  %1703 = vst.msk [vmem:[#allocation3 + $0x2c] sm:$0xf] %vm1055_vm4, %v5297_v3  ;;  %v1096_v11 = vpack.c.bf16 %v1010_v0, %v1010_v0 }
  0xfb   : > { %v654_v7 = vrot.slane %v612_v2, 2  ;;  %v655_v8 = vrot.slane %v612_v2, 4  ;;  %v656_v9 = vrot.slane %v612_v2, 6  ;;  %v4079_v10 = vrot.slane %v612_v2, 9  ;;  %1853 = vst.msk [vmem:[#allocation3 + $0x10] sm:$0xf] %vm1055_vm4, %v5297_v3 }
  0xfc   : > { %v1222_v13 = vunpack.c.l.b16 %v1094_v63  ;;  %v1223_v14 = vunpack.c.l.b16 %v1095_v4  ;;  %v1301_v21 = vrot.slane %v1221_v5, 7  ;;  %v1224_v33 = vunpack.c.l.b16 %v1096_v11 }
  0xfd   : > { %v4080_v16 = vrot.slane %v654_v7, 9  ;;  %v4081_v17 = vrot.slane %v655_v8, 9  ;;  %v4082_v18 = vrot.slane %v656_v9, 9  ;;  %v947_v19 = vmax.f32 %v612_v2, %v4079_v10  ;;  %v557_v20 = vpop.f32.mrf.mxu0 }
  0xfe   : > { %v1302_v24 = vrot.slane %v1222_v13, 6  ;;  %v1304_v34 = vrot.slane %v1223_v14, 5  ;;  %v1532_v35 = vor.u32 %v1531_v15, %v1528_v6  ;;  %v1537_v45 = vrot.slane %v1535_v25, 5  ;;  %v602_v6 = vpop.f32.mrf.mxu3 }
  0xff   : > { %v948_v27 = vmax.f32 %v654_v7, %v4080_v16  ;;  %v949_v28 = vmax.f32 %v655_v8, %v4081_v17  ;;  %v950_v30 = vmax.f32 %v656_v9, %v4082_v18  ;;  %v1011_v31 = vmax.f32 %v947_v19, 0.0  ;;  %v1430_v8 = vld [vmem:[#allocation2 + $0x18] sm:$0xf] }
 0x100   : > { %v1303_v36 = vsel %vm1271_vm5, %v1302_v24, %v1301_v21  ;;  %v1533_v42 = vrot.slane %v1532_v35, 4  ;;  %v1306_v53 = vrot.slane %v1224_v33, 4  ;;  %v598_v63 = vadd.f32 %v5174_v22, %v5288_v44 }
 0x101   : > { %v1012_v37 = vmax.f32 %v948_v27, 0.0  ;;  %v1013_v38 = vmax.f32 %v949_v28, 0.0  ;;  %v1014_v40 = vmax.f32 %v950_v30, 0.0  ;;  %v1097_v41 = vpack.c.bf16 %v1011_v31, %v1011_v31 }
 0x102   : > { %v1305_v49 = vsel %vm1274_vm6, %v1304_v34, %v1303_v36  ;;  %v1538_v51 = vsel %vm5234_vm1, %v1533_v42, %v1537_v45  ;;  %v603_v9 = vadd.f32 %v5174_v22, %v602_v6  ;;  %v558_v44 = vadd.f32 %v5174_v22, %v557_v20 }
 0x103   : > { %v1098_v46 = vpack.c.bf16 %v1012_v37, %v1012_v37  ;;  %v1099_v47 = vpack.c.bf16 %v1013_v38, %v1013_v38  ;;  %v1100_v39 = vpack.c.bf16 %v1014_v40, %v1014_v40  ;;  %v1225_v50 = vunpack.c.l.b16 %v1097_v41  ;;  %1765 = vst.msk [vmem:[#allocation3 + $0x1c] sm:$0xf] %vm1055_vm4, %v1538_v51  ;;  %1613 = vrot.lane.b32.xlu0 %v1538_v51, %s5025_s22 }
 0x104   : > { %v1307_v61 = vsel %vm1277_vm7, %v1306_v53, %v1305_v49  ;;  %v621_v11 = vmax.f32 %v598_v63, %v603_v9 }
 0x105   : > { %v1226_v54 = vunpack.c.l.b16 %v1098_v46  ;;  %v1227_v55 = vunpack.c.l.b16 %v1099_v47  ;;  %v1228_v56 = vunpack.c.l.b16 %v1100_v39  ;;  %v559_v57 = vpop.f32.mrf.mxu0  ;;  %v1308_v58 = vrot.slane %v1225_v50, 3 }
 0x106   : > { %v681_v16 = vrot.slane %v621_v11, 2  ;;  %v682_v17 = vrot.slane %v621_v11, 4  ;;  %v683_v18 = vrot.slane %v621_v11, 6  ;;  %v4115_v19 = vrot.slane %v621_v11, 9  ;;  %v604_v42 = vpop.f32.mrf.mxu3 }
 0x107   : > { %v1310_v62 = vrot.slane %v1226_v54, 2  ;;  %v1312_v0 = vrot.slane %v1227_v55, 1  ;;  %v1384_v1 = vpack.c.b16 %v1228_v56, %v1228_v56  ;;  %v1309_v2 = vsel %vm1280_vm9, %v1308_v58, %v1307_v61 }
 0x108   : > { %v4116_v24 = vrot.slane %v681_v16, 9  ;;  %v4117_v25 = vrot.slane %v682_v17, 9  ;;  %v4118_v27 = vrot.slane %v683_v18, 9  ;;  %v983_v28 = vmax.f32 %v621_v11, %v4115_v19 }
 0x109   : > { %v1311_v4 = vsel %vm1283_vm10, %v1310_v62, %v1309_v2  ;;  %v1434_v5 = vsel %vm5213_vm13, %v1384_v1, %v1433_v59  ;;  %v560_v45 = vadd.f32 %v5174_v22, %v559_v57  ;;  %v600_v57 = vadd.f32 %v5174_v22, %v5304_v32 }
 0x10a   : > { %v1313_v7 = vsel %vm1286_vm11, %v1312_v0, %v1311_v4  ;;  %1435 = vst [vmem:[#allocation2 + $0x1c] sm:$0x1] %v1434_v5  ;;  %v984_v35 = vmax.f32 %v681_v16, %v4116_v24  ;;  %v985_v36 = vmax.f32 %v682_v17, %v4117_v25  ;;  %v1047_v37 = vmax.f32 %v983_v28, 0.0 }
 0x10b   : > { %v1383_v10 = vpack.c.b16 %v1313_v7, %v1313_v7  ;;  %v986_v39 = vmax.f32 %v683_v18, %v4118_v27  ;;  %v605_v59 = vadd.f32 %v5174_v22, %v604_v42 }
 0x10c   : > { %v1048_v49 = vmax.f32 %v984_v35, 0.0  ;;  %v1049_v50 = vmax.f32 %v985_v36, 0.0  ;;  %v1133_v58 = vpack.c.bf16 %v1047_v37, %v1047_v37 }
 0x10d   : > { %v1431_v13 = vsel %vm5227_vm15, %v1383_v10, %v1430_v8  ;;  %v562_v14 = vpop.f32.mrf.mxu0  ;;  %v1050_v63 = vmax.f32 %v986_v39, 0.0 }
 0x10e   : > { %1432 = vst [vmem:[#allocation2 + $0x18] sm:$0xf] %v1431_v13  ;;  %v563_v15 = vadd.f32 %v5174_v22, %v562_v14  ;;  %v1134_v4 = vpack.c.bf16 %v1048_v49, %v1048_v49  ;;  %v5338_v5 = vpack.c.bf16 %v1049_v50, %v1049_v50  ;;  %v1261_v16 = vunpack.c.l.b16 %v1133_v58 }
 0x10f   : > { %v1136_v37 = vpack.c.bf16 %v1050_v63, %v1050_v63 }
 0x110   : > { %v613_v21 = vmax.f32 %v558_v44, %v563_v15  ;;  %v1366_v50 = vrot.slane %v1261_v16, 7 }
 0x112   : > { %v657_v30 = vrot.slane %v613_v21, 2  ;;  %v658_v31 = vrot.slane %v613_v21, 4  ;;  %v659_v33 = vrot.slane %v613_v21, 6  ;;  %v4083_v34 = vrot.slane %v613_v21, 9 }
 0x114   : > { %v4084_v38 = vrot.slane %v657_v30, 9  ;;  %v4085_v20 = vrot.slane %v658_v31, 9  ;;  %v4086_v40 = vrot.slane %v659_v33, 9  ;;  %v951_v41 = vmax.f32 %v613_v21, %v4083_v34 }
 0x115   : > { %v564_v46 = vpop.f32.mrf.mxu0  ;;  %v5326_v47 = vld [vmem:[#allocation2 + $0x18] sm:$0xf] }
 0x116   : > { %v952_v51 = vmax.f32 %v657_v30, %v4084_v38  ;;  %v953_v53 = vmax.f32 %v658_v31, %v4085_v20  ;;  %v954_v54 = vmax.f32 %v659_v33, %v4086_v40  ;;  %v1015_v55 = vmax.f32 %v951_v41, 0.0  ;;  %1714 = vrot.lane.b32.xlu2 %v5326_v47, %s5025_s22  ;;  %1489 = vst.msk [vmem:[#allocation3 + $0x3c] sm:$0xf] %vm1055_vm4, %v5326_v47 }
 0x117   : > { %v565_v56 = vadd.f32 %v5174_v22, %v564_v46  ;;  %1810 = vst.msk [vmem:[#allocation3 + $0x20] sm:$0xf] %vm1055_vm4, %v5326_v47  ;;  %v1262_v30 = vunpack.c.l.b16 %v1134_v4  ;;  %v1263_v38 = vunpack.c.l.b16 %v5338_v5  ;;  %v5342_v20 = vmax.f32 %v600_v57, %v605_v59  ;;  %v1439_v5 = vld [vmem:[#allocation2 + $0x24] sm:$0x1] }
 0x118   : > { %v1016_v61 = vmax.f32 %v952_v51, 0.0  ;;  %v1017_v62 = vmax.f32 %v953_v53, 0.0  ;;  %v1018_v0 = vmax.f32 %v954_v54, 0.0  ;;  %v1101_v1 = vpack.c.bf16 %v1015_v55, %v1015_v55 }
 0x119   : > { %v614_v2 = vmax.f32 %v560_v45, %v565_v56  ;;  %v1367_v55 = vrot.slane %v1262_v30, 6  ;;  %v1473_v56 = vld [vmem:[#allocation2 + $0x1c] sm:$0x1]  ;;  %v1540_v57 = vshrl.u32 %v5326_v47, 16  ;;  %v1543_v59 = vshll.u32 %v5326_v47, 16 }
 0x11a   : > { %v1102_v6 = vpack.c.bf16 %v1016_v61, %v1016_v61  ;;  %v1103_v7 = vpack.c.bf16 %v1017_v62, %v1017_v62  ;;  %v1104_v8 = vpack.c.bf16 %v1018_v0, %v1018_v0  ;;  %v1229_v9 = vunpack.c.l.b16 %v1101_v1 }
 0x11b   : > { %v660_v10 = vrot.slane %v614_v2, 2  ;;  %v661_v11 = vrot.slane %v614_v2, 4  ;;  %v662_v13 = vrot.slane %v614_v2, 6  ;;  %v4087_v32 = vrot.slane %v614_v2, 9 }
 0x11c   : > { %v1230_v14 = vunpack.c.l.b16 %v1102_v6  ;;  %v1231_v44 = vunpack.c.l.b16 %v1103_v7  ;;  %v1232_v15 = vunpack.c.l.b16 %v1104_v8  ;;  %v1314_v25 = vrot.slane %v1229_v9, 7 }
 0x11d   : > { %v4088_v17 = vrot.slane %v660_v10, 9  ;;  %v4089_v18 = vrot.slane %v661_v11, 9  ;;  %v4090_v19 = vrot.slane %v662_v13, 9  ;;  %v955_v21 = vmax.f32 %v614_v2, %v4087_v32  ;;  %v567_v24 = vpop.f32.mrf.mxu0 }
 0x11e   : > { %v1315_v27 = vrot.slane %v1230_v14, 6  ;;  %v1317_v28 = vrot.slane %v1231_v44, 5  ;;  %v1319_v40 = vrot.slane %v1232_v15, 4  ;;  %v5346_v49 = vadd.f32 %v5174_v22, %v567_v24 }
 0x11f   : > { %v956_v31 = vmax.f32 %v660_v10, %v4088_v17  ;;  %v957_v33 = vmax.f32 %v661_v11, %v4089_v18  ;;  %v958_v34 = vmax.f32 %v662_v13, %v4090_v19  ;;  %v1019_v35 = vmax.f32 %v955_v21, 0.0  ;;  %v1436_v17 = vld [vmem:[#allocation2 + $0x20] sm:$0xf] }
 0x120   : > { %v1316_v36 = vsel %vm1271_vm5, %v1315_v27, %v1314_v25  ;;  %v1264_v61 = vunpack.c.l.b16 %v1136_v37  ;;  %v1542_v6 = vrot.slane %v1540_v57, 4  ;;  %v1545_v7 = vrot.slane %v1543_v59, 5 }
 0x121   : > { %v1020_v41 = vmax.f32 %v956_v31, 0.0  ;;  %v1021_v42 = vmax.f32 %v957_v33, 0.0  ;;  %v1022_v45 = vmax.f32 %v958_v34, 0.0  ;;  %v1318_v46 = vsel %vm1274_vm6, %v1317_v28, %v1316_v36 }
 0x122   : > { %v1105_v39 = vpack.c.bf16 %v1019_v35, %v1019_v35  ;;  %v1320_v62 = vsel %vm1277_vm7, %v1319_v40, %v1318_v46  ;;  %v1549_v8 = vshll.u32 %v1473_v56, 16  ;;  %v1368_v13 = vsel %vm1271_vm5, %v1367_v55, %v1366_v50 }
 0x123   : > { %v1106_v51 = vpack.c.bf16 %v1020_v41, %v1020_v41  ;;  %v1107_v53 = vpack.c.bf16 %v1021_v42, %v1021_v42  ;;  %v1108_v54 = vpack.c.bf16 %v1022_v45, %v1022_v45  ;;  %v1369_v14 = vrot.slane %v1263_v38, 5 }
 0x124   : > { %v1233_v58 = vunpack.c.l.b16 %v1105_v39  ;;  %v1546_v44 = vor.u32 %v1545_v7, %v1542_v6  ;;  %v1551_v15 = vrot.slane %v1549_v8, 5  ;;  %v684_v19 = vrot.slane %v5342_v20, 2 }
 0x125   : > { %v1234_v0 = vunpack.c.l.b16 %v1106_v51  ;;  %v1235_v1 = vunpack.c.l.b16 %v1107_v53  ;;  %v1236_v2 = vunpack.c.l.b16 %v1108_v54  ;;  %v569_v63 = vpop.f32.mrf.mxu0  ;;  %v685_v21 = vrot.slane %v5342_v20, 4  ;;  %v4791_v54 = vld [vmem:[%s6282_s3 + $0x38] sm:$0xff] }
 0x126   : > { %v1321_v4 = vrot.slane %v1233_v58, 3  ;;  %v1547_v25 = vrot.slane %v1546_v44, 4  ;;  %v686_v27 = vrot.slane %v5342_v20, 6  ;;  %v4119_v28 = vrot.slane %v5342_v20, 9  ;;  %2290 = vmatpush.bf16.msra.mxu1 %v4791_v54 }
 0x127   : > { %v1323_v9 = vrot.slane %v1234_v0, 2  ;;  %v1325_v10 = vrot.slane %v1235_v1, 1  ;;  %v1386_v11 = vpack.c.b16 %v1236_v2, %v1236_v2  ;;  %v4120_v31 = vrot.slane %v684_v19, 9  ;;  %v4790_v1 = vld [vmem:[%s6282_s3 + $0x30] sm:$0xff] }
 0x128   : > { %v1322_v32 = vsel %vm1280_vm9, %v1321_v4, %v1320_v62  ;;  %v4121_v33 = vrot.slane %v685_v21, 9  ;;  %v4126_v34 = vrot.slane %v5326_v47, 9  ;;  %v1371_v35 = vrot.slane %v1264_v61, 4 }
 0x129   : > { %v1324_v16 = vsel %vm1283_vm10, %v1323_v9, %v1322_v32  ;;  %v1440_v18 = vsel %vm5213_vm13, %v1386_v11, %v1439_v5  ;;  %v1552_v36 = vsel %vm5234_vm1, %v1547_v25, %v1551_v15  ;;  %v4122_v37 = vrot.slane %v686_v27, 9 }
 0x12a   : > { %v1326_v24 = vsel %vm1286_vm11, %v1325_v10, %v1324_v16  ;;  %1441 = vst [vmem:[#allocation2 + $0x24] sm:$0x1] %v1440_v18  ;;  %v987_v38 = vmax.f32 %v5342_v20, %v4119_v28  ;;  %v1675_v41 = vrot.slane %v1473_v56, 5  ;;  %1615 = vrot.lane.b32.xlu1 %v1552_v36, %s5025_s22  ;;  %v988_v42 = vmax.f32 %v684_v19, %v4120_v31  ;;  %v1463_v10 = vld [vmem:[#allocation2 + $0x44] sm:$0x1] }
 0x12b   : > { %v1385_v30 = vpack.c.b16 %v1326_v24, %v1326_v24  ;;  %1766 = vst.msk [vmem:[#allocation3 + $0x30] sm:$0xf] %vm1055_vm4, %v1552_v36  ;;  %v989_v45 = vmax.f32 %v685_v21, %v4121_v33  ;;  %v1370_v47 = vsel %vm1274_vm6, %v1369_v14, %v1368_v13  ;;  %v990_v39 = vmax.f32 %v686_v27, %v4122_v37  ;;  %v4789_v18 = vld [vmem:[%s6282_s3 + $0x28] sm:$0xff]  ;;  %v5400_v31 = vld [vmem:[%s6281_s2] ss:$0 sm:$0xff] }
 0x12c   : > { %v1051_v50 = vmax.f32 %v987_v38, 0.0  ;;  %v1052_v53 = vmax.f32 %v988_v42, 0.0  ;;  %v5376_v55 = vsel %vm5253_vm14, %v4126_v34, %v1675_v41  ;;  %v1372_v57 = vsel %vm1277_vm7, %v1371_v35, %v1370_v47  ;;  %2291 = vmatpush.bf16.msra.mxu1 %v4790_v1  ;;  %v1460_v35 = vld [vmem:[#allocation2 + $0x40] sm:$0xf] }
 0x12d   : > { %v1437_v40 = vsel %vm5227_vm15, %v1385_v30, %v1436_v17  ;;  %v572_v46 = vpop.f32.mrf.mxu0  ;;  %v1053_v20 = vmax.f32 %v989_v45, 0.0  ;;  %v1054_v56 = vmax.f32 %v990_v39, 0.0  ;;  %v570_v59 = vadd.f32 %v5174_v22, %v569_v63  ;;  %1704 = vst.msk [vmem:[#allocation3 + $0x40] sm:$0xf] %vm1055_vm4, %v5376_v55 }
 0x12e   : > { %1438 = vst [vmem:[#allocation2 + $0x20] sm:$0xf] %v1437_v40  ;;  %v573_v51 = vadd.f32 %v5174_v22, %v572_v46  ;;  %v1137_v58 = vpack.c.bf16 %v1051_v50, %v1051_v50  ;;  %v1138_v62 = vpack.c.bf16 %v1052_v53, %v1052_v53  ;;  %v4788_v46 = vld [vmem:[%s6282_s3 + $0x20] sm:$0xff]  ;;  %v1663_v47 = vrot.slane %v5208_v26, 5 }
 0x12f   : > { %v1139_v0 = vpack.c.bf16 %v1053_v20, %v1053_v20  ;;  %v1140_v2 = vpack.c.bf16 %v1054_v56, %v1054_v56  ;;  %1854 = vst.msk [vmem:[#allocation3 + $0x24] sm:$0xf] %vm1055_vm4, %v5376_v55 }
 0x130   : > { %v615_v61 = vmax.f32 %v5346_v49, %v573_v51  ;;  %v1265_v4 = vunpack.c.l.b16 %v1137_v58  ;;  %v1266_v7 = vunpack.c.l.b16 %v1138_v62  ;;  %2292 = vmatpush.bf16.msra.mxu1 %v4789_v18 }
 0x131   : > { %v1267_v49 = vunpack.c.l.b16 %v1139_v0  ;;  %v1268_v22 = vunpack.c.l.b16 %v1140_v2 }
 0x132   : > { %v663_v5 = vrot.slane %v615_v61, 2  ;;  %v664_v6 = vrot.slane %v615_v61, 4  ;;  %v665_v8 = vrot.slane %v615_v61, 6  ;;  %v4091_v9 = vrot.slane %v615_v61, 9 }
 0x133   : > { %v1373_v63 = vrot.slane %v1265_v4, 3  ;;  %v1375_v32 = vrot.slane %v1266_v7, 2  ;;  %v1377_v14 = vrot.slane %v1267_v49, 1  ;;  %v1394_v21 = vpack.c.b16 %v1268_v22, %v1268_v22  ;;  %v4787_v4 = vld [vmem:[%s6282_s3 + $0x18] sm:$0xff]  ;;  %v1475_v22 = vld [vmem:[#allocation2 + $0x24] sm:$0x1] }
 0x134   : > { %v4092_v11 = vrot.slane %v663_v5, 9  ;;  %v4093_v13 = vrot.slane %v664_v6, 9  ;;  %v4094_v44 = vrot.slane %v665_v8, 9  ;;  %v959_v15 = vmax.f32 %v615_v61, %v4091_v9  ;;  %2293 = vmatpush.bf16.msra.mxu1 %v4788_v46 }
 0x135   : > { %v574_v16 = vpop.f32.mrf.mxu0  ;;  %v5388_v17 = vld [vmem:[#allocation2 + $0x20] sm:$0xf]  ;;  %v1374_v19 = vsel %vm1280_vm9, %v1373_v63, %v1372_v57  ;;  %v1464_v36 = vsel %vm5213_vm13, %v1394_v21, %v1463_v10  ;;  %v4123_v63 = vrot.slane %v5199_v60, 9  ;;  %v4799_v60 = vld [vmem:[%s6282_s3 + $0x78] sm:$0xff] }
 0x136   : > { %v960_v24 = vmax.f32 %v663_v5, %v4092_v11  ;;  %v961_v25 = vmax.f32 %v664_v6, %v4093_v13  ;;  %1716 = vrot.lane.b32.xlu2 %v5388_v17, %s5025_s22  ;;  %v1376_v27 = vsel %vm1283_vm10, %v1375_v32, %v1374_v19  ;;  %v962_v28 = vmax.f32 %v665_v8, %v4094_v44 }
 0x137   : > { %v1023_v30 = vmax.f32 %v959_v15, 0.0  ;;  %v575_v33 = vadd.f32 %v5400_v31, %v574_v16  ;;  %1490 = vst.msk [vmem:[#allocation3 + $0x50] sm:$0xf] %vm1055_vm4, %v5388_v17  ;;  %v1378_v34 = vsel %vm1286_vm11, %v1377_v14, %v1376_v27  ;;  %v1554_v51 = vshrl.u32 %v5388_v17, 16  ;;  %2319 = vmatpush.bf16.msra.mxu2 %v4799_v60  ;;  %v1610_v46 = vpop.permute.xlu1 %1609  ;;  %v4795_v60 = vld [vmem:[%s6282_s3 + $0x58] sm:$0xff] }
 0x138   : > { %v1024_v37 = vmax.f32 %v960_v24, 0.0  ;;  %v1025_v38 = vmax.f32 %v961_v25, 0.0  ;;  %1811 = vst.msk [vmem:[#allocation3 + $0x34] sm:$0xf] %vm1055_vm4, %v5388_v17  ;;  %v1393_v40 = vpack.c.b16 %v1378_v34, %v1378_v34  ;;  %v1026_v41 = vmax.f32 %v962_v28, 0.0  ;;  %2294 = vmatpush.bf16.msra.mxu1 %v4787_v4  ;;  %v4786_v25 = vld [vmem:[%s6282_s3 + $0x10] sm:$0xff] }
 0x139   : > { %1465 = vst [vmem:[#allocation2 + $0x44] sm:$0x1] %v1464_v36  ;;  %v1109_v42 = vpack.c.bf16 %v1023_v30, %v1023_v30  ;;  %v616_v45 = vmax.f32 %v570_v59, %v575_v33  ;;  %v1557_v56 = vshll.u32 %v5388_v17, 16  ;;  %v1556_v32 = vrot.slane %v1554_v51, 4 }
 0x13a   : > { %v1110_v39 = vpack.c.bf16 %v1024_v37, %v1024_v37  ;;  %v1111_v50 = vpack.c.bf16 %v1025_v38, %v1025_v38  ;;  %v1461_v53 = vsel %vm5227_vm15, %v1393_v40, %v1460_v35  ;;  %v1112_v62 = vpack.c.bf16 %v1026_v41, %v1026_v41  ;;  %1634 = vst.msk [vmem:[#allocation3] sm:$0xf] %vm1633_vm2, %v1610_v46 }
 0x13b   : > { %v1237_v20 = vunpack.c.l.b16 %v1109_v42  ;;  %v666_v54 = vrot.slane %v616_v45, 2  ;;  %1462 = vst [vmem:[#allocation2 + $0x40] sm:$0xf] %v1461_v53  ;;  %v667_v57 = vrot.slane %v616_v45, 4  ;;  %v668_v59 = vrot.slane %v616_v45, 6 }
 0x13c   : > { %v1238_v58 = vunpack.c.l.b16 %v1110_v39  ;;  %v1239_v61 = vunpack.c.l.b16 %v1111_v50  ;;  %v4095_v1 = vrot.slane %v616_v45, 9  ;;  %v1240_v14 = vunpack.c.l.b16 %v1112_v62  ;;  %2295 = vmatpush.bf16.msra.mxu1 %v4786_v25 }
 0x13d   : > { %v1327_v0 = vrot.slane %v1237_v20, 7  ;;  %v4096_v26 = vrot.slane %v666_v54, 9  ;;  %v5418_v2 = vpop.f32.mrf.mxu0  ;;  %v4097_v7 = vrot.slane %v667_v57, 9  ;;  %v4098_v49 = vrot.slane %v668_v59, 9 }
 0x13e   : > { %v1328_v5 = vrot.slane %v1238_v58, 6  ;;  %v1330_v6 = vrot.slane %v1239_v61, 5  ;;  %v963_v8 = vmax.f32 %v616_v45, %v4095_v1  ;;  %v1559_v16 = vrot.slane %v1557_v56, 5 }
 0x13f   : > { %v964_v9 = vmax.f32 %v666_v54, %v4096_v26  ;;  %v965_v11 = vmax.f32 %v667_v57, %v4097_v7  ;;  %v966_v13 = vmax.f32 %v668_v59, %v4098_v49  ;;  %v1563_v24 = vshll.u32 %v1475_v22, 16  ;;  %v1445_v54 = vld [vmem:[#allocation2 + $0x2c] sm:$0x1]  ;;  %v4784_v49 = vld [vmem:[%s6282_s3] sm:$0xff] }
 0x140   : > { %v1329_v10 = vsel %vm1271_vm5, %v1328_v5, %v1327_v0  ;;  %v1027_v44 = vmax.f32 %v963_v8, 0.0  ;;  %v1560_v30 = vor.u32 %v1559_v16, %v1556_v32  ;;  %v1664_v34 = vsel %vm5253_vm14, %v4123_v63, %v1663_v47  ;;  %v4785_v47 = vld [vmem:[%s6282_s3 + $0x8] sm:$0xff]  ;;  %v1442_v5 = vld [vmem:[#allocation2 + $0x28] sm:$0xf] }
 0x141   : > { %v1028_v15 = vmax.f32 %v964_v9, 0.0  ;;  %v1331_v18 = vsel %vm1274_vm6, %v1330_v6, %v1329_v10  ;;  %v1029_v19 = vmax.f32 %v965_v11, 0.0  ;;  %v1030_v21 = vmax.f32 %v966_v13, 0.0  ;;  %1701 = vst.msk [vmem:[#allocation3 + $0x4] sm:$0xf] %vm1055_vm4, %v1664_v34  ;;  %2296 = vmatpush.bf16.msra.mxu1 %v4785_v47  ;;  %v4798_v6 = vld [vmem:[%s6282_s3 + $0x70] sm:$0xff] }
 0x142   : > { %v1113_v27 = vpack.c.bf16 %v1027_v44, %v1027_v44  ;;  %v5432_v33 = vld [vmem:[#allocation2 + $0x40] sm:$0xf]  ;;  %v1565_v37 = vrot.slane %v1563_v24, 5  ;;  %v4127_v38 = vrot.slane %v5388_v17, 9  ;;  %v1561_v42 = vrot.slane %v1560_v30, 4  ;;  %2320 = vmatpush.bf16.msra.mxu2 %v4798_v6  ;;  %v4796_v13 = vld [vmem:[%s6282_s3 + $0x60] sm:$0xff] }
 0x143   : > { %v1114_v28 = vpack.c.bf16 %v1028_v15, %v1028_v15  ;;  %v1115_v35 = vpack.c.bf16 %v1029_v19, %v1029_v19  ;;  %v1116_v36 = vpack.c.bf16 %v1030_v21, %v1030_v21  ;;  %1815 = vst.msk [vmem:[#allocation3 + $0x84] sm:$0xf] %vm1055_vm4, %v5432_v33  ;;  %v1679_v39 = vrot.slane %v1475_v22, 5  ;;  %v4797_v10 = vld [vmem:[%s6282_s3 + $0x68] sm:$0xff] }
 0x144   : > { %v1241_v40 = vunpack.c.l.b16 %v1113_v27  ;;  %v1332_v50 = vrot.slane %v1240_v14, 4  ;;  %v1566_v56 = vsel %vm5234_vm1, %v1561_v42, %v1565_v37  ;;  %v578_v22 = vadd.f32 %v5400_v31, %v5418_v2 }
 0x145   : > { %v1242_v41 = vunpack.c.l.b16 %v1114_v28  ;;  %v579_v45 = vpop.f32.mrf.mxu0  ;;  %v1243_v51 = vunpack.c.l.b16 %v1115_v35  ;;  %v1244_v53 = vunpack.c.l.b16 %v1116_v36  ;;  %v5448_v58 = vsel %vm5253_vm14, %v4127_v38, %v1679_v39  ;;  %1767 = vst.msk [vmem:[#allocation3 + $0x44] sm:$0xf] %vm1055_vm4, %v1566_v56  ;;  %1617 = vrot.lane.b32.xlu1 %v1566_v56, %s5025_s22  ;;  %2297 = vmatpush.bf16.msra.mxu1 %v4784_v49  ;;  %v4135_v49 = vld [vmem:[#allocation3] sm:$0xf] }
 0x146   : > { %v1334_v20 = vrot.slane %v1241_v40, 3  ;;  %v1333_v61 = vsel %vm1277_vm7, %v1332_v50, %v1331_v18  ;;  %1855 = vst.msk [vmem:[#allocation3 + $0x38] sm:$0xf] %vm1055_vm4, %v5448_v58  ;;  %2321 = vmatpush.bf16.msra.mxu2 %v4797_v10  ;;  %v580_v24 = vadd.f32 %v5400_v31, %v579_v45 }
 0x147   : > { %v1336_v17 = vrot.slane %v1242_v41, 2  ;;  %v1338_v57 = vrot.slane %v1243_v51, 1  ;;  %v1388_v59 = vpack.c.b16 %v1244_v53, %v1244_v53  ;;  %1705 = vst.msk [vmem:[#allocation3 + $0x54] sm:$0xf] %vm1055_vm4, %v5448_v58  ;;  %v4794_v51 = vld [vmem:[%s6282_s3 + $0x50] sm:$0xff] }
 0x148   : > { %v1711_v62 = vpop.permute.xlu0 %1710  ;;  %v1335_v0 = vsel %vm1280_vm9, %v1334_v20, %v1333_v61 }
 0x149   : > { %1734 = vst.msk [vmem:[#allocation3 + $0x4] sm:$0xf] %vm1633_vm2, %v1711_v62  ;;  %v1337_v1 = vsel %vm1283_vm10, %v1336_v17, %v1335_v0  ;;  %v1446_v26 = vsel %vm5213_vm13, %v1388_v59, %v1445_v54 }
 0x14a   : > { %v1339_v4 = vsel %vm1286_vm11, %v1338_v57, %v1337_v1  ;;  %1447 = vst [vmem:[#allocation2 + $0x2c] sm:$0x1] %v1446_v26  ;;  %2322 = vmatpush.bf16.msra.mxu2 %v4796_v13 }
 0x14b   : > { %v1387_v7 = vpack.c.b16 %v1339_v4, %v1339_v4 }
 0x14d   : > { %v582_v8 = vpop.f32.mrf.mxu0  ;;  %v1443_v9 = vsel %vm5227_vm15, %v1387_v7, %v1442_v5  ;;  %1724 = vrot.lane.b32.xlu1 %v5432_v33, %s5025_s22 }
 0x14e   : > { %v583_v63 = vadd.f32 %v5400_v31, %v582_v8  ;;  %1444 = vst [vmem:[#allocation2 + $0x28] sm:$0xf] %v1443_v9  ;;  %2323 = vmatpush.bf16.msra.mxu2 %v4795_v60  ;;  %v4793_v9 = vld [vmem:[%s6282_s3 + $0x48] sm:$0xff] }
 0x150   : > { %v617_v11 = vmax.f32 %v578_v22, %v583_v63 }
 0x151   : > { %v5482_v15 = vld [vmem:[#allocation2 + $0x2c] sm:$0x1] }
 0x152   : > { %v669_v32 = vrot.slane %v617_v11, 2  ;;  %v670_v14 = vrot.slane %v617_v11, 4  ;;  %v671_v2 = vrot.slane %v617_v11, 6  ;;  %v4099_v44 = vrot.slane %v617_v11, 9  ;;  %2324 = vmatpush.bf16.msra.mxu2 %v4794_v51 }
 0x153   : > { %v1683_v27 = vrot.slane %v5482_v15, 5  ;;  %v1577_v10 = vshll.u32 %v5482_v15, 16 }
 0x154   : > { %v4100_v16 = vrot.slane %v669_v32, 9  ;;  %v4101_v18 = vrot.slane %v670_v14, 9  ;;  %v4102_v19 = vrot.slane %v671_v2, 9  ;;  %v967_v21 = vmax.f32 %v617_v11, %v4099_v44 }
 0x155   : > { %v584_v25 = vpop.f32.mrf.mxu0  ;;  %v1476_v36 = vld [vmem:[#allocation2 + $0x28] sm:$0xf]  ;;  %v1612_v37 = vpop.permute.xlu1 %1611  ;;  %1777 = vrot.lane.b32.xlu1 %v5260_v23, %s5025_s22 }
 0x156   : > { %v968_v28 = vmax.f32 %v669_v32, %v4100_v16  ;;  %v969_v30 = vmax.f32 %v670_v14, %v4101_v18  ;;  %v970_v34 = vmax.f32 %v671_v2, %v4102_v19  ;;  %v1031_v35 = vmax.f32 %v967_v21, 0.0  ;;  %1718 = vrot.lane.b32.xlu2 %v1476_v36, %s5025_s22  ;;  %1491 = vst.msk [vmem:[#allocation3 + $0x64] sm:$0xf] %vm1055_vm4, %v1476_v36 }
 0x157   : > { %v585_v38 = vadd.f32 %v5400_v31, %v584_v25  ;;  %v1568_v40 = vshrl.u32 %v1476_v36, 16  ;;  %v1571_v41 = vshll.u32 %v1476_v36, 16  ;;  %v4128_v42 = vrot.slane %v1476_v36, 9  ;;  %1635 = vst.msk [vmem:[#allocation3 + $0x14] sm:$0xf] %vm1633_vm2, %v1612_v37  ;;  %2325 = vmatpush.bf16.msra.mxu2 %v4793_v9 }
 0x158   : > { %v1032_v45 = vmax.f32 %v968_v28, 0.0  ;;  %v1033_v46 = vmax.f32 %v969_v30, 0.0  ;;  %v1034_v47 = vmax.f32 %v970_v34, 0.0  ;;  %v1117_v39 = vpack.c.bf16 %v1031_v35, %v1031_v35  ;;  %1812 = vst.msk [vmem:[#allocation3 + $0x48] sm:$0xf] %vm1055_vm4, %v1476_v36  ;;  %v4792_v30 = vld [vmem:[%s6282_s3 + $0x40] sm:$0xff] }
 0x159   : > { %v618_v50 = vmax.f32 %v580_v24, %v585_v38  ;;  %v5501_v53 = vsel %vm5253_vm14, %v4128_v42, %v1683_v27  ;;  %v1570_v56 = vrot.slane %v1568_v40, 4  ;;  %v1573_v26 = vrot.slane %v1571_v41, 5 }
 0x15a   : > { %v1118_v20 = vpack.c.bf16 %v1032_v45, %v1032_v45  ;;  %v1119_v17 = vpack.c.bf16 %v1033_v46, %v1033_v46  ;;  %v1245_v54 = vunpack.c.l.b16 %v1117_v39  ;;  %1856 = vst.msk [vmem:[#allocation3 + $0x4c] sm:$0xf] %vm1055_vm4, %v5501_v53  ;;  %v1120_v62 = vpack.c.bf16 %v1034_v47, %v1034_v47  ;;  %v1451_v39 = vld [vmem:[#allocation2 + $0x34] sm:$0x1] }
 0x15b   : > { %v672_v23 = vrot.slane %v618_v50, 2  ;;  %v673_v61 = vrot.slane %v618_v50, 4  ;;  %v674_v57 = vrot.slane %v618_v50, 6  ;;  %v4103_v59 = vrot.slane %v618_v50, 9  ;;  %1706 = vst.msk [vmem:[#allocation3 + $0x68] sm:$0xf] %vm1055_vm4, %v5501_v53  ;;  %2326 = vmatpush.bf16.msra.mxu2 %v4792_v30 }
 0x15c   : > { %v1246_v0 = vunpack.c.l.b16 %v1118_v20  ;;  %v1247_v1 = vunpack.c.l.b16 %v1119_v17  ;;  %v1340_v22 = vrot.slane %v1245_v54, 7  ;;  %v1248_v44 = vunpack.c.l.b16 %v1120_v62 }
 0x15d   : > { %v4104_v4 = vrot.slane %v672_v23, 9  ;;  %v4105_v5 = vrot.slane %v673_v61, 9  ;;  %v4106_v6 = vrot.slane %v674_v57, 9  ;;  %v971_v7 = vmax.f32 %v618_v50, %v4103_v59  ;;  %v587_v8 = vpop.f32.mrf.mxu0  ;;  %1783 = vrot.lane.b32.xlu1 %v5448_v58, %s5025_s22  ;;  %v1448_v59 = vld [vmem:[#allocation2 + $0x30] sm:$0xf] }
 0x15e   : > { %v1341_v63 = vrot.slane %v1246_v0, 6  ;;  %v4766_v2 = vld [vmem:[#allocation3 + $0x10] sm:$0xf0]  ;;  %v1343_v16 = vrot.slane %v1247_v1, 5  ;;  %v1574_v19 = vor.u32 %v1573_v26, %v1570_v56  ;;  %v1579_v28 = vrot.slane %v1577_v10, 5 }
 0x15f   : > { %v972_v11 = vmax.f32 %v672_v23, %v4104_v4  ;;  %v973_v13 = vmax.f32 %v673_v61, %v4105_v5  ;;  %v974_v32 = vmax.f32 %v674_v57, %v4106_v6  ;;  %v1035_v14 = vmax.f32 %v971_v7, 0.0  ;;  %v4764_v7 = vld [vmem:[#allocation3 + $0x4] sm:$0xf] }
 0x160   : > { %v4136_v18 = vor.u32 %v4766_v2, %v4135_v49  ;;  %v1342_v21 = vsel %vm1271_vm5, %v1341_v63, %v1340_v22  ;;  %v1575_v15 = vrot.slane %v1574_v19, 4  ;;  %v1345_v40 = vrot.slane %v1248_v44, 4 }
 0x161   : > { %v1036_v24 = vmax.f32 %v972_v11, 0.0  ;;  %v1037_v25 = vmax.f32 %v973_v13, 0.0  ;;  %v1038_v60 = vmax.f32 %v974_v32, 0.0  ;;  %v1121_v27 = vpack.c.bf16 %v1035_v14, %v1035_v14 }
 0x162   : > { %2298 = vmatmul.bf16.vlgmr.msra.gmra.mxu1 %v4136_v18  ;;  %v1344_v58 = vsel %vm1274_vm6, %v1343_v16, %v1342_v21  ;;  %v1580_v38 = vsel %vm5234_vm1, %v1575_v15, %v1579_v28  ;;  %v588_v26 = vadd.f32 %v5400_v31, %v587_v8  ;;  %v1743_v8 = vshrl.u32 %v5432_v33, 16 }
 0x163   : > { %v1122_v34 = vpack.c.bf16 %v1036_v24, %v1036_v24  ;;  %v1123_v35 = vpack.c.bf16 %v1037_v25, %v1037_v25  ;;  %v1124_v36 = vpack.c.bf16 %v1038_v60, %v1038_v60  ;;  %v1249_v37 = vunpack.c.l.b16 %v1121_v27  ;;  %1768 = vst.msk [vmem:[#allocation3 + $0x58] sm:$0xf] %vm1055_vm4, %v1580_v38  ;;  %1619 = vrot.lane.b32.xlu2 %v1580_v38, %s5025_s22 }
 0x164   : > { %v1346_v50 = vsel %vm1277_vm7, %v1345_v40, %v1344_v58  ;;  %v1746_v14 = vshll.u32 %v5432_v33, 16  ;;  %v5544_v60 = vrot.slane %v1743_v8, 4  ;;  %v5558_v40 = vld [vmem:[#allocation2 + $0x44] sm:$0x1] }
 0x165   : > { %v1250_v41 = vunpack.c.l.b16 %v1122_v34  ;;  %v1251_v42 = vunpack.c.l.b16 %v1123_v35  ;;  %v1252_v45 = vunpack.c.l.b16 %v1124_v36  ;;  %v589_v46 = vpop.f32.mrf.mxu0  ;;  %v1347_v47 = vrot.slane %v1249_v37, 3 }
 0x166   : > { %v5546_v27 = vrot.slane %v1746_v14, 5  ;;  %v590_v35 = vadd.f32 %v5400_v31, %v589_v46 }
 0x167   : > { %v1349_v51 = vrot.slane %v1250_v41, 2  ;;  %v1351_v20 = vrot.slane %v1251_v42, 1  ;;  %v1390_v17 = vpack.c.b16 %v1252_v45, %v1252_v45  ;;  %v1348_v54 = vsel %vm1280_vm9, %v1347_v47, %v1346_v50 }
 0x168   : > { %v1713_v56 = vpop.permute.xlu0 %1712  ;;  %v4131_v50 = vrot.slane %v5432_v33, 9 }
 0x169   : > { %v1350_v23 = vsel %vm1283_vm10, %v1349_v51, %v1348_v54  ;;  %v1452_v61 = vsel %vm5213_vm13, %v1390_v17, %v1451_v39  ;;  %1735 = vst.msk [vmem:[#allocation3 + $0x18] sm:$0xf] %vm1633_vm2, %v1713_v56  ;;  %v5563_v56 = vld [vmem:[#allocation2 + $0x48] sm:$0xf] }
 0x16a   : > { %v1352_v57 = vsel %vm1286_vm11, %v1351_v20, %v1350_v23  ;;  %1453 = vst [vmem:[#allocation2 + $0x34] sm:$0x1] %v1452_v61  ;;  %v1818_v12 = vshrl.u32 %v5563_v56, 16 }
 0x16b   : > { %v1389_v62 = vpack.c.b16 %v1352_v57, %v1352_v57  ;;  %1816 = vst.msk [vmem:[#allocation3 + $0x98] sm:$0xf] %vm1055_vm4, %v5563_v56 }
 0x16d   : > { %v1449_v0 = vsel %vm5227_vm15, %v1389_v62, %v1448_v59  ;;  %v592_v1 = vpop.f32.mrf.mxu0 }
 0x16e   : > { %1450 = vst [vmem:[#allocation2 + $0x30] sm:$0xf] %v1449_v0  ;;  %v593_v4 = vadd.f32 %v5400_v31, %v592_v1 }
 0x170   : > { %v619_v5 = vmax.f32 %v588_v26, %v593_v4  ;;  %v1715_v6 = vpop.permute.xlu2 %1714  ;;  %v4137_v49 = vld [vmem:[#allocation3 + $0x14] sm:$0xf0]  ;;  %v1775_v26 = vrot.slane %v5558_v40, 5 }
 0x171   : > { %1736 = vst.msk [vmem:[#allocation3 + $0x2c] sm:$0xf] %vm1633_vm2, %v1715_v6  ;;  %v4140_v9 = vor.u32 %v4764_v7, %v4137_v49  ;;  %v5534_v22 = vld [vmem:[#allocation2 + $0x34] sm:$0x1] }
 0x172   : > { %v675_v63 = vrot.slane %v619_v5, 2  ;;  %v676_v10 = vrot.slane %v619_v5, 4  ;;  %v677_v11 = vrot.slane %v619_v5, 6  ;;  %v4107_v13 = vrot.slane %v619_v5, 9 }
 0x173   : > { %2327 = vmatmul.bf16.vlgmr.msra.gmra.mxu2 %v4140_v9  ;;  %v1591_v32 = vshll.u32 %v5534_v22, 16  ;;  %v1687_v25 = vrot.slane %v5534_v22, 5  ;;  %v1749_v22 = vor.u32 %v5546_v27, %v5544_v60 }
 0x174   : > { %v4108_v2 = vrot.slane %v675_v63, 9  ;;  %v4109_v44 = vrot.slane %v676_v10, 9  ;;  %v4110_v16 = vrot.slane %v677_v11, 9  ;;  %v975_v18 = vmax.f32 %v619_v5, %v4107_v13 }
 0x175   : > { %v594_v19 = vpop.f32.mrf.mxu0  ;;  %v5539_v21 = vld [vmem:[#allocation2 + $0x30] sm:$0xf]  ;;  %v5541_v24 = vrot.slane %v1591_v32, 5  ;;  %v1614_v36 = vpop.permute.xlu0 %1613 }
 0x176   : > { %v976_v15 = vmax.f32 %v675_v63, %v4108_v2  ;;  %v977_v28 = vmax.f32 %v676_v10, %v4109_v44  ;;  %v978_v30 = vmax.f32 %v677_v11, %v4110_v16  ;;  %v1039_v34 = vmax.f32 %v975_v18, 0.0  ;;  %1720 = vrot.lane.b32.xlu0 %v5539_v21, %s5025_s22  ;;  %1492 = vst.msk [vmem:[#allocation3 + $0x78] sm:$0xf] %vm1055_vm4, %v5539_v21  ;;  %v5574_v16 = vld [vmem:[#allocation2 + $0x4c] sm:$0x1] }
 0x177   : > { %v595_v58 = vadd.f32 %v5400_v31, %v594_v19  ;;  %1813 = vst.msk [vmem:[#allocation3 + $0x5c] sm:$0xf] %vm1055_vm4, %v5539_v21  ;;  %v1582_v37 = vshrl.u32 %v5539_v21, 16  ;;  %v1585_v38 = vshll.u32 %v5539_v21, 16  ;;  %v5571_v2 = vsel %vm5253_vm14, %v4131_v50, %v1775_v26 }
 0x178   : > { %v1040_v41 = vmax.f32 %v976_v15, 0.0  ;;  %v1041_v42 = vmax.f32 %v977_v28, 0.0  ;;  %v1042_v45 = vmax.f32 %v978_v30, 0.0  ;;  %v1125_v47 = vpack.c.bf16 %v1039_v34, %v1039_v34  ;;  %1636 = vst.msk [vmem:[#allocation3 + $0x28] sm:$0xf] %vm1633_vm2, %v1614_v36 }
 0x179   : > { %1837 = vst.msk [vmem:[#allocation3 + $0xc] sm:$0xf] %vm1633_vm2, %v1614_v36  ;;  %v620_v46 = vmax.f32 %v590_v35, %v595_v58  ;;  %v1584_v39 = vrot.slane %v1582_v37, 4  ;;  %v1587_v31 = vrot.slane %v1585_v38, 5  ;;  %v4129_v44 = vrot.slane %v5539_v21, 9 }
 0x17a   : > { %v1126_v51 = vpack.c.bf16 %v1040_v41, %v1040_v41  ;;  %v1127_v20 = vpack.c.bf16 %v1041_v42, %v1041_v42  ;;  %v1128_v17 = vpack.c.bf16 %v1042_v45, %v1042_v45  ;;  %v1253_v54 = vunpack.c.l.b16 %v1125_v47  ;;  %1859 = vst.msk [vmem:[#allocation3 + $0x88] sm:$0xf] %vm1055_vm4, %v5571_v2 }
 0x17b   : > { %v678_v23 = vrot.slane %v620_v46, 2  ;;  %v679_v61 = vrot.slane %v620_v46, 4  ;;  %v680_v57 = vrot.slane %v620_v46, 6  ;;  %v4111_v59 = vrot.slane %v620_v46, 9 }
 0x17c   : > { %v1254_v62 = vunpack.c.l.b16 %v1126_v51  ;;  %v1255_v0 = vunpack.c.l.b16 %v1127_v20  ;;  %v1256_v1 = vunpack.c.l.b16 %v1128_v17  ;;  %v1353_v7 = vrot.slane %v1253_v54, 7 }
 0x17d   : > { %v4112_v4 = vrot.slane %v678_v23, 9  ;;  %v4113_v33 = vrot.slane %v679_v61, 9  ;;  %v4114_v5 = vrot.slane %v680_v57, 9  ;;  %v979_v6 = vmax.f32 %v620_v46, %v4111_v59  ;;  %v1454_v59 = vld [vmem:[#allocation2 + $0x38] sm:$0xf] }
 0x17e   : > { %v1354_v49 = vrot.slane %v1254_v62, 6  ;;  %v1356_v9 = vrot.slane %v1255_v0, 5  ;;  %v1588_v63 = vor.u32 %v1587_v31, %v1584_v39  ;;  %v1358_v18 = vrot.slane %v1256_v1, 4 }
 0x17f   : > { %v980_v10 = vmax.f32 %v678_v23, %v4112_v4  ;;  %v981_v11 = vmax.f32 %v679_v61, %v4113_v33  ;;  %v982_v13 = vmax.f32 %v680_v57, %v4114_v5  ;;  %v1043_v32 = vmax.f32 %v979_v6, 0.0 }
 0x180   : > { %v1355_v8 = vsel %vm1271_vm5, %v1354_v49, %v1353_v7  ;;  %v1589_v14 = vrot.slane %v1588_v63, 4  ;;  %v5586_v21 = vsel %vm5253_vm14, %v4129_v44, %v1687_v25  ;;  %v1752_v38 = vshll.u32 %v5558_v40, 16  ;;  %v1457_v40 = vld [vmem:[#allocation2 + $0x3c] sm:$0x1] }
 0x181   : > { %v1044_v19 = vmax.f32 %v980_v10, 0.0  ;;  %v1045_v15 = vmax.f32 %v981_v11, 0.0  ;;  %v1046_v28 = vmax.f32 %v982_v13, 0.0  ;;  %v1357_v30 = vsel %vm1274_vm6, %v1356_v9, %v1355_v8  ;;  %1857 = vst.msk [vmem:[#allocation3 + $0x60] sm:$0xf] %vm1055_vm4, %v5586_v21 }
 0x182   : > { %v1129_v34 = vpack.c.bf16 %v1043_v32, %v1043_v32  ;;  %v1594_v35 = vsel %vm5234_vm1, %v1589_v14, %v5541_v24  ;;  %v4132_v24 = vrot.slane %v5563_v56, 9  ;;  %v1849_v25 = vrot.slane %v5574_v16, 5  ;;  %1707 = vst.msk [vmem:[#allocation3 + $0x7c] sm:$0xf] %vm1055_vm4, %v5586_v21  ;;  %v4769_v7 = vld [vmem:[#allocation3 + $0x2c] sm:$0xf] }
 0x183   : > { %v1130_v36 = vpack.c.bf16 %v1044_v19, %v1044_v19  ;;  %v1131_v58 = vpack.c.bf16 %v1045_v15, %v1045_v15  ;;  %v1132_v37 = vpack.c.bf16 %v1046_v28, %v1046_v28  ;;  %1769 = vst.msk [vmem:[#allocation3 + $0x6c] sm:$0xf] %vm1055_vm4, %v1594_v35  ;;  %1621 = vrot.lane.b32.xlu2 %v1594_v35, %s5025_s22  ;;  %v1754_v46 = vrot.slane %v1752_v38, 5  ;;  %v4803_v38 = vld [vmem:[%s6282_s3 + $0x98] sm:$0xff] }
 0x184   : > { %v1257_v41 = vunpack.c.l.b16 %v1129_v34  ;;  %v1750_v31 = vrot.slane %v1749_v22, 4  ;;  %v1850_v50 = vsel %vm5253_vm14, %v4132_v24, %v1849_v25  ;;  %v1359_v51 = vsel %vm1277_vm7, %v1358_v18, %v1357_v30  ;;  %v4802_v22 = vld [vmem:[%s6282_s3 + $0x90] sm:$0xff] }
 0x185   : > { %v1258_v42 = vunpack.c.l.b16 %v1130_v36  ;;  %v1259_v45 = vunpack.c.l.b16 %v1131_v58  ;;  %v1260_v47 = vunpack.c.l.b16 %v1132_v37  ;;  %1860 = vst.msk [vmem:[#allocation3 + $0x9c] sm:$0xf] %vm1055_vm4, %v1850_v50  ;;  %v1821_v32 = vshll.u32 %v5563_v56, 16  ;;  %v4806_v36 = vld [vmem:[%s6282_s3 + $0xb0] sm:$0xff]  ;;  %v4804_v58 = vld [vmem:[%s6282_s3 + $0xa0] sm:$0xff] }
 0x186   : > { %v1360_v39 = vrot.slane %v1257_v41, 3  ;;  %v5606_v54 = vsel %vm5234_vm1, %v1750_v31, %v1754_v46  ;;  %v1827_v8 = vshll.u32 %v5574_v16, 16  ;;  %v1820_v44 = vrot.slane %v1818_v12, 4  ;;  %v4155_v16 = vld [vmem:[#allocation3 + $0x28] sm:$0xf]  ;;  %2349 = vmatpush.bf16.msrb.mxu3 %v4806_v36  ;;  %v4814_v50 = vld [vmem:[%s6282_s3 + $0xf0] sm:$0xff] }
 0x187   : > { %v1362_v60 = vrot.slane %v1258_v42, 2  ;;  %v1364_v27 = vrot.slane %v1259_v45, 1  ;;  %v1392_v20 = vpack.c.b16 %v1260_v47, %v1260_v47  ;;  %1771 = vst.msk [vmem:[#allocation3 + $0x94] sm:$0xf] %vm1055_vm4, %v5606_v54  ;;  %v1823_v18 = vrot.slane %v1821_v32, 5  ;;  %v4819_v45 = vld [vmem:[%s6282_s3 + $0x118] sm:$0xff] }
 0x188   : > { %v1361_v17 = vsel %vm1280_vm9, %v1360_v39, %v1359_v51  ;;  %v1829_v15 = vrot.slane %v1827_v8, 5  ;;  %v4801_v47 = vld [vmem:[%s6282_s3 + $0x88] sm:$0xff]  ;;  %2410 = vmatpush.bf16.msrb.mxu2 %v4819_v45  ;;  %v4800_v39 = vld [vmem:[%s6282_s3 + $0x80] sm:$0xff]  ;;  %v4818_v51 = vld [vmem:[%s6282_s3 + $0x110] sm:$0xff]  ;;  %vm2683_vm9 = vcmask 1041408  }
 0x189   : > { %v1363_v23 = vsel %vm1283_vm10, %v1362_v60, %v1361_v17  ;;  %v1458_v61 = vsel %vm5213_vm13, %v1392_v20, %v1457_v40  ;;  %v4815_v40 = vld [vmem:[%s6282_s3 + $0xf8] sm:$0xff]  ;;  %v4813_v60 = vld [vmem:[%s6282_s3 + $0xe8] sm:$0xff]  ;;  %v4812_v20 = vld [vmem:[%s6282_s3 + $0xe0] sm:$0xff]  ;;  %vm2638_vm13 = vsmask.f32 2306 }
 0x18a   : > { %v1365_v57 = vsel %vm1286_vm11, %v1364_v27, %v1363_v23  ;;  %1459 = vst [vmem:[#allocation2 + $0x3c] sm:$0x1] %v1458_v61  ;;  %2377 = vmatpush.bf16.msrb.mxu1 %v4815_v40  ;;  %v4817_v17 = vld [vmem:[%s6282_s3 + $0x108] sm:$0xff]  ;;  %v4811_v61 = vld [vmem:[%s6282_s3 + $0xd8] sm:$0xff]  ;;  %vm2686_vm11 = vcmask 1043458  }
 0x18b   : > { %v1391_v62 = vpack.c.b16 %v1365_v57, %v1365_v57  ;;  %1779 = vrot.lane.b32.xlu2 %v5297_v3, %s5025_s22 }
 0x18c   : > { %2411 = vmatpush.bf16.msrb.mxu2 %v4818_v51 }
 0x18d   : > { %v1455_v0 = vsel %vm5227_vm15, %v1391_v62, %v1454_v59  ;;  %vm5787_vm15 = vmand %vm1658_vm3, %vm2638_vm13  ;;  %vm2785_vm13 = vcmask 1040384  }
 0x18e   : > { %1456 = vst [vmem:[#allocation2 + $0x38] sm:$0xf] %v1455_v0  ;;  %2378 = vmatpush.bf16.msrb.mxu1 %v4814_v50 }
 0x190   : > { %v1717_v1 = vpop.permute.xlu2 %1716  ;;  %2412 = vmatpush.bf16.msrb.mxu2 %v4817_v17 }
 0x191   : > { %1737 = vst.msk [vmem:[#allocation3 + $0x40] sm:$0xf] %vm1633_vm2, %v1717_v1  ;;  %v1481_v29 = vld [vmem:[#allocation2 + $0x3c] sm:$0x1] }
 0x192   : > { %v1691_v33 = vrot.slane %v1481_v29, 5  ;;  %v1605_v43 = vshll.u32 %v1481_v29, 16  ;;  %2379 = vmatpush.bf16.msrb.mxu1 %v4813_v60 }
 0x193   : > { %1785 = vrot.lane.b32.xlu2 %v5501_v53, %s5025_s22 }
 0x194   : > { %v1607_v11 = vrot.slane %v1605_v43, 5 }
 0x195   : > { %v1480_v26 = vld [vmem:[#allocation2 + $0x38] sm:$0xf] }
 0x196   : > { %1722 = vrot.lane.b32.xlu0 %v1480_v26, %s5025_s22  ;;  %1493 = vst.msk [vmem:[#allocation3 + $0x8c] sm:$0xf] %vm1055_vm4, %v1480_v26  ;;  %v4130_v4 = vrot.slane %v1480_v26, 9  ;;  %v1596_v5 = vshrl.u32 %v1480_v26, 16  ;;  %v1599_v3 = vshll.u32 %v1480_v26, 16  ;;  %2380 = vmatpush.bf16.msrb.mxu1 %v4812_v20 }
 0x197   : > { %1814 = vst.msk [vmem:[#allocation3 + $0x70] sm:$0xf] %vm1055_vm4, %v1480_v26  ;;  %v5713_v26 = vld [vmem:[%s6283_s4] ss:$0 sm:$0xff] }
 0x198   : > { %v1692_v6 = vsel %vm5253_vm14, %v4130_v4, %v1691_v33  ;;  %v4157_v49 = vld [vmem:[#allocation3 + $0x3c] sm:$0xf0]  ;;  %v1598_v9 = vrot.slane %v1596_v5, 4  ;;  %v1601_v53 = vrot.slane %v1599_v3, 5  ;;  %v4810_v5 = vld [vmem:[%s6282_s3 + $0xd0] sm:$0xff]  ;;  %v4816_v3 = vld [vmem:[%s6282_s3 + $0x100] sm:$0xff] }
 0x199   : > { %1858 = vst.msk [vmem:[#allocation3 + $0x74] sm:$0xf] %vm1055_vm4, %v1692_v6  ;;  %1789 = vrot.lane.b32.xlu1 %v1692_v6, %s5025_s22  ;;  %v4160_v63 = vor.u32 %v4769_v7, %v4157_v49  ;;  %2413 = vmatpush.bf16.msrb.mxu2 %v4816_v3  ;;  %vm2710_vm14 = vsmask.f32 7448 }
 0x19a   : > { %1708 = vst.msk [vmem:[#allocation3 + $0x90] sm:$0xf] %vm1055_vm4, %v1692_v6  ;;  %v1602_v10 = vor.u32 %v1601_v53, %v1598_v9  ;;  %2381 = vmatpush.bf16.msrb.mxu1 %v4811_v61  ;;  %v4809_v53 = vld [vmem:[%s6282_s3 + $0xc8] sm:$0xff] }
 0x19b   : > { %1791 = vrot.lane.b32.xlu2 %v5571_v2, %s5025_s22  ;;  %2332 = vmatmul.bf16.gmra.mxu2 %v4160_v63  ;;  %v1824_v2 = vor.u32 %v1823_v18, %v1820_v44 }
 0x19c   : > { %v1603_v13 = vrot.slane %v1602_v10, 4  ;;  %v1616_v19 = vpop.permute.xlu1 %1615 }
 0x19d   : > { %1637 = vst.msk [vmem:[#allocation3 + $0x3c] sm:$0xf] %vm1633_vm2, %v1616_v19  ;;  %v1825_v28 = vrot.slane %v1824_v2, 4 }
 0x19e   : > { %v1608_v14 = vsel %vm5234_vm1, %v1603_v13, %v1607_v11  ;;  %1838 = vst.msk [vmem:[#allocation3 + $0x20] sm:$0xf] %vm1633_vm2, %v1616_v19  ;;  %2382 = vmatpush.bf16.msrb.mxu1 %v4810_v5  ;;  %v4808_v13 = vld [vmem:[%s6282_s3 + $0xc0] sm:$0xff] }
 0x19f   : > { %1770 = vst.msk [vmem:[#allocation3 + $0x80] sm:$0xf] %vm1055_vm4, %v1608_v14  ;;  %1623 = vrot.lane.b32.xlu0 %v1608_v14, %s5025_s22  ;;  %v1830_v56 = vsel %vm5234_vm1, %v1825_v28, %v1829_v15  ;;  %v4768_v15 = vld [vmem:[#allocation3 + $0x20] sm:$0xf0]  ;;  %vm2277_vm4 = vcmask 523264  }
 0x1a0   : > { %v4778_v20 = vld [vmem:[#allocation3 + $0x70] sm:$0xf0]  ;;  %vm2706_vm1 = vsmask.f32 3336 }
 0x1a1   : > { %1833 = vrot.lane.b32.xlu1 %v1830_v56, %s5025_s22  ;;  %v4151_v56 = vld [vmem:[#allocation3 + $0x10] sm:$0xf]  ;;  %vm2707_vm3 = vmor %vm2705_vm0, %vm2706_vm1 }
 0x1a2   : > { %2383 = vmatpush.bf16.msrb.mxu1 %v4809_v53  ;;  %vm2787_vm0 = vmor %vm2785_vm13, %vm1271_vm5 }
 0x1a3   : > { %vm2789_vm1 = vmor %vm2787_vm0, %vm1277_vm7 }
 0x1a4   : > { %v4771_v30 = vld [vmem:[#allocation3 + $0x38] sm:$0xf0] }
 0x1a5   : > { %v4156_v34 = vor.u32 %v4771_v30, %v4155_v16  ;;  %v4152_v30 = vor.u32 %v4768_v15, %v4151_v56 }
 0x1a6   : > { %2384 = vmatpush.bf16.msrb.mxu1 %v4808_v13 }
 0x1a7   : > { %1781 = vrot.lane.b32.xlu0 %v5376_v55, %s5025_s22  ;;  %2303 = vmatmul.bf16.gmra.mxu1 %v4156_v34  ;;  %v4805_v55 = vld [vmem:[%s6282_s3 + $0xa8] sm:$0xff] }
 0x1a8   : > { %2350 = vmatpush.bf16.msrb.mxu3 %v4805_v55 }
 0x1ac   : > { %2351 = vmatpush.bf16.msrb.mxu3 %v4804_v58 }
 0x1af   : > { %1787 = vrot.lane.b32.xlu0 %v5586_v21, %s5025_s22 }
 0x1b0   : > { %v1719_v35 = vpop.permute.xlu2 %1718  ;;  %2352 = vmatpush.bf16.msrb.mxu3 %v4803_v38  ;;  %v4765_v38 = vld [vmem:[#allocation3 + $0xc] sm:$0xf] }
 0x1b1   : > { %1738 = vst.msk [vmem:[#allocation3 + $0x54] sm:$0xf] %vm1633_vm2, %v1719_v35 }
 0x1b4   : > { %2353 = vmatpush.bf16.msrb.mxu3 %v4802_v22 }
 0x1b7   : > { %1831 = vrot.lane.b32.xlu0 %v5606_v54, %s5025_s22  ;;  %v1618_v21 = vpop.permute.xlu1 %1617 }
 0x1b8   : > { %1638 = vst.msk [vmem:[#allocation3 + $0x50] sm:$0xf] %vm1633_vm2, %v1618_v21  ;;  %2354 = vmatpush.bf16.msrb.mxu3 %v4801_v47  ;;  %v4774_v1 = vld [vmem:[#allocation3 + $0x54] sm:$0xf] }
 0x1b9   : > { %1839 = vst.msk [vmem:[#allocation3 + $0x34] sm:$0xf] %vm1633_vm2, %v1618_v21  ;;  %v4145_v21 = vld [vmem:[#allocation3 + $0x1c] sm:$0xf0] }
 0x1ba   : > { %v4148_v22 = vor.u32 %v4765_v38, %v4145_v21 }
 0x1bc   : > { %2355 = vmatpush.bf16.msrb.mxu3 %v4800_v39 }
 0x1bd   : > { %v1620_v37 = vpop.permute.xlu2 %1619 }
 0x1be   : > { %1639 = vst.msk [vmem:[#allocation3 + $0x64] sm:$0xf] %vm1633_vm2, %v1620_v37 }
 0x1bf   : > { %1840 = vst.msk [vmem:[#allocation3 + $0x48] sm:$0xf] %vm1633_vm2, %v1620_v37  ;;  %v1725_v41 = vpop.permute.xlu1 %1724  ;;  %v4175_v24 = vld [vmem:[#allocation3 + $0x50] sm:$0xf] }
 0x1c0   : > { %1741 = vst.msk [vmem:[#allocation3 + $0x90] sm:$0xf] %vm1633_vm2, %v1725_v41  ;;  %v4770_v60 = vld [vmem:[#allocation3 + $0x34] sm:$0xf] }
 0x1c5   : > { %v4776_v25 = vld [vmem:[#allocation3 + $0x60] sm:$0xf0] }
 0x1c6   : > { %v4176_v42 = vor.u32 %v4776_v25, %v4175_v24  ;;  %v4773_v24 = vld [vmem:[#allocation3 + $0x48] sm:$0xf0]  ;;  %v4165_v51 = vld [vmem:[#allocation3 + $0x44] sm:$0xf0] }
 0x1c7   : > { %v1778_v46 = vpop.permute.xlu1 %1777  ;;  %v4197_v11 = vld [vmem:[#allocation3 + $0x8c] sm:$0xf0] }
 0x1c8   : > { %2308 = vmatmul.bf16.gmra.mxu1 %v4176_v42  ;;  %1801 = vst.msk [vmem:[#allocation3 + $0x8] sm:$0xf] %vm1633_vm2, %v1778_v46  ;;  %v4171_v46 = vld [vmem:[#allocation3 + $0x38] sm:$0xf] }
 0x1c9   : > { %v4172_v39 = vor.u32 %v4773_v24, %v4171_v46 }
 0x1cf   : > { %v1784_v31 = vpop.permute.xlu1 %1783  ;;  %v4143_v59 = vld [vmem:[#allocation3 + $0x8] sm:$0xf] }
 0x1d0   : > { %1804 = vst.msk [vmem:[#allocation3 + $0x44] sm:$0xf] %vm1633_vm2, %v1784_v31 }
 0x1d7   : > { %v4772_v35 = vld [vmem:[#allocation3 + $0x40] sm:$0xf0] }
 0x1dd   : > { %v1622_v27 = vpop.permute.xlu2 %1621 }
 0x1de   : > { %1640 = vst.msk [vmem:[#allocation3 + $0x78] sm:$0xf] %vm1633_vm2, %v1622_v27 }
 0x1df   : > { %1841 = vst.msk [vmem:[#allocation3 + $0x5c] sm:$0xf] %vm1633_vm2, %v1622_v27  ;;  %v2299_v33 = vpop.f32.mrf.mxu1  ;;  %v4168_v27 = vor.u32 %v4770_v60, %v4165_v51 }
 0x1e0   : > { %v2300_v43 = vadd.f32 %v5713_v26, %v2299_v33 }
 0x1e5   : > { %v1780_v54 = vpop.permute.xlu2 %1779  ;;  %v4195_v44 = vld [vmem:[#allocation3 + $0x78] sm:$0xf] }
 0x1e6   : > { %1802 = vst.msk [vmem:[#allocation3 + $0x1c] sm:$0xf] %vm1633_vm2, %v1780_v54  ;;  %v4191_v54 = vld [vmem:[#allocation3 + $0x60] sm:$0xf] }
 0x1e7   : > { %v5739_v28 = vpop.f32.mrf.mxu1 }
 0x1e8   : > { %v1721_v23 = vpop.permute.xlu0 %1720 }
 0x1e9   : > { %1739 = vst.msk [vmem:[#allocation3 + $0x68] sm:$0xf] %vm1633_vm2, %v1721_v23  ;;  %v4192_v23 = vor.u32 %v4778_v20, %v4191_v54 }
 0x1ed   : > { %v1786_v57 = vpop.permute.xlu2 %1785  ;;  %v4767_v62 = vld [vmem:[#allocation3 + $0x18] sm:$0xf0] }
 0x1ee   : > { %1805 = vst.msk [vmem:[#allocation3 + $0x58] sm:$0xf] %vm1633_vm2, %v1786_v57  ;;  %v4144_v0 = vor.u32 %v4767_v62, %v4143_v59  ;;  %v4775_v62 = vld [vmem:[#allocation3 + $0x5c] sm:$0xf] }
 0x1f0   : > { %2356 = vmatmul.bf16.vlgmr.msrb.gmra.mxu3 %v4144_v0  ;;  %v4177_v29 = vld [vmem:[#allocation3 + $0x64] sm:$0xf0] }
 0x1f1   : > { %v4180_v4 = vor.u32 %v4774_v1, %v4177_v29  ;;  %v4211_v1 = vld [vmem:[#allocation3 + $0x88] sm:$0xf]  ;;  %v4783_v29 = vld [vmem:[#allocation3 + $0x98] sm:$0xf0] }
 0x1f3   : > { %2337 = vmatmul.bf16.gmra.mxu2 %v4180_v4  ;;  %v4212_v4 = vor.u32 %v4783_v29, %v4211_v1 }
 0x1f5   : > { %v1792_v6 = vpop.permute.xlu2 %1791  ;;  %v4183_v40 = vld [vmem:[#allocation3 + $0x58] sm:$0xf] }
 0x1f6   : > { %1808 = vst.msk [vmem:[#allocation3 + $0x94] sm:$0xf] %vm1633_vm2, %v1792_v6  ;;  %v2328_v7 = vpop.f32.mrf.mxu2 }
 0x1f7   : > { %v5723_v49 = vadd.f32 %v2328_v7, %v2300_v43 }
 0x1fd   : > { %v4782_v61 = vld [vmem:[#allocation3 + $0x90] sm:$0xf0] }
 0x1fe   : > { %v5737_v2 = vpop.f32.mrf.mxu2 }
 0x208   : > { %v1723_v9 = vpop.permute.xlu0 %1722 }
 0x209   : > { %1740 = vst.msk [vmem:[#allocation3 + $0x7c] sm:$0xf] %vm1633_vm2, %v1723_v9 }
 0x20b   : > { %v1790_v63 = vpop.permute.xlu1 %1789 }
 0x20c   : > { %1807 = vst.msk [vmem:[#allocation3 + $0x80] sm:$0xf] %vm1633_vm2, %v1790_v63 }
 0x210   : > { %v4779_v10 = vld [vmem:[#allocation3 + $0x7c] sm:$0xf] }
 0x211   : > { %v1624_v12 = vpop.permute.xlu0 %1623  ;;  %v4200_v32 = vor.u32 %v4779_v10, %v4197_v11 }
 0x212   : > { %1641 = vst.msk [vmem:[#allocation3 + $0x8c] sm:$0xf] %vm1633_vm2, %v1624_v12 }
 0x213   : > { %1842 = vst.msk [vmem:[#allocation3 + $0x70] sm:$0xf] %vm1633_vm2, %v1624_v12  ;;  %2342 = vmatmul.bf16.gmra.mxu2 %v4200_v32  ;;  %v1834_v8 = vpop.permute.xlu1 %1833  ;;  %v4203_v17 = vld [vmem:[#allocation3 + $0x80] sm:$0xf] }
 0x214   : > { %1844 = vst.msk [vmem:[#allocation3 + $0x98] sm:$0xf] %vm1633_vm2, %v1834_v8  ;;  %v4204_v57 = vor.u32 %v4782_v61, %v4203_v17 }
 0x219   : > { %v1782_v14 = vpop.permute.xlu0 %1781  ;;  %v4781_v18 = vld [vmem:[#allocation3 + $0x88] sm:$0xf0] }
 0x21a   : > { %1803 = vst.msk [vmem:[#allocation3 + $0x30] sm:$0xf] %vm1633_vm2, %v1782_v14  ;;  %v4196_v19 = vor.u32 %v4781_v18, %v4195_v44  ;;  %v4185_v59 = vld [vmem:[#allocation3 + $0x6c] sm:$0xf0] }
 0x21b   : > { %v4188_v0 = vor.u32 %v4775_v62, %v4185_v59  ;;  %v4205_v5 = vld [vmem:[#allocation3 + $0x94] sm:$0xf0] }
 0x21c   : > { %2313 = vmatmul.bf16.gmra.mxu1 %v4196_v19 }
 0x21e   : > { %v2333_v36 = vpop.f32.mrf.mxu2 }
 0x221   : > { %v1788_v16 = vpop.permute.xlu0 %1787  ;;  %v4163_v34 = vld [vmem:[#allocation3 + $0x30] sm:$0xf] }
 0x222   : > { %1806 = vst.msk [vmem:[#allocation3 + $0x6c] sm:$0xf] %vm1633_vm2, %v1788_v16  ;;  %v4164_v52 = vor.u32 %v4772_v35, %v4163_v34  ;;  %v2302_v34 = vadd.f32 %v5713_v26, %v5739_v28 }
 0x223   : > { %4357 = vmatmul.msk.bf16.vlgmr.msrb.gmra.mxu2 %vm2277_vm4, %v4152_v30 }
 0x224   : > { %2361 = vmatmul.bf16.gmra.mxu3 %v4164_v52  ;;  %v2304_v55 = vpop.f32.mrf.mxu1  ;;  %v2331_v35 = vadd.f32 %v5737_v2, %v2302_v34 }
 0x225   : > { %v2305_v58 = vadd.f32 %v5713_v26, %v2304_v55 }
 0x226   : > { %v2335_v42 = vpop.f32.mrf.mxu2 }
 0x227   : > { %v5744_v41 = vadd.f32 %v2333_v36, %v2305_v58 }
 0x229   : > { %v1832_v37 = vpop.permute.xlu0 %1831  ;;  %v4777_v45 = vld [vmem:[#allocation3 + $0x68] sm:$0xf0] }
 0x22a   : > { %1843 = vst.msk [vmem:[#allocation3 + $0x84] sm:$0xf] %vm1633_vm2, %v1832_v37  ;;  %v4184_v50 = vor.u32 %v4777_v45, %v4183_v40  ;;  %vm5805_vm2 = vmor %vm2707_vm3, %vm2708_vm12 }
 0x22b   : > { %vm5868_vm3 = vmor %vm2789_vm1, %vm1283_vm10 }
 0x22c   : > { %2385 = vmatmul.bf16.vlgmr.msrb.gmra.mxu1 %v4148_v22  ;;  %v2306_v25 = vpop.f32.mrf.mxu1 }
 0x22d   : > { %v2307_v47 = vadd.f32 %v5713_v26, %v2306_v25 }
 0x22f   : > { %v5748_v31 = vadd.f32 %v2335_v42, %v2307_v47 }
 0x231   : > { %v4780_v33 = vld [vmem:[#allocation3 + $0x84] sm:$0xf] }
 0x232   : > { %v4208_v3 = vor.u32 %v4780_v33, %v4205_v5 }
 0x233   : > { %4358 = vmatmul.msk.bf16.gmra.mxu2 %vm2277_vm4, %v4172_v39 }
 0x234   : > { %2366 = vmatmul.bf16.gmra.mxu3 %v4184_v50 }
 0x23c   : > { %2390 = vmatmul.bf16.gmra.mxu1 %v4168_v27 }
 0x243   : > { %4359 = vmatmul.msk.bf16.gmra.mxu2 %vm2277_vm4, %v4192_v23 }
 0x244   : > { %2371 = vmatmul.bf16.gmra.mxu3 %v4204_v57  ;;  %v2679_v57 = vrot.slane %v5195_v48, 2 }
 0x245   : > { %v2309_v43 = vpop.f32.mrf.mxu1 }
 0x246   : > { %v2310_v6 = vadd.f32 %v5713_v26, %v2309_v43  ;;  %v5773_v43 = vsel %vm2683_vm9, %v5195_v48, %v2679_v57 }
 0x24c   : > { %2395 = vmatmul.bf16.gmra.mxu1 %v4188_v0 }
 0x24d   : > { %v2311_v53 = vpop.f32.mrf.mxu1 }
 0x24e   : > { %v2312_v63 = vadd.f32 %v5713_v26, %v2311_v53 }
 0x253   : > { %4360 = vmatmul.msk.bf16.gmra.mxu2 %vm2277_vm4, %v4212_v4  ;;  %vm5825_vm4 = vmor %vm5805_vm2, %vm2710_vm14 }
 0x25c   : > { %2400 = vmatmul.bf16.gmra.mxu1 %v4208_v3 }
 0x273   : > { %v2357_v8 = vpop.f32.mrf.mxu3 }
 0x274   : > { %v2358_v52 = vadd.f32 %v2357_v8, %v5723_v49 }
 0x276   : > { %v2338_v7 = vpop.f32.mrf.mxu2 }
 0x277   : > { %v5754_v9 = vadd.f32 %v2338_v7, %v2310_v6 }
 0x27b   : > { %v2359_v56 = vpop.f32.mrf.mxu3 }
 0x27c   : > { %v2360_v36 = vadd.f32 %v2359_v56, %v2331_v35 }
 0x27e   : > { %v2340_v10 = vpop.f32.mrf.mxu2 }
 0x27f   : > { %v5757_v11 = vadd.f32 %v2340_v10, %v2312_v63 }
 0x296   : > { %v2343_v13 = vpop.f32.mrf.mxu2 }
 0x299   : > { %v2314_v12 = vpop.f32.mrf.mxu1 }
 0x29a   : > { %v2315_v32 = vadd.f32 %v5713_v26, %v2314_v12  ;;  %v5780_v12 = vsel %vm2686_vm11, %v5195_v48, %v2679_v57  ;;  %v2640_v48 = vld [vmem:[#allocation4 + $0x4] sm:$0x7]  ;;  %v4835_v57 = vld [vmem:[%s6284_s5 + $0x30] sm:$0xff] }
 0x29c   : > { %v5760_v18 = vadd.f32 %v2343_v13, %v2315_v32 }
 0x29e   : > { %v2345_v14 = vpop.f32.mrf.mxu2 }
 0x2a1   : > { %v2316_v44 = vpop.f32.mrf.mxu1 }
 0x2a2   : > { %v2317_v19 = vadd.f32 %v5713_v26, %v2316_v44  ;;  %v2715_v44 = vshll.u32 %v5773_v43, 16 }
 0x2a4   : > { %v5763_v30 = vadd.f32 %v2345_v14, %v2317_v19  ;;  %v2712_v14 = vshrl.u32 %v5773_v43, 16 }
 0x2a6   : > { %v2415_v15 = vpop.f32.mrf.mxu2 }
 0x2a7   : > { %v2362_v55 = vpop.f32.mrf.mxu3 }
 0x2a8   : > { %v2363_v5 = vadd.f32 %v2362_v55, %v5744_v41  ;;  %v2717_v55 = vrot.slane %v2715_v44, 7 }
 0x2a9   : > { %v2386_v16 = vpop.f32.mrf.mxu1 }
 0x2aa   : > { %v2387_v21 = vadd.f32 %v2386_v16, %v2358_v52  ;;  %v2689_v52 = vrot.slane %v5780_v12, 2 }
 0x2ac   : > { %v2416_v22 = vadd.f32 %v2415_v15, %v2387_v21 }
 0x2ae   : > { %v2417_v58 = vpop.f32.mrf.mxu2 }
 0x2af   : > { %v2364_v39 = vpop.f32.mrf.mxu3 }
 0x2b0   : > { %v2365_v10 = vadd.f32 %v2364_v39, %v5748_v31 }
 0x2b1   : > { %v2388_v37 = vpop.f32.mrf.mxu1 }
 0x2b2   : > { %v2389_v38 = vadd.f32 %v2388_v37, %v2360_v36  ;;  %v2714_v36 = vrot.slane %v2712_v14, 6  ;;  %v4834_v14 = vld [vmem:[%s6284_s5 + $0x28] sm:$0xff] }
 0x2b4   : > { %v2418_v24 = vadd.f32 %v2417_v58, %v2389_v38 }
 0x2b6   : > { %v2435_v25 = vmax.f32 %v2416_v22, %v2418_v24  ;;  %v2420_v50 = vpop.f32.mrf.mxu2 }
 0x2b7   : > { %v5775_v63 = vpop.f32.mrf.mxu3 }
 0x2b8   : > { %v2443_v42 = vrot.slane %v2435_v25, 2  ;;  %v2444_v45 = vrot.slane %v2435_v25, 4  ;;  %v2445_v47 = vrot.slane %v2435_v25, 6  ;;  %v4361_v46 = vrot.slane %v2435_v25, 9 }
 0x2b9   : > { %v2391_v61 = vpop.f32.mrf.mxu1 }
 0x2ba   : > { %v4362_v40 = vrot.slane %v2443_v42, 9  ;;  %v4363_v26 = vrot.slane %v2444_v45, 9  ;;  %v4364_v28 = vrot.slane %v2445_v47, 9  ;;  %v2515_v2 = vmax.f32 %v2435_v25, %v4361_v46 }
 0x2bb   : > { %v2392_v13 = vadd.f32 %v2391_v61, %v2363_v5 }
 0x2bc   : > { %v2516_v49 = vmax.f32 %v2443_v42, %v4362_v40  ;;  %v2517_v51 = vmax.f32 %v2444_v45, %v4363_v26  ;;  %v2518_v60 = vmax.f32 %v2445_v47, %v4364_v28  ;;  %v2531_v27 = vmax.f32 %v2515_v2, 0.0  ;;  %v4836_v26 = vld [vmem:[%s6284_s5 + $0x38] sm:$0xff] }
 0x2bd   : > { %v2421_v34 = vadd.f32 %v2420_v50, %v2392_v13  ;;  %v2718_v28 = vor.u32 %v2717_v55, %v2714_v36  ;;  %v2721_v2 = vshll.u32 %v2689_v52, 16  ;;  %3595 = vmatpush.bf16.msra.mxu3 %v4836_v26 }
 0x2be   : > { %v2532_v20 = vmax.f32 %v2516_v49, 0.0  ;;  %v2533_v17 = vmax.f32 %v2517_v51, 0.0  ;;  %v2534_v54 = vmax.f32 %v2518_v60, 0.0  ;;  %v2553_v23 = vpack.c.bf16 %v2531_v27, %v2531_v27  ;;  %v2422_v3 = vpop.f32.mrf.mxu2 }
 0x2bf   : > { %v2369_v42 = vpop.f32.mrf.mxu3 }
 0x2c0   : > { %v2554_v59 = vpack.c.bf16 %v2532_v20, %v2532_v20  ;;  %v2555_v62 = vpack.c.bf16 %v2533_v17, %v2533_v17  ;;  %v2556_v0 = vpack.c.bf16 %v2534_v54, %v2534_v54  ;;  %v2585_v1 = vunpack.c.l.b16 %v2553_v23 }
 0x2c1   : > { %v2393_v8 = vpop.f32.mrf.mxu1  ;;  %3596 = vmatpush.bf16.msra.mxu3 %v4835_v57 }
 0x2c2   : > { %v2586_v29 = vunpack.c.l.b16 %v2554_v59  ;;  %v2587_v4 = vunpack.c.l.b16 %v2555_v62  ;;  %v2588_v33 = vunpack.c.l.b16 %v2556_v0  ;;  %v2601_v6 = vrot.slane %v2585_v1, 7 }
 0x2c3   : > { %v2394_v15 = vadd.f32 %v2393_v8, %v2365_v10  ;;  %v2723_v59 = vrot.slane %v2721_v2, 7  ;;  %v2719_v1 = vrot.slane %v2718_v28, 2  ;;  %v2370_v8 = vadd.f32 %v2369_v42, %v5757_v11 }
 0x2c4   : > { %v2602_v7 = vrot.slane %v2586_v29, 6  ;;  %v2604_v53 = vrot.slane %v2587_v4, 5  ;;  %v2606_v32 = vrot.slane %v2588_v33, 4 }
 0x2c5   : > { %v2423_v35 = vadd.f32 %v2422_v3, %v2394_v15  ;;  %3597 = vmatpush.bf16.msra.mxu3 %v4834_v14 }
 0x2c6   : > { %v2603_v41 = vsel %vm1271_vm5, %v2602_v7, %v2601_v6  ;;  %v5795_v37 = vpop.f32.mrf.mxu2  ;;  %v2368_v7 = vadd.f32 %v5775_v63, %v5754_v9  ;;  %v2724_v9 = vsel %vm5825_vm4, %v2719_v1, %v2723_v59  ;;  %v4894_v6 = vld [vmem:[%s6284_s5 + $0x208] sm:$0xff] }
 0x2c7   : > { %v2605_v19 = vsel %vm1274_vm6, %v2604_v53, %v2603_v41  ;;  %v2436_v58 = vmax.f32 %v2421_v34, %v2423_v35 }
 0x2c8   : > { %v2607_v31 = vsel %vm1277_vm7, %v2606_v32, %v2605_v19 }
 0x2c9   : > { %v2629_v16 = vpack.c.b16 %v2607_v31, %v2607_v31  ;;  %v2446_v38 = vrot.slane %v2436_v58, 2  ;;  %v2447_v22 = vrot.slane %v2436_v58, 4  ;;  %v2448_v24 = vrot.slane %v2436_v58, 6  ;;  %v2396_v45 = vpop.f32.mrf.mxu1  ;;  %v2372_v31 = vpop.f32.mrf.mxu3 }
 0x2ca   : > { %v4365_v25 = vrot.slane %v2436_v58, 9 }
 0x2cb   : > { %v2641_v21 = vsel %vm5787_vm15, %v2629_v16, %v2640_v48  ;;  %v4366_v47 = vrot.slane %v2446_v38, 9  ;;  %v4367_v46 = vrot.slane %v2447_v22, 9  ;;  %v4368_v39 = vrot.slane %v2448_v24, 9 }
 0x2cc   : > { %2642 = vst [vmem:[#allocation4 + $0x4] sm:$0x7] %v2641_v21  ;;  %v2519_v40 = vmax.f32 %v2436_v58, %v4365_v25  ;;  %v2397_v48 = vadd.f32 %v2396_v45, %v2368_v7 }
 0x2cd   : > { %v2520_v50 = vmax.f32 %v2446_v38, %v4366_v47  ;;  %v2521_v49 = vmax.f32 %v2447_v22, %v4367_v46  ;;  %v2522_v51 = vmax.f32 %v2448_v24, %v4368_v39  ;;  %v4833_v38 = vld [vmem:[%s6284_s5 + $0x20] sm:$0xff] }
 0x2ce   : > { %v2535_v60 = vmax.f32 %v2519_v40, 0.0  ;;  %v2427_v0 = vpop.f32.mrf.mxu2  ;;  %v2426_v25 = vadd.f32 %v5795_v37, %v2397_v48  ;;  %3598 = vmatpush.bf16.msra.mxu3 %v4833_v38  ;;  %v2643_v40 = vld [vmem:[#allocation4 + $0x8] sm:$0x7]  ;;  %v4830_v48 = vld [vmem:[%s6284_s5 + $0x8] sm:$0xff] }
 0x2cf   : > { %v2536_v17 = vmax.f32 %v2520_v50, 0.0  ;;  %v2537_v54 = vmax.f32 %v2521_v49, 0.0  ;;  %v2538_v23 = vmax.f32 %v2522_v51, 0.0  ;;  %v4832_v49 = vld [vmem:[%s6284_s5 + $0x18] sm:$0xff] }
 0x2d0   : > { %v2557_v61 = vpack.c.bf16 %v2535_v60, %v2535_v60 }
 0x2d1   : > { %v2558_v29 = vpack.c.bf16 %v2536_v17, %v2536_v17  ;;  %v2559_v4 = vpack.c.bf16 %v2537_v54, %v2537_v54  ;;  %v2560_v33 = vpack.c.bf16 %v2538_v23, %v2538_v23  ;;  %v2398_v10 = vpop.f32.mrf.mxu1  ;;  %v4377_v54 = vrot.slane %v5773_v43, 9  ;;  %v2374_v57 = vpop.f32.mrf.mxu3  ;;  %v4831_v43 = vld [vmem:[%s6284_s5 + $0x10] sm:$0xff] }
 0x2d2   : > { %v2589_v53 = vunpack.c.l.b16 %v2557_v61  ;;  %v2399_v11 = vadd.f32 %v2398_v10, %v2370_v8  ;;  %v2794_v23 = vrot.slane %v2689_v52, 7  ;;  %3599 = vmatpush.bf16.msra.mxu3 %v4832_v49 }
 0x2d3   : > { %v5803_v27 = vld [vmem:[#allocation4 + $0x4] sm:$0x7]  ;;  %v2590_v44 = vunpack.c.l.b16 %v2558_v29  ;;  %v2591_v19 = vunpack.c.l.b16 %v2559_v4  ;;  %v2592_v15 = vunpack.c.l.b16 %v2560_v33  ;;  %v2373_v4 = vadd.f32 %v2372_v31, %v5760_v18 }
 0x2d4   : > { %2662 = vst [vmem:[#allocation1 + $0x1] ss:$2 sm:$0xff] %v5803_v27  ;;  %v2680_v62 = vrot.slane %v5803_v27, 2  ;;  %v2608_v35 = vrot.slane %v2589_v53, 7  ;;  %v2428_v42 = vadd.f32 %v2427_v0, %v2399_v11  ;;  %v2795_v53 = vsel %vm5868_vm3, %v4377_v54, %v2794_v23 }
 0x2d5   : > { %v2609_v36 = vrot.slane %v2590_v44, 6  ;;  %v2611_v55 = vrot.slane %v2591_v19, 5  ;;  %v2613_v24 = vrot.slane %v2592_v15, 4  ;;  %v2375_v18 = vadd.f32 %v2374_v57, %v5763_v30 }
 0x2d6   : > { %v5816_v5 = vsel %vm2683_vm9, %v5803_v27, %v2680_v62  ;;  %v5820_v3 = vsel %vm2686_vm11, %v5803_v27, %v2680_v62  ;;  %v2437_v26 = vmax.f32 %v2426_v25, %v2428_v42  ;;  %v2430_v28 = vpop.f32.mrf.mxu2  ;;  %3600 = vmatpush.bf16.msra.mxu3 %v4831_v43  ;;  %v4852_v43 = vld [vmem:[%s6284_s5 + $0xb8] sm:$0xff] }
 0x2d7   : > { %v2694_v13 = vrot.slane %v5820_v3, 2  ;;  %v2725_v41 = vshrl.u32 %v5816_v5, 16  ;;  %v2728_v32 = vshll.u32 %v5816_v5, 16  ;;  %v2610_v22 = vsel %vm1271_vm5, %v2609_v36, %v2608_v35  ;;  %3623 = vmatpush.bf16.msra.mxu1 %v4852_v43  ;;  %v4837_v43 = vld [vmem:[%s6284_s5 + $0x40] sm:$0xff] }
 0x2d8   : > { %v2612_v46 = vsel %vm1274_vm6, %v2611_v55, %v2610_v22  ;;  %v2449_v51 = vrot.slane %v2437_v26, 2  ;;  %v2450_v60 = vrot.slane %v2437_v26, 4  ;;  %v2451_v20 = vrot.slane %v2437_v26, 6  ;;  %v4829_v22 = vld [vmem:[%s6284_s5] sm:$0xff] }
 0x2d9   : > { %v2727_v63 = vrot.slane %v2725_v41, 6  ;;  %v2730_v16 = vrot.slane %v2728_v32, 7  ;;  %v2734_v34 = vshll.u32 %v2694_v13, 16  ;;  %v2614_v39 = vsel %vm1277_vm7, %v2613_v24, %v2612_v46  ;;  %v2401_v2 = vpop.f32.mrf.mxu1 }
 0x2da   : > { %v2630_v37 = vpack.c.b16 %v2614_v39, %v2614_v39  ;;  %v4369_v17 = vrot.slane %v2437_v26, 9  ;;  %v4370_v59 = vrot.slane %v2449_v51, 9  ;;  %v4371_v62 = vrot.slane %v2450_v60, 9  ;;  %3601 = vmatpush.bf16.msra.mxu3 %v4830_v48 }
 0x2db   : > { %v2669_v21 = vld.sshfl [vmem:[#allocation1] sm:$0xff pattern:$0x75643120]  ;;  %v2731_v58 = vor.u32 %v2730_v16, %v2727_v63  ;;  %v2736_v47 = vrot.slane %v2734_v34, 7  ;;  %v4372_v0 = vrot.slane %v2451_v20, 9  ;;  %v2798_v29 = vrot.slane %v2694_v13, 7 }
 0x2dc   : > { %2765 = vst [vmem:[#allocation1] ss:$2 sm:$0xff] %v2724_v9  ;;  %v2644_v61 = vsel %vm5787_vm15, %v2630_v37, %v2643_v40  ;;  %v2523_v1 = vmax.f32 %v2437_v26, %v4369_v17  ;;  %v2524_v52 = vmax.f32 %v2449_v51, %v4370_v59  ;;  %v2525_v33 = vmax.f32 %v2450_v60, %v4371_v62  ;;  %v4843_v17 = vld [vmem:[%s6284_s5 + $0x70] sm:$0xff] }
 0x2dd   : > { %v2732_v45 = vrot.slane %v2731_v58, 2  ;;  %2673 = vst [vmem:[#allocation5] sm:$0xf] %v2669_v21  ;;  %v2526_v3 = vmax.f32 %v2451_v20, %v4372_v0  ;;  %v4378_v10 = vrot.slane %v5816_v5, 9  ;;  %v2402_v13 = vadd.f32 %v2401_v2, %v2373_v4  ;;  %v2646_v20 = vld [vmem:[#allocation4 + $0xc] sm:$0x7] }
 0x2de   : > { %2645 = vst [vmem:[#allocation4 + $0x8] sm:$0x7] %v2644_v61  ;;  %v2539_v7 = vmax.f32 %v2523_v1, 0.0  ;;  %v2540_v41 = vmax.f32 %v2524_v52, 0.0  ;;  %v2541_v32 = vmax.f32 %v2525_v33, 0.0  ;;  %v2432_v16 = vpop.f32.mrf.mxu2  ;;  %3602 = vmatpush.bf16.msra.mxu3 %v4829_v22  ;;  %v4842_v52 = vld [vmem:[%s6284_s5 + $0x68] sm:$0xff] }
 0x2df   : > { %v5851_v50 = vsel %vm5825_vm4, %v2732_v45, %v2736_v47  ;;  %v2542_v8 = vmax.f32 %v2526_v3, 0.0  ;;  %v5878_v15 = vsel %vm5868_vm3, %v4378_v10, %v2798_v29  ;;  %v2431_v35 = vadd.f32 %v2430_v28, %v2402_v13  ;;  %v4844_v45 = vld [vmem:[%s6284_s5 + $0x78] sm:$0xff]  ;;  %v4850_v22 = vld [vmem:[%s6284_s5 + $0xa8] sm:$0xff] }
 0x2e0   : > { %2768 = vst [vmem:[#allocation1 + $0x1] ss:$2 sm:$0xff] %v5851_v50  ;;  %v2561_v14 = vpack.c.bf16 %v2539_v7, %v2539_v7  ;;  %v2562_v5 = vpack.c.bf16 %v2540_v41, %v2540_v41  ;;  %v2563_v30 = vpack.c.bf16 %v2541_v32, %v2541_v32 }
 0x2e1   : > { %v2403_v44 = vpop.f32.mrf.mxu1  ;;  %v2564_v9 = vpack.c.bf16 %v2542_v8, %v2542_v8 }
 0x2e2   : > { %v2404_v31 = vadd.f32 %v2403_v44, %v2375_v18  ;;  %v2593_v63 = vunpack.c.l.b16 %v2561_v14  ;;  %v2594_v55 = vunpack.c.l.b16 %v2562_v5  ;;  %v2595_v11 = vunpack.c.l.b16 %v2563_v30  ;;  %3609 = vmatpush.bf16.msrb.mxu3 %v4844_v45  ;;  %v4851_v44 = vld [vmem:[%s6284_s5 + $0xb0] sm:$0xff] }
 0x2e3   : > { %v2596_v58 = vunpack.c.l.b16 %v2564_v9  ;;  %3624 = vmatpush.bf16.msra.mxu1 %v4851_v44 }
 0x2e4   : > { %v2433_v36 = vadd.f32 %v2432_v16, %v2404_v31  ;;  %v2615_v24 = vrot.slane %v2593_v63, 7  ;;  %v2616_v25 = vrot.slane %v2594_v55, 6  ;;  %v2618_v42 = vrot.slane %v2595_v11, 5  ;;  %v4860_v55 = vld [vmem:[%s6284_s5 + $0xf8] sm:$0xff] }
 0x2e5   : > { %v5884_v34 = vld [vmem:[#allocation4 + $0x8] sm:$0x7]  ;;  %v2620_v26 = vrot.slane %v2596_v58, 4  ;;  %3637 = vmatpush.bf16.msra.mxu2 %v4860_v55 }
 0x2e6   : > { %2665 = vst [vmem:[#allocation1 + $0x10] ss:$2 sm:$0xff] %v5884_v34  ;;  %v2681_v21 = vrot.slane %v5884_v34, 2  ;;  %v2438_v38 = vmax.f32 %v2431_v35, %v2433_v36  ;;  %v2617_v47 = vsel %vm1271_vm5, %v2616_v25, %v2615_v24  ;;  %3610 = vmatpush.bf16.msrb.mxu3 %v4843_v17 }
 0x2e7   : > { %v2775_v19 = vld.sshfl [vmem:[#allocation1] sm:$0xff pattern:$0x75643120]  ;;  %v2619_v2 = vsel %vm1274_vm6, %v2618_v42, %v2617_v47  ;;  %v4859_v42 = vld [vmem:[%s6284_s5 + $0xf0] sm:$0xff]  ;;  %3625 = vmatpush.bf16.msra.mxu1 %v4850_v22 }
 0x2e8   : > { %2809 = vst [vmem:[#allocation1] ss:$2 sm:$0xff] %v2795_v53  ;;  %v2452_v46 = vrot.slane %v2438_v38, 2  ;;  %v2453_v39 = vrot.slane %v2438_v38, 4  ;;  %v5897_v40 = vsel %vm2683_vm9, %v5884_v34, %v2681_v21  ;;  %v2454_v37 = vrot.slane %v2438_v38, 6  ;;  %v4853_v22 = vld [vmem:[%s6284_s5 + $0xc0] sm:$0xff] }
 0x2e9   : > { %2812 = vst [vmem:[#allocation1 + $0x1] ss:$2 sm:$0xff] %v5878_v15  ;;  %v4373_v49 = vrot.slane %v2438_v38, 9  ;;  %v2621_v60 = vsel %vm1277_vm7, %v2620_v26, %v2619_v2  ;;  %v2738_v59 = vshrl.u32 %v5897_v40, 16  ;;  %v2741_v62 = vshll.u32 %v5897_v40, 16  ;;  %v4849_v26 = vld [vmem:[%s6284_s5 + $0xa0] sm:$0xff]  ;;  %3638 = vmatpush.bf16.msra.mxu2 %v4859_v42 }
 0x2ea   : > { %2779 = vst [vmem:[#allocation5 + $0x4] sm:$0xf] %v2775_v19  ;;  %v4374_v51 = vrot.slane %v2452_v46, 9  ;;  %v2631_v54 = vpack.c.b16 %v2621_v60, %v2621_v60  ;;  %v4375_v23 = vrot.slane %v2453_v39, 9  ;;  %v4376_v61 = vrot.slane %v2454_v37, 9  ;;  %3611 = vmatpush.bf16.msrb.mxu3 %v4842_v52  ;;  %v4841_v19 = vld [vmem:[%s6284_s5 + $0x60] sm:$0xff] }
 0x2eb   : > { %v2527_v57 = vmax.f32 %v2438_v38, %v4373_v49  ;;  %v5918_v10 = vsel %vm2686_vm11, %v5884_v34, %v2681_v21  ;;  %v2740_v18 = vrot.slane %v2738_v59, 6  ;;  %v2743_v41 = vrot.slane %v2741_v62, 7  ;;  %v4840_v38 = vld [vmem:[%s6284_s5 + $0x58] sm:$0xff]  ;;  %3626 = vmatpush.bf16.msra.mxu1 %v4849_v26  ;;  %v4838_v59 = vld [vmem:[%s6284_s5 + $0x48] sm:$0xff]  ;;  %v4847_v52 = vld [vmem:[%s6284_s5 + $0x90] sm:$0xff] }
 0x2ec   : > { %v2528_v0 = vmax.f32 %v2452_v46, %v4374_v51  ;;  %v2529_v1 = vmax.f32 %v2453_v39, %v4375_v23  ;;  %v2530_v29 = vmax.f32 %v2454_v37, %v4376_v61  ;;  %v2699_v48 = vrot.slane %v5918_v10, 2  ;;  %v4839_v39 = vld [vmem:[%s6284_s5 + $0x50] sm:$0xff]  ;;  %v2649_v51 = vld [vmem:[#allocation4 + $0x10] sm:$0x7]  ;;  %v4848_v62 = vld [vmem:[%s6284_s5 + $0x98] sm:$0xff] }
 0x2ed   : > { %v2543_v4 = vmax.f32 %v2527_v57, 0.0  ;;  %v2744_v16 = vor.u32 %v2743_v41, %v2740_v18  ;;  %v4858_v61 = vld [vmem:[%s6284_s5 + $0xe8] sm:$0xff]  ;;  %v4379_v44 = vrot.slane %v5897_v40, 9 }
 0x2ee   : > { %v2544_v33 = vmax.f32 %v2528_v0, 0.0  ;;  %v2545_v3 = vmax.f32 %v2529_v1, 0.0  ;;  %v2546_v7 = vmax.f32 %v2530_v29, 0.0  ;;  %3612 = vmatpush.bf16.msrb.mxu3 %v4841_v19  ;;  %v2747_v24 = vshll.u32 %v2699_v48, 16  ;;  %3639 = vmatpush.bf16.msra.mxu2 %v4858_v61  ;;  %v4846_v18 = vld [vmem:[%s6284_s5 + $0x88] sm:$0xff] }
 0x2ef   : > { %v2565_v53 = vpack.c.bf16 %v2543_v4, %v2543_v4  ;;  %v4857_v4 = vld [vmem:[%s6284_s5 + $0xe0] sm:$0xff]  ;;  %3627 = vmatpush.bf16.msra.mxu1 %v4848_v62 }
 0x2f0   : > { %v2819_v28 = vld.sshfl [vmem:[#allocation1] sm:$0xff pattern:$0x75643120]  ;;  %v2566_v13 = vpack.c.bf16 %v2544_v33, %v2544_v33  ;;  %v2567_v32 = vpack.c.bf16 %v2545_v3, %v2545_v3  ;;  %v2568_v8 = vpack.c.bf16 %v2546_v7, %v2546_v7  ;;  %v4856_v7 = vld [vmem:[%s6284_s5 + $0xd8] sm:$0xff] }
 0x2f1   : > { %2825 = vst [vmem:[#allocation1] ss:$2 sm:$0xff] %v5803_v27  ;;  %v2647_v27 = vsel %vm5787_vm15, %v2631_v54, %v2646_v20  ;;  %v2597_v14 = vunpack.c.l.b16 %v2565_v53  ;;  %v2749_v20 = vrot.slane %v2747_v24, 7  ;;  %v4884_v24 = vld [vmem:[%s6284_s5 + $0x1b8] sm:$0xff] }
 0x2f2   : > { %2823 = vst [vmem:[#allocation5 + $0x8] sm:$0xf] %v2819_v28  ;;  %v2598_v31 = vunpack.c.l.b16 %v2566_v13  ;;  %v2599_v5 = vunpack.c.l.b16 %v2567_v32  ;;  %v2600_v30 = vunpack.c.l.b16 %v2568_v8  ;;  %3613 = vmatpush.bf16.msrb.mxu3 %v4840_v38  ;;  %v2745_v28 = vrot.slane %v2744_v16, 2  ;;  %3640 = vmatpush.bf16.msra.mxu2 %v4857_v4  ;;  %v4385_v32 = vld [vmem:[#allocation5] sm:$0xf]  ;;  %v4866_v38 = vld [vmem:[%s6284_s5 + $0x128] sm:$0xff] }
 0x2f3   : > { %2827 = vst [vmem:[#allocation1 + $0x1] ss:$2 sm:$0xff] %v5884_v34  ;;  %v2622_v9 = vrot.slane %v2597_v14, 7  ;;  %3628 = vmatpush.bf16.msra.mxu1 %v4847_v52  ;;  %v2802_v13 = vrot.slane %v2699_v48, 7  ;;  %v4868_v14 = vld [vmem:[%s6284_s5 + $0x138] sm:$0xff]  ;;  %v4845_v48 = vld [vmem:[%s6284_s5 + $0x80] sm:$0xff] }
 0x2f4   : > { %2648 = vst [vmem:[#allocation4 + $0xc] sm:$0x7] %v2647_v27  ;;  %v2623_v63 = vrot.slane %v2598_v31, 6  ;;  %v2625_v36 = vrot.slane %v2599_v5, 5  ;;  %v2627_v58 = vrot.slane %v2600_v30, 4  ;;  %v5975_v0 = vsel %vm5825_vm4, %v2745_v28, %v2749_v20  ;;  %v4876_v30 = vld [vmem:[%s6284_s5 + $0x178] sm:$0xff] }
 0x2f5   : > { %v6018_v5 = vsel %vm5868_vm3, %v4379_v44, %v2802_v13  ;;  %v4883_v28 = vld [vmem:[%s6284_s5 + $0x1b0] sm:$0xff]  ;;  %v4862_v4 = vld [vmem:[%s6284_s5 + $0x108] sm:$0xff]  ;;  %v4880_v52 = vld [vmem:[%s6284_s5 + $0x198] sm:$0xff] }
 0x2f6   : > { %v2624_v21 = vsel %vm1271_vm5, %v2623_v63, %v2622_v9  ;;  %3614 = vmatpush.bf16.msrb.mxu3 %v4839_v39  ;;  %3641 = vmatpush.bf16.msra.mxu2 %v4856_v7  ;;  %v4867_v63 = vld [vmem:[%s6284_s5 + $0x130] sm:$0xff]  ;;  %v4870_v7 = vld [vmem:[%s6284_s5 + $0x148] sm:$0xff]  ;;  %v4861_v13 = vld [vmem:[%s6284_s5 + $0x100] sm:$0xff]  ;;  %vm3767_vm5 = vcmask 253952  }
 0x2f7   : > { %v2626_v25 = vsel %vm1274_vm6, %v2625_v36, %v2624_v21  ;;  %3629 = vmatpush.bf16.msra.mxu1 %v4846_v18  ;;  %v4854_v36 = vld [vmem:[%s6284_s5 + $0xc8] sm:$0xff]  ;;  %v4879_v44 = vld [vmem:[%s6284_s5 + $0x190] sm:$0xff]  ;;  %vm3768_vm6 = vmand %vm3767_vm5, %vm1419_vm8 }
 0x2f8   : > { %v2628_v46 = vsel %vm1277_vm7, %v2627_v58, %v2626_v25  ;;  %vm3782_vm7 = vcmask 516352  }
 0x2f9   : > { %v2632_v60 = vpack.c.b16 %v2628_v46, %v2628_v46  ;;  %v4865_v46 = vld [vmem:[%s6284_s5 + $0x120] sm:$0xff]  ;;  %vm3783_vm10 = vmand %vm3782_vm7, %vm1419_vm8 }
 0x2fa   : > { %3615 = vmatpush.bf16.msrb.mxu3 %v4838_v59  ;;  %v2833_v3 = vld.sshfl [vmem:[#allocation1] sm:$0xff pattern:$0x75643120]  ;;  %v4393_v59 = vld [vmem:[#allocation5 + $0x8] sm:$0xf] }
 0x2fb   : > { %v5927_v35 = vld [vmem:[#allocation4 + $0xc] sm:$0x7]  ;;  %v2650_v57 = vsel %vm5787_vm15, %v2632_v60, %v2649_v51  ;;  %2837 = vst [vmem:[#allocation5 + $0xc] sm:$0xf] %v2833_v3  ;;  %3630 = vmatpush.bf16.msra.mxu1 %v4845_v48  ;;  %v4864_v51 = vld [vmem:[%s6284_s5 + $0x118] sm:$0xff]  ;;  %v4891_v48 = vld [vmem:[%s6284_s5 + $0x1f0] sm:$0xff] }
 0x2fc   : > { %2668 = vst [vmem:[#allocation1 + $0x11] ss:$2 sm:$0xff] %v5927_v35  ;;  %v2682_v11 = vrot.slane %v5927_v35, 2  ;;  %vm3810_vm15 = vcmask 1041152  }
 0x2fd   : > { %2651 = vst [vmem:[#allocation4 + $0x10] sm:$0x7] %v2650_v57  ;;  %v4863_v57 = vld [vmem:[%s6284_s5 + $0x110] sm:$0xff]  ;;  %vm3811_vm12 = vmand %vm3810_vm15, %vm1419_vm8 }
 0x2fe   : > { %v5949_v45 = vsel %vm2683_vm9, %v5927_v35, %v2682_v11  ;;  %v2702_v47 = vsel %vm2686_vm11, %v5927_v35, %v2682_v11  ;;  %3616 = vmatpush.bf16.msrb.mxu3 %v4837_v43  ;;  %2859 = vst [vmem:[#allocation1] ss:$2 sm:$0xff] %v5851_v50  ;;  %v4855_v50 = vld [vmem:[%s6284_s5 + $0xd0] sm:$0xff]  ;;  %v6102_v43 = vld [vmem:[#allocation4 + $0x14] sm:$0x7] }
 0x2ff   : > { %v2704_v2 = vrot.slane %v2702_v47, 2  ;;  %v2751_v37 = vshrl.u32 %v5949_v45, 16  ;;  %v2754_v49 = vshll.u32 %v5949_v45, 16  ;;  %2861 = vst [vmem:[#allocation1 + $0x1] ss:$2 sm:$0xff] %v5975_v0  ;;  %v4380_v10 = vrot.slane %v5949_v45, 9  ;;  %3642 = vmatpush.bf16.msra.mxu2 %v4855_v50  ;;  %3665 = vmatpush.bf16.msrb.mxu1 %v4876_v30 }
 0x300   : > { %v4875_v11 = vld [vmem:[%s6284_s5 + $0x170] sm:$0xff]  ;;  %v2907_v18 = vrot.slane %v6102_v43, 2  ;;  %v4878_v30 = vld [vmem:[%s6284_s5 + $0x188] sm:$0xff] }
 0x301   : > { %v2753_v17 = vrot.slane %v2751_v37, 6  ;;  %v2756_v54 = vrot.slane %v2754_v49, 7  ;;  %v2760_v23 = vshll.u32 %v2704_v2, 16  ;;  %v2806_v41 = vrot.slane %v2704_v2, 7  ;;  %v4873_v2 = vld [vmem:[%s6284_s5 + $0x160] sm:$0xff] }
 0x302   : > { %v4820_v49 = vld [vmem:[#allocation5 + $0x4] sm:$0xf] }
 0x303   : > { %v2670_v27 = vld.sshfl [vmem:[#allocation1 + $0x10] sm:$0xff pattern:$0x75643120]  ;;  %v2757_v1 = vor.u32 %v2756_v54, %v2753_v17  ;;  %v2762_v29 = vrot.slane %v2760_v23, 7  ;;  %v6025_v9 = vsel %vm5868_vm3, %v4380_v10, %v2806_v41  ;;  %3643 = vmatpush.bf16.msra.mxu2 %v4854_v36  ;;  %3666 = vmatpush.bf16.msrb.mxu1 %v4875_v11  ;;  %v4882_v54 = vld [vmem:[%s6284_s5 + $0x1a8] sm:$0xff]  ;;  %v4872_v23 = vld [vmem:[%s6284_s5 + $0x158] sm:$0xff] }
 0x304   : > { %2771 = vst [vmem:[#allocation1 + $0x10] ss:$2 sm:$0xff] %v5975_v0  ;;  %v5995_v53 = vld [vmem:[#allocation4 + $0x10] sm:$0x7]  ;;  %v4892_v41 = vld [vmem:[%s6284_s5 + $0x1f8] sm:$0xff] }
 0x305   : > { %v2758_v56 = vrot.slane %v2757_v1, 2  ;;  %2674 = vst [vmem:[#allocation5 + $0x24] sm:$0xf] %v2670_v27  ;;  %v2840_v19 = vrot.slane %v5995_v53, 2  ;;  %v4900_v10 = vld [vmem:[%s6284_s5 + $0x238] sm:$0xff] }
 0x306   : > { %v2867_v55 = vld.sshfl [vmem:[#allocation1] sm:$0xff pattern:$0x75643120] }
 0x307   : > { %v5989_v33 = vsel %vm5825_vm4, %v2758_v56, %v2762_v29  ;;  %v6034_v16 = vsel %vm2683_vm9, %v5995_v53, %v2840_v19  ;;  %2871 = vst [vmem:[#allocation5 + $0x10] sm:$0xf] %v2867_v55  ;;  %v6057_v25 = vsel %vm2686_vm11, %v5995_v53, %v2840_v19  ;;  %3644 = vmatpush.bf16.msra.mxu2 %v4853_v22  ;;  %v4899_v55 = vld [vmem:[%s6284_s5 + $0x230] sm:$0xff] }
 0x308   : > { %2774 = vst [vmem:[#allocation1 + $0x11] ss:$2 sm:$0xff] %v5989_v33  ;;  %v2846_v21 = vshrl.u32 %v6034_v16, 16  ;;  %v2849_v58 = vshll.u32 %v6034_v16, 16  ;;  %v2845_v39 = vrot.slane %v6057_v25, 2 }
 0x309   : > { %2878 = vst [vmem:[#allocation1] ss:$2 sm:$0xff] %v5878_v15  ;;  %v4874_v15 = vld [vmem:[%s6284_s5 + $0x168] sm:$0xff] }
 0x30a   : > { %2880 = vst [vmem:[#allocation1 + $0x1] ss:$2 sm:$0xff] %v6018_v5  ;;  %v2848_v45 = vrot.slane %v2846_v21, 6  ;;  %v2851_v47 = vrot.slane %v2849_v58, 7  ;;  %3667 = vmatpush.bf16.msrb.mxu1 %v4874_v15  ;;  %v2855_v17 = vshll.u32 %v2845_v39, 16  ;;  %v4890_v21 = vld [vmem:[%s6284_s5 + $0x1e8] sm:$0xff] }
 0x30b   : > { %3679 = vmatpush.bf16.msrb.mxu2 %v4884_v24  ;;  %v4877_v58 = vld [vmem:[%s6284_s5 + $0x180] sm:$0xff] }
 0x30c   : > { %v4824_v8 = vld [vmem:[#allocation5 + $0x20] sm:$0xf0]  ;;  %v2852_v37 = vor.u32 %v2851_v47, %v2848_v45  ;;  %v2857_v27 = vrot.slane %v2855_v17, 7  ;;  %v4889_v47 = vld [vmem:[%s6284_s5 + $0x1e0] sm:$0xff] }
 0x30d   : > { %v4386_v31 = vor.u32 %v4824_v8, %v4385_v32  ;;  %v2876_v32 = vrot.slane %v2845_v39, 7  ;;  %v4821_v8 = vld [vmem:[#allocation5 + $0xc] sm:$0xf]  ;;  %v4897_v39 = vld [vmem:[%s6284_s5 + $0x220] sm:$0xff] }
 0x30e   : > { %3668 = vmatpush.bf16.msrb.mxu1 %v4873_v2  ;;  %v2853_v61 = vrot.slane %v2852_v37, 2  ;;  %v4401_v25 = vld [vmem:[#allocation5 + $0x10] sm:$0xf] }
 0x30f   : > { %v2776_v40 = vld.sshfl [vmem:[#allocation1 + $0x10] sm:$0xff pattern:$0x75643120]  ;;  %3603 = vmatmul.bf16.vlgmr.msra.gmra.mxu3 %v4386_v31  ;;  %3680 = vmatpush.bf16.msrb.mxu2 %v4883_v28  ;;  %v6128_v31 = vsel %vm2683_vm9, %v6102_v43, %v2907_v18 }
 0x310   : > { %2815 = vst [vmem:[#allocation1 + $0x10] ss:$2 sm:$0xff] %v6018_v5  ;;  %3651 = vmatpush.bf16.msra.mxu3 %v4868_v14  ;;  %v6096_v29 = vsel %vm5825_vm4, %v2853_v61, %v2857_v27  ;;  %v2916_v36 = vshll.u32 %v6128_v31, 16  ;;  %v4886_v61 = vld [vmem:[%s6284_s5 + $0x1c8] sm:$0xff] }
 0x311   : > { %2818 = vst [vmem:[#allocation1 + $0x11] ss:$2 sm:$0xff] %v6025_v9  ;;  %v2886_v60 = vld.sshfl [vmem:[#allocation1] sm:$0xff pattern:$0x75643120] }
 0x312   : > { %2780 = vst [vmem:[#allocation5 + $0x28] sm:$0xf] %v2776_v40  ;;  %3669 = vmatpush.bf16.msrb.mxu1 %v4872_v23  ;;  %v2918_v24 = vrot.slane %v2916_v36, 7  ;;  %v4895_v23 = vld [vmem:[%s6284_s5 + $0x210] sm:$0xff] }
 0x313   : > { %2890 = vst [vmem:[#allocation5 + $0x14] sm:$0xf] %v2886_v60  ;;  %3681 = vmatpush.bf16.msrb.mxu2 %v4882_v54 }
 0x314   : > { %3652 = vmatpush.bf16.msra.mxu3 %v4867_v63  ;;  %2892 = vst [vmem:[#allocation1] ss:$2 sm:$0xff] %v5884_v34  ;;  %v4881_v34 = vld [vmem:[%s6284_s5 + $0x1a0] sm:$0xff]  ;;  %v2913_v63 = vshrl.u32 %v6128_v31, 16 }
 0x315   : > { %2894 = vst [vmem:[#allocation1 + $0x1] ss:$2 sm:$0xff] %v5927_v35 }
 0x316   : > { %v2915_v22 = vrot.slane %v2913_v63, 6 }
 0x317   : > { %3682 = vmatpush.bf16.msrb.mxu2 %v4881_v34 }
 0x318   : > { %v2820_v42 = vld.sshfl [vmem:[#allocation1 + $0x10] sm:$0xff pattern:$0x75643120]  ;;  %3653 = vmatpush.bf16.msra.mxu3 %v4866_v38 }
 0x319   : > { %2829 = vst [vmem:[#allocation1 + $0x10] ss:$2 sm:$0xff] %v5927_v35  ;;  %v4387_v26 = vld [vmem:[#allocation5 + $0x24] sm:$0xf0]  ;;  %v4871_v35 = vld [vmem:[%s6284_s5 + $0x150] sm:$0xff] }
 0x31a   : > { %2824 = vst [vmem:[#allocation5 + $0x2c] sm:$0xf] %v2820_v42  ;;  %v4390_v20 = vor.u32 %v4820_v49, %v4387_v26  ;;  %3670 = vmatpush.bf16.msrb.mxu1 %v4871_v35  ;;  %v4898_v42 = vld [vmem:[%s6284_s5 + $0x228] sm:$0xff]  ;;  %v4888_v26 = vld [vmem:[%s6284_s5 + $0x1d8] sm:$0xff]  ;;  %v4887_v49 = vld [vmem:[%s6284_s5 + $0x1d0] sm:$0xff] }
 0x31b   : > { %2832 = vst [vmem:[#allocation1 + $0x11] ss:$2 sm:$0xff] %v5995_v53  ;;  %3683 = vmatpush.bf16.msrb.mxu2 %v4880_v52 }
 0x31c   : > { %3654 = vmatpush.bf16.msra.mxu3 %v4865_v46  ;;  %v2900_v3 = vld.sshfl [vmem:[#allocation1] sm:$0xff pattern:$0x75643120] }
 0x31d   : > { %2904 = vst [vmem:[#allocation5 + $0x18] sm:$0xf] %v2900_v3 }
 0x31e   : > { %2926 = vst [vmem:[#allocation1] ss:$2 sm:$0xff] %v5975_v0  ;;  %3671 = vmatpush.bf16.msrb.mxu1 %v4870_v7  ;;  %v4869_v0 = vld [vmem:[%s6284_s5 + $0x140] sm:$0xff] }
 0x31f   : > { %3617 = vmatmul.bf16.vlgmr.msrb.gmra.mxu3 %v4390_v20  ;;  %2928 = vst [vmem:[#allocation1 + $0x1] ss:$2 sm:$0xff] %v5989_v33  ;;  %3684 = vmatpush.bf16.msrb.mxu2 %v4879_v44 }
 0x320   : > { %3655 = vmatpush.bf16.msra.mxu3 %v4864_v51  ;;  %v4822_v51 = vld [vmem:[#allocation5 + $0x14] sm:$0xf] }
 0x321   : > { %v4825_v62 = vld [vmem:[#allocation5 + $0x28] sm:$0xf0] }
 0x322   : > { %v4394_v1 = vor.u32 %v4825_v62, %v4393_v59  ;;  %v2834_v56 = vld.sshfl [vmem:[#allocation1 + $0x10] sm:$0xff pattern:$0x75643120]  ;;  %3672 = vmatpush.bf16.msrb.mxu1 %v4869_v0  ;;  %v4382_v59 = vrot.slane %v6128_v31, 9  ;;  %v4957_v0 = vld [vmem:[%s6285_s6] ss:$0 sm:$0xff] }
 0x323   : > { %2838 = vst [vmem:[#allocation5 + $0x30] sm:$0xf] %v2834_v56  ;;  %3685 = vmatpush.bf16.msrb.mxu2 %v4878_v30  ;;  %v4893_v56 = vld [vmem:[%s6284_s5 + $0x200] sm:$0xff] }
 0x324   : > { %3631 = vmatmul.bf16.vlgmr.msra.gmra.mxu1 %v4394_v1  ;;  %3656 = vmatpush.bf16.msra.mxu3 %v4863_v57  ;;  %2863 = vst [vmem:[#allocation1 + $0x10] ss:$2 sm:$0xff] %v5989_v33  ;;  %v4381_v33 = vrot.slane %v6034_v16, 9  ;;  %v2910_v16 = vsel %vm2686_vm11, %v6102_v43, %v2907_v18  ;;  %v4885_v57 = vld [vmem:[%s6284_s5 + $0x1c0] sm:$0xff]  ;;  %v4409_v27 = vld [vmem:[#allocation5 + $0x18] sm:$0xf] }
 0x325   : > { %2866 = vst [vmem:[#allocation1 + $0x11] ss:$2 sm:$0xff] %v6096_v29  ;;  %v2912_v38 = vrot.slane %v2910_v16, 2 }
 0x326   : > { %v6139_v40 = vsel %vm5868_vm3, %v4381_v33, %v2876_v32  ;;  %3707 = vmatpush.bf16.msra.mxu1 %v4900_v10  ;;  %v2934_v11 = vld.sshfl [vmem:[#allocation1] sm:$0xff pattern:$0x75643120] }
 0x327   : > { %2938 = vst [vmem:[#allocation5 + $0x1c] sm:$0xf] %v2934_v11  ;;  %3686 = vmatpush.bf16.msrb.mxu2 %v4877_v58  ;;  %v2943_v62 = vrot.slane %v2912_v38, 7 }
 0x328   : > { %3657 = vmatpush.bf16.msra.mxu3 %v4862_v4  ;;  %2945 = vst [vmem:[#allocation1] ss:$2 sm:$0xff] %v6018_v5  ;;  %v2919_v5 = vor.u32 %v2918_v24, %v2915_v22 }
 0x329   : > { %2947 = vst [vmem:[#allocation1 + $0x1] ss:$2 sm:$0xff] %v6025_v9  ;;  %v2944_v35 = vsel %vm5868_vm3, %v4382_v59, %v2943_v62 }
 0x32a   : > { %v4395_v14 = vld [vmem:[#allocation5 + $0x2c] sm:$0xf0]  ;;  %3708 = vmatpush.bf16.msra.mxu1 %v4899_v55  ;;  %v2920_v2 = vrot.slane %v2919_v5, 2 }
 0x32b   : > { %v4398_v19 = vor.u32 %v4821_v8, %v4395_v14 }
 0x32c   : > { %3658 = vmatpush.bf16.msra.mxu3 %v4861_v13  ;;  %v2868_v50 = vld.sshfl [vmem:[#allocation1 + $0x10] sm:$0xff pattern:$0x75643120] }
 0x32d   : > { %3645 = vmatmul.bf16.vlgmr.msra.gmra.mxu2 %v4398_v19  ;;  %2872 = vst [vmem:[#allocation5 + $0x34] sm:$0xf] %v2868_v50 }
 0x32e   : > { %2882 = vst [vmem:[#allocation1 + $0x10] ss:$2 sm:$0xff] %v6025_v9  ;;  %v2922_v9 = vshll.u32 %v2912_v38, 16  ;;  %3709 = vmatpush.bf16.msra.mxu1 %v4898_v42  ;;  %v4823_v4 = vld [vmem:[#allocation5 + $0x1c] sm:$0xf] }
 0x32f   : > { %2885 = vst [vmem:[#allocation1 + $0x11] ss:$2 sm:$0xff] %v6139_v40 }
 0x330   : > { %3693 = vmatpush.bf16.msrb.mxu3 %v4892_v41  ;;  %v2953_v28 = vld.sshfl [vmem:[#allocation1] sm:$0xff pattern:$0x75643120]  ;;  %v2924_v37 = vrot.slane %v2922_v9, 7 }
 0x331   : > { %2957 = vst [vmem:[#allocation5 + $0x20] sm:$0xf] %v2953_v28 }
 0x332   : > { %3710 = vmatpush.bf16.msra.mxu1 %v4897_v39  ;;  %v2925_v54 = vsel %vm5825_vm4, %v2920_v2, %v2924_v37 }
 0x334   : > { %3694 = vmatpush.bf16.msrb.mxu3 %v4891_v48  ;;  %v4826_v15 = vld [vmem:[#allocation5 + $0x30] sm:$0xf0] }
 0x335   : > { %v4402_v45 = vor.u32 %v4826_v15, %v4401_v25 }
 0x336   : > { %v2887_v46 = vld.sshfl [vmem:[#allocation1 + $0x10] sm:$0xff pattern:$0x75643120] }
 0x337   : > { %3659 = vmatmul.bf16.vlgmr.msra.gmra.mxu3 %v4402_v45  ;;  %2891 = vst [vmem:[#allocation5 + $0x38] sm:$0xf] %v2887_v46 }
 0x338   : > { %3695 = vmatpush.bf16.msrb.mxu3 %v4890_v21  ;;  %2896 = vst [vmem:[#allocation1 + $0x10] ss:$2 sm:$0xff] %v5995_v53  ;;  %v4896_v53 = vld [vmem:[%s6284_s5 + $0x218] sm:$0xff]  ;;  %v4417_v7 = vld [vmem:[#allocation5 + $0x20] sm:$0xf] }
 0x339   : > { %2899 = vst [vmem:[#allocation1 + $0x11] ss:$2 sm:$0xff] %v6102_v43  ;;  %3711 = vmatpush.bf16.msra.mxu1 %v4896_v53 }
 0x33c   : > { %3696 = vmatpush.bf16.msrb.mxu3 %v4889_v47 }
 0x33d   : > { %3712 = vmatpush.bf16.msra.mxu1 %v4895_v23 }
 0x33e   : > { %v4403_v60 = vld [vmem:[#allocation5 + $0x34] sm:$0xf0] }
 0x33f   : > { %v4406_v20 = vor.u32 %v4822_v51, %v4403_v60 }
 0x340   : > { %3697 = vmatpush.bf16.msrb.mxu3 %v4888_v26  ;;  %v2901_v17 = vld.sshfl [vmem:[#allocation1 + $0x10] sm:$0xff pattern:$0x75643120] }
 0x341   : > { %3673 = vmatmul.bf16.vlgmr.msrb.gmra.mxu1 %v4406_v20  ;;  %2905 = vst [vmem:[#allocation5 + $0x3c] sm:$0xf] %v2901_v17 }
 0x342   : > { %2930 = vst [vmem:[#allocation1 + $0x10] ss:$2 sm:$0xff] %v6096_v29  ;;  %3713 = vmatpush.bf16.msra.mxu1 %v4894_v6 }
 0x343   : > { %2933 = vst [vmem:[#allocation1 + $0x11] ss:$2 sm:$0xff] %v2925_v54 }
 0x344   : > { %3698 = vmatpush.bf16.msrb.mxu3 %v4887_v49 }
 0x346   : > { %3714 = vmatpush.bf16.msra.mxu1 %v4893_v56 }
 0x348   : > { %3699 = vmatpush.bf16.msrb.mxu3 %v4886_v61  ;;  %v4827_v1 = vld [vmem:[#allocation5 + $0x38] sm:$0xf0] }
 0x349   : > { %v4410_v34 = vor.u32 %v4827_v1, %v4409_v27  ;;  %v3769_v27 = vld [vmem:[#allocation6] sm:$0x1] }
 0x34a   : > { %v2935_v29 = vld.sshfl [vmem:[#allocation1 + $0x10] sm:$0xff pattern:$0x75643120] }
 0x34b   : > { %3687 = vmatmul.bf16.vlgmr.msrb.gmra.mxu2 %v4410_v34  ;;  %2939 = vst [vmem:[#allocation5 + $0x40] sm:$0xf] %v2935_v29 }
 0x34c   : > { %3700 = vmatpush.bf16.msrb.mxu3 %v4885_v57  ;;  %2949 = vst [vmem:[#allocation1 + $0x10] ss:$2 sm:$0xff] %v6139_v40 }
 0x34d   : > { %2952 = vst [vmem:[#allocation1 + $0x11] ss:$2 sm:$0xff] %v2944_v35 }
 0x352   : > { %v4411_v43 = vld [vmem:[#allocation5 + $0x3c] sm:$0xf0] }
 0x353   : > { %v4414_v52 = vor.u32 %v4823_v4, %v4411_v43 }
 0x354   : > { %v2954_v3 = vld.sshfl [vmem:[#allocation1 + $0x10] sm:$0xff pattern:$0x75643120] }
 0x355   : > { %3701 = vmatmul.bf16.vlgmr.msrb.gmra.mxu3 %v4414_v52  ;;  %2958 = vst [vmem:[#allocation5 + $0x44] sm:$0xf] %v2954_v3 }
 0x35c   : > { %v4828_v18 = vld [vmem:[#allocation5 + $0x40] sm:$0xf0] }
 0x35d   : > { %v4418_v13 = vor.u32 %v4828_v18, %v4417_v7 }
 0x35f   : > { %3715 = vmatmul.bf16.vlgmr.msra.gmra.mxu1 %v4418_v13 }
 0x392   : > { %v3604_v41 = vpop.f32.mrf.mxu3 }
 0x393   : > { %v3605_v33 = vadd.f32 %v4957_v0, %v3604_v41 }
 0x39a   : > { %v3606_v12 = vpop.f32.mrf.mxu3 }
 0x39b   : > { %v3607_v30 = vadd.f32 %v4957_v0, %v3606_v12 }
 0x3a1   : > { %v3632_v8 = vpop.f32.mrf.mxu1 }
 0x3a2   : > { %v3618_v32 = vpop.f32.mrf.mxu3 }
 0x3a3   : > { %v3619_v50 = vadd.f32 %v3618_v32, %v3605_v33  ;;  %v4908_v33 = vld [vmem:[%s6286_s7 + $0x38] sm:$0xff] }
 0x3a4   : > { %3881 = vmatpush.bf16.msra.mxu2 %v4908_v33 }
 0x3a5   : > { %v3633_v40 = vadd.f32 %v3632_v8, %v3619_v50  ;;  %v4907_v50 = vld [vmem:[%s6286_s7 + $0x30] sm:$0xff] }
 0x3a8   : > { %3882 = vmatpush.bf16.msra.mxu2 %v4907_v50 }
 0x3a9   : > { %v3634_v19 = vpop.f32.mrf.mxu1 }
 0x3aa   : > { %v3620_v14 = vpop.f32.mrf.mxu3 }
 0x3ab   : > { %v3621_v36 = vadd.f32 %v3620_v14, %v3607_v30 }
 0x3ad   : > { %v3635_v58 = vadd.f32 %v3634_v19, %v3621_v36  ;;  %v4903_v36 = vld [vmem:[%s6286_s7 + $0x10] sm:$0xff] }
 0x3b0   : > { %v3646_v44 = vpop.f32.mrf.mxu2 }
 0x3b1   : > { %v3647_v63 = vadd.f32 %v3646_v44, %v3633_v40 }
 0x3b8   : > { %v3648_v10 = vpop.f32.mrf.mxu2 }
 0x3b9   : > { %v3649_v22 = vadd.f32 %v3648_v10, %v3635_v58  ;;  %v4906_v10 = vld [vmem:[%s6286_s7 + $0x28] sm:$0xff] }
 0x3ba   : > { %v3660_v31 = vpop.f32.mrf.mxu3  ;;  %3883 = vmatpush.bf16.msra.mxu2 %v4906_v10 }
 0x3bb   : > { %v3661_v55 = vadd.f32 %v3660_v31, %v3647_v63 }
 0x3be   : > { %v3674_v48 = vpop.f32.mrf.mxu1 }
 0x3bf   : > { %v3675_v38 = vadd.f32 %v3674_v48, %v3661_v55  ;;  %v4905_v48 = vld [vmem:[%s6286_s7 + $0x20] sm:$0xff]  ;;  %v4902_v55 = vld [vmem:[%s6286_s7 + $0x8] sm:$0xff] }
 0x3c0   : > { %3884 = vmatpush.bf16.msra.mxu2 %v4905_v48 }
 0x3c2   : > { %v3662_v16 = vpop.f32.mrf.mxu3 }
 0x3c3   : > { %v3663_v15 = vadd.f32 %v3662_v16, %v3649_v22  ;;  %v4904_v16 = vld [vmem:[%s6286_s7 + $0x18] sm:$0xff] }
 0x3c4   : > { %3885 = vmatpush.bf16.msra.mxu2 %v4904_v16 }
 0x3c6   : > { %v3676_v21 = vpop.f32.mrf.mxu1 }
 0x3c7   : > { %v3677_v46 = vadd.f32 %v3676_v21, %v3663_v15 }
 0x3c8   : > { %3886 = vmatpush.bf16.msra.mxu2 %v4903_v36 }
 0x3cc   : > { %3887 = vmatpush.bf16.msra.mxu2 %v4902_v55 }
 0x3ce   : > { %v3688_v11 = vpop.f32.mrf.mxu2 }
 0x3cf   : > { %v3689_v24 = vadd.f32 %v3688_v11, %v3675_v38  ;;  %v4901_v11 = vld [vmem:[%s6286_s7] sm:$0xff] }
 0x3d0   : > { %3888 = vmatpush.bf16.msra.mxu2 %v4901_v11 }
 0x3d6   : > { %v3690_v45 = vpop.f32.mrf.mxu2 }
 0x3d7   : > { %v3691_v9 = vadd.f32 %v3690_v45, %v3677_v46 }
 0x3d8   : > { %v3702_v25 = vpop.f32.mrf.mxu3 }
 0x3d9   : > { %v3703_v42 = vadd.f32 %v3702_v25, %v3689_v24 }
 0x3dc   : > { %v3716_v47 = vpop.f32.mrf.mxu1 }
 0x3dd   : > { %v3717_v5 = vadd.f32 %v3716_v47, %v3703_v42  ;;  %v3832_v42 = vld [vmem:[%s6287_s8] sm:$0x1] }
 0x3df   : > { %v3723_v39 = vrot.slane %v3717_v5, 4 }
 0x3e0   : > { %v3704_v26 = vpop.f32.mrf.mxu3 }
 0x3e1   : > { %v3727_v28 = vmax.f32 %v3717_v5, %v3723_v39  ;;  %v3705_v2 = vadd.f32 %v3704_v26, %v3691_v9 }
 0x3e3   : > { %v3731_v37 = vrot.slane %v3727_v28, 2 }
 0x3e4   : > { %v3718_v53 = vpop.f32.mrf.mxu1 }
 0x3e5   : > { %v3733_v49 = vsel %vm2683_vm9, %v3727_v28, %v3731_v37  ;;  %v3734_v51 = vsel %vm2686_vm11, %v3727_v28, %v3731_v37  ;;  %v3719_v60 = vadd.f32 %v3718_v53, %v3705_v2 }
 0x3e6   : > { %v3735_v20 = vrot.slane %v3734_v51, 2  ;;  %v4707_v17 = vrot.slane %v3733_v49, 9 }
 0x3e7   : > { %v3724_v54 = vrot.slane %v3719_v60, 4 }
 0x3e8   : > { %v3755_v23 = vmax.f32 %v3733_v49, %v4707_v17  ;;  %v4708_v61 = vrot.slane %v3735_v20, 9 }
 0x3e9   : > { %v3728_v6 = vmax.f32 %v3719_v60, %v3724_v54 }
 0x3ea   : > { %v3759_v57 = vmax.f32 %v3755_v23, 0.0  ;;  %v3756_v59 = vmax.f32 %v3735_v20, %v4708_v61 }
 0x3eb   : > { %v3732_v62 = vrot.slane %v3728_v6, 2 }
 0x3ec   : > { %v3763_v1 = vpack.c.bf16 %v3759_v57, %v3759_v57  ;;  %v3760_v56 = vmax.f32 %v3756_v59, 0.0 }
 0x3ed   : > { %v3736_v34 = vsel %vm2683_vm9, %v3728_v6, %v3732_v62  ;;  %v3737_v35 = vsel %vm2686_vm11, %v3728_v6, %v3732_v62  ;;  %vm3796_vm9 = vcmask 778752  }
 0x3ee   : > { %v3738_v29 = vrot.slane %v3737_v35, 2  ;;  %v4709_v4 = vrot.slane %v3736_v34, 9  ;;  %v3764_v43 = vpack.c.bf16 %v3760_v56, %v3760_v56  ;;  %v3770_v52 = vsel %vm3768_vm6, %v3763_v1, %v3769_v27  ;;  %vm3797_vm11 = vmand %vm3796_vm9, %vm1419_vm8 }
 0x3ef   : > { %3771 = vst [vmem:[#allocation6] sm:$0x1] %v3770_v52 }
 0x3f0   : > { %v3773_v3 = vrot.slane %v3764_v43, 3  ;;  %v3757_v7 = vmax.f32 %v3736_v34, %v4709_v4  ;;  %v4710_v18 = vrot.slane %v3738_v29, 9 }
 0x3f2   : > { %v3777_v13 = vsel %vm2785_vm13, %v3764_v43, %v3773_v3  ;;  %v3761_v41 = vmax.f32 %v3757_v7, 0.0  ;;  %v3758_v12 = vmax.f32 %v3738_v29, %v4710_v18 }
 0x3f3   : > { %3779 = vrot.lane.b32.xlu2 %v3777_v13, %s5026_s25  ;;  %s324_s25 = scalar_lea.vmem [#allocation7], %s323_s16 }
 0x3f4   : > { %v3765_v32 = vpack.c.bf16 %v3761_v41, %v3761_v41  ;;  %v3762_v8 = vmax.f32 %v3758_v12, 0.0 }
 0x3f6   : > { %v3788_v14 = vrot.slane %v3765_v32, 3  ;;  %v3766_v44 = vpack.c.bf16 %v3762_v8, %v3762_v8  ;;  %v3784_v30 = vld [vmem:[#allocation6] sm:$0x1] }
 0x3f8   : > { %v3791_v19 = vsel %vm2785_vm13, %v3765_v32, %v3788_v14  ;;  %v3802_v0 = vrot.slane %v3766_v44, 3 }
 0x3f9   : > { %3793 = vrot.lane.b32.xlu0 %v3791_v19, %s5025_s22  ;;  %s4979_s22 = scalar_lea.hbm %s6288_s9, 2 }
 0x3fa   : > { %v3805_v31 = vsel %vm2785_vm13, %v3766_v44, %v3802_v0  ;;  %p4981_p1 = scmp.lt.s32.totalorder %s4979_s22, %s4975_s14 }
 0x3fb   : > { %3807 = vrot.lane.b32.xlu1 %v3805_v31, %s5027_s26  ;;  %s3908_s26 = sshll.u32 %s324_s25, 4  ;;  %s3909_s26 = int_to_ptr.vmem [resolvable:$true] %s3908_s26 }
 0x3fc   : > { %p4982_p2 = por %p4981_p1, %p4980_p0 }
 0x3fe   : > { %p4983_p3 = pnand %p4982_p2, %p4978_p13 }
 0x44d   : > { %v3780_v40 = vpop.permute.xlu2 %3779 }
 0x44e   : > { %v3785_v63 = vsel %vm3783_vm10, %v3780_v40, %v3784_v30 }
 0x44f   : > { %3786 = vst [vmem:[#allocation6] sm:$0x1] %v3785_v63 }
 0x456   : > { %v3798_v58 = vld [vmem:[#allocation6] sm:$0x1] }
 0x46b   : > { %v3794_v21 = vpop.permute.xlu0 %3793 }
 0x46c   : > { %v3799_v38 = vsel %vm3797_vm11, %v3794_v21, %v3798_v58 }
 0x46d   : > { %3800 = vst [vmem:[#allocation6] sm:$0x1] %v3799_v38  ;;  %v3808_v22 = vpop.permute.xlu1 %3807 }
 0x474   : > { %v3812_v24 = vld [vmem:[#allocation6] sm:$0x1] }
 0x475   : > { %v3813_v25 = vsel %vm3811_vm12, %v3808_v22, %v3812_v24 }
 0x476   : > { %3814 = vst [vmem:[#allocation6] sm:$0x1] %v3813_v25 }
 0x47d   : > { %v3815_v15 = vld [vmem:[#allocation6] sm:$0x1] }
 0x47e   : > { %3889 = vmatmul.bf16.vlgmr.msra.gmra.mxu2 %v3815_v15 }
 0x501   : > { %v3890_v45 = vpop.f32.mrf.mxu2 }
 0x502   : > { %v3891_v47 = vadd.f32 %v3890_v45, %v3832_v42 }
 0x504   : > { %v3894_v46 = vmax.f32 %v3891_v47, 0.0 }
 0x506   : > { %3896 = vst.msk [vmem:[%s324_s25] sm:$0x1] %vm3767_vm5, %v3894_v46 }
 0x507   : > { %4986 = shalt.err (!%p4983_p3)
}
 0x508   : > { %4911 = dma.vmem_to_hbm [thread:$0]  (%p5116_p5), %s3909_s26, 16, %s3911_s27, %s3898_s28  }
 0x509   : > { %v3892_v5 = vpop.f32.mrf.mxu2 }
 0x50a PF: > { %p4917_p4 = scmp.ge.s32.totalorder %s5021_s12, 2  ;;  %s3922_s16 = sand.u32 1, %s5009_s30  }
 0x50b   : > { %s3923_s24 = scalar_lea.sflag [#allocation8], %s3922_s16 }
 0x50c   : > { %p4914_p7 = pnand %p4917_p4, %p5120_p6 }
 0x50e   : > { %p4915_p8 = pneg %p4914_p7 }
 0x510   : > { %5004 = dma.done.wait (%p4915_p8), %s3923_s24, 16  }
 0x511   : > { %5006 = vsyncadd (%p4915_p8), %s3923_s24, 4294967280  ;;  %p19_p9 = scmp.ge.s32.totalorder %s5103_s15, 4   ;;  %s6307_s30 = smov %s5013_s10 }
 0x512   : > { %s6308_s10 = smov %s5017_s11  ;;  %s6309_s11 = smov %s5114_s18 }
 0x513   : > { %s6310_s12 = smov %s5103_s15  ;;  %21 = sbr.rel (!%p19_p9) target bundleno = 3 (0x3), region = 120 }
 0x518   :  { %3928 = vsyncpa [#allocation8], 1 }
 0x519   :  { %3930 = vsyncpa [#allocation8 + $0x1], 1 }

</bundles_post_ra>
